<compile_context>
chip_gen: v7x
topology: tpu7x:2x2x1
jax: 0.10.0
libtpu: 0.0.40
codegen_flags: <defaults>
</compile_context>

<pallas_src>
import math
import functools

import jax
import jax.numpy as jnp
from jax.experimental import pallas as pl
from jax.experimental.pallas import tpu as pltpu


# ----------------------------- kernel helpers ------------------------------

def _layer_norm(x, g_ref, b_ref, eps=1e-5):
    mu = jnp.mean(x, axis=-1, keepdims=True)
    var = jnp.mean((x - mu) ** 2, axis=-1, keepdims=True)
    return (x - mu) * jax.lax.rsqrt(var + eps) * g_ref[...] + b_ref[...]


def _linear_bf16(x_f32, w_ref, b_ref):
    # bf16 MXU matmul with f32 accumulation; bias added in f32.
    return jnp.dot(x_f32.astype(jnp.bfloat16), w_ref[...],
                   preferred_element_type=jnp.float32) + b_ref[...]


def _attention(q, k, v, key_masked, bblk, nq, nk, head, hs):
    """Multi-head attention core (projections already applied).

    q: (bblk*nq, H*hs) f32, already scaled by 1/sqrt(hs)
    k, v: (bblk*nk, H*hs) f32
    key_masked: (bblk, 1, nk) bool, True == masked key position
    returns (bblk*nq, H*hs) f32
    """
    qb = q.reshape(bblk, nq, head * hs).astype(jnp.bfloat16)
    kb = k.reshape(bblk, nk, head * hs).astype(jnp.bfloat16)
    vb = v.reshape(bblk, nk, head * hs).astype(jnp.bfloat16)

    outs = []
    for h in range(head):                      # static unroll, no head transposes
        sl = slice(h * hs, (h + 1) * hs)
        s = jnp.einsum("bqd,bkd->bqk", qb[:, :, sl], kb[:, :, sl],
                       preferred_element_type=jnp.float32)
        # exact masked_fill semantics (fully-masked rows -> uniform softmax)
        s = jnp.where(key_masked, -65504.0, s)
        s = s - jnp.max(s, axis=-1, keepdims=True)
        p = jnp.exp(s)
        p = p * pl.reciprocal(jnp.sum(p, axis=-1, keepdims=True), approx=True)
        outs.append(jnp.einsum("bqk,bkd->bqd", p.astype(jnp.bfloat16),
                               vb[:, :, sl],
                               preferred_element_type=jnp.float32))
    out = jnp.concatenate(outs, axis=-1)       # (bblk, nq, H*hs)
    return out.reshape(bblk * nq, head * hs)


# ------------------------------- the kernel --------------------------------

def decoder_dct_kernel(
    x_ref, y_ref, xm_ref, ym_ref,
    # mhatt1 (self-attention): fused QKV + merge
    wqkv1, bqkv1, wm1, bm1,
    # mhatt2 (cross-attention): Q from x, fused KV from y, merge
    wq2, bq2, wkv2, bkv2, wm2, bm2,
    # FFN
    wf1, bf1, wf2, bf2,
    # LayerNorms
    g1, be1, g2, be2, g3, be3,
    o_ref,
    *, head, head_size,
):
    bblk, nx, d = x_ref.shape
    ny = y_ref.shape[1]
    inv_scale = 1.0 / math.sqrt(head_size)

    x = x_ref[...].reshape(bblk * nx, d)       # (Rx, D) f32
    y = y_ref[...].reshape(bblk * ny, d)       # (Ry, D) f32
    x_masked = xm_ref[...] > 0.5               # (bblk, 1, nx) bool (hoisted compare)
    y_masked = ym_ref[...] > 0.5               # (bblk, 1, ny) bool

    # --- block 1: self-attention + residual + LN ---
    qkv = _linear_bf16(x, wqkv1, bqkv1)        # (Rx, 3D)  fused Q/K/V projection
    q = qkv[:, 0:d] * inv_scale                # fold 1/sqrt(hs) into q
    k = qkv[:, d:2 * d]
    v = qkv[:, 2 * d:3 * d]
    att = _attention(q, k, v, x_masked, bblk, nx, nx, head, head_size)
    att = _linear_bf16(att, wm1, bm1)
    x = _layer_norm(x + att, g1, be1)

    # --- block 2: cross-attention (k, v from y) + residual + LN ---
    q = _linear_bf16(x, wq2, bq2) * inv_scale
    kv = _linear_bf16(y, wkv2, bkv2)           # (Ry, 2D)  fused K/V projection
    k = kv[:, 0:d]
    v = kv[:, d:2 * d]
    att = _attention(q, k, v, y_masked, bblk, nx, ny, head, head_size)
    att = _linear_bf16(att, wm2, bm2)
    x = _layer_norm(x + att, g2, be2)

    # --- block 3: position-wise FFN + residual + LN ---
    h = jnp.maximum(_linear_bf16(x, wf1, bf1), 0.0)   # ReLU
    ffn = _linear_bf16(h, wf2, bf2)
    x = _layer_norm(x + ffn, g3, be3)

    o_ref[...] = x.reshape(bblk, nx, d)


# ------------------------------ host wrapper -------------------------------

def decoder_dct_forward(x, y, x_mask, y_mask, params, *, head, block_b=None):
    """x: (B, Nx, D), y: (B, Ny, D), x_mask: (B, 1, Nx), y_mask: (B, 1, Ny)."""
    (q1w, q1b, k1w, k1b, v1w, v1b, m1w, m1b,
     q2w, q2b, k2w, k2b, v2w, v2b, m2w, m2b,
     f1w, f1b, f2w, f2b, g1, be1, g2, be2, g3, be3) = params

    B, Nx, D = x.shape
    Ny = y.shape[1]
    head_size = D // head     # == hidden_dim/8 for the module's default head=8

    bblk = B if block_b is None else block_b
    assert B % bblk == 0, "batch must be divisible by the batch block"

    bf16 = jnp.bfloat16
    fused_params = [
        # self-attention: fused QKV weight / bias, merge
        jnp.concatenate([q1w, k1w, v1w], axis=1).astype(bf16),   # (D, 3D)
        jnp.concatenate([q1b, k1b, v1b], axis=1),                # (1, 3D) f32
        m1w.astype(bf16), m1b,
        # cross-attention: Q, fused KV, merge
        q2w.astype(bf16), q2b,
        jnp.concatenate([k2w, v2w], axis=1).astype(bf16),        # (D, 2D)
        jnp.concatenate([k2b, v2b], axis=1),                     # (1, 2D) f32
        m2w.astype(bf16), m2b,
        # FFN
        f1w.astype(bf16), f1b, f2w.astype(bf16), f2b,
        # LayerNorms (f32)
        g1, be1, g2, be2, g3, be3,
    ]

    seq_specs = [
        pl.BlockSpec((bblk, Nx, D), lambda i: (i, 0, 0)),   # x
        pl.BlockSpec((bblk, Ny, D), lambda i: (i, 0, 0)),   # y
        pl.BlockSpec((bblk, 1, Nx), lambda i: (i, 0, 0)),   # x_mask
        pl.BlockSpec((bblk, 1, Ny), lambda i: (i, 0, 0)),   # y_mask
    ]
    # Grid-invariant weights: full-array blocks.  (At realistic D, add
    # pipeline_mode=pl.Buffered(1) here so constants are not double-buffered.)
    param_specs = [
        pl.BlockSpec(p.shape, lambda i, _nd=p.ndim: (0,) * _nd)
        for p in fused_params
    ]

    kernel = functools.partial(decoder_dct_kernel, head=head,
                               head_size=head_size)

    return pl.pallas_call(
        kernel,
        out_shape=jax.ShapeDtypeStruct((B, Nx, D), jnp.float32),
        grid_spec=pltpu.PrefetchScalarGridSpec(
            num_scalar_prefetch=0,
            grid=(B // bblk,),
            in_specs=seq_specs + param_specs,
            out_specs=pl.BlockSpec((bblk, Nx, D), lambda i: (i, 0, 0)),
        ),
        compiler_params=pltpu.CompilerParams(
            dimension_semantics=("parallel",),     # batch blocks are independent
            vmem_limit_bytes=32 * 1024 * 1024,
        ),
    )(x, y, x_mask, y_mask, *fused_params)


# ------------------------- pure-JAX reference check ------------------------

def _ref_mha(q_in, kv_in, mask, wq, bq, wk, bk, wv, bv, wm, bm, head, hs):
    q = q_in @ wq + bq
    k = kv_in @ wk + bk
    v = kv_in @ wv + bv
    nq, nk = q_in.shape[0], kv_in.shape[0]
    qh = q.reshape(nq, head, hs).transpose(1, 0, 2)
    kh = k.reshape(nk, head, hs).transpose(1, 0, 2)
    vh = v.reshape(nk, head, hs).transpose(1, 0, 2)
    s = jnp.einsum("hqd,hkd->hqk", qh, kh) / math.sqrt(hs)
    s = jnp.where(mask > 0.5, -65504.0, s)
    a = jax.nn.softmax(s, axis=-1)
    o = jnp.einsum("hqk,hkd->hqd", a, vh).transpose(1, 0, 2).reshape(nq, head * hs)
    return o @ wm + bm


def _ref_ln(x, g, b, eps=1e-5):
    mu = x.mean(-1, keepdims=True)
    var = ((x - mu) ** 2).mean(-1, keepdims=True)
    return (x - mu) / jnp.sqrt(var + eps) * g + b


def decoder_dct_reference(x, y, x_mask, y_mask, params, *, head):
    (q1w, q1b, k1w, k1b, v1w, v1b, m1w, m1b,
     q2w, q2b, k2w, k2b, v2w, v2b, m2w, m2b,
     f1w, f1b, f2w, f2b, g1, be1, g2, be2, g3, be3) = params
    D = x.shape[-1]
    hs = D // head

    def one(xb, yb, xm, ym):
        a1 = _ref_mha(xb, xb, xm, q1w, q1b, k1w, k1b, v1w, v1b, m1w, m1b, head, hs)
        xb = _ref_ln(xb + a1, g1, be1)
        a2 = _ref_mha(xb, yb, ym, q2w, q2b, k2w, k2b, v2w, v2b, m2w, m2b, head, hs)
        xb = _ref_ln(xb + a2, g2, be2)
        h = jnp.maximum(xb @ f1w + f1b, 0.0)
        xb = _ref_ln(xb + (h @ f2w + f2b), g3, be3)
        return xb

    return jax.vmap(one)(x, y, x_mask, y_mask)


# ---------------------------------- main ------------------------------------

if __name__ == "__main__":
    B, Nx, Ny, D, HEAD = 2, 8, 16, 128, 8     # head_size = 16; lane-dense D

    key = jax.random.PRNGKey(0)
    keys = iter(jax.random.split(key, 64))

    def w(shape, scale=0.02):
        return (scale * jax.random.normal(next(keys), shape)).astype(jnp.float32)

    def b(shape):
        return jnp.zeros(shape, jnp.float32).reshape(1, -1)

    # Parameters (Linear weights stored as (in, out); biases / LN params as (1, X)).
    params = [
        # mhatt1: q, k, v, merge
        w((D, D)), b((D,)), w((D, D)), b((D,)), w((D, D)), b((D,)), w((D, D)), b((D,)),
        # mhatt2: q, k, v, merge
        w((D, D)), b((D,)), w((D, D)), b((D,)), w((D, D)), b((D,)), w((D, D)), b((D,)),
        # ffn: dense1 (D -> 2D), dense2 (2D -> D)
        w((D, 2 * D)), b((2 * D,)), w((2 * D, D)), b((D,)),
        # norm1, norm2, norm3 (gamma, beta)
        jnp.ones((1, D), jnp.float32), jnp.zeros((1, D), jnp.float32),
        jnp.ones((1, D), jnp.float32), jnp.zeros((1, D), jnp.float32),
        jnp.ones((1, D), jnp.float32), jnp.zeros((1, D), jnp.float32),
    ]

    x = jax.random.normal(next(keys), (B, Nx, D), jnp.float32)
    y = jax.random.normal(next(keys), (B, Ny, D), jnp.float32)
    # Masks: 1.0 == masked (equivalent to the bool mask of masked_fill).
    x_mask = (jax.random.uniform(next(keys), (B, 1, Nx)) < 0.2).astype(jnp.float32)
    y_mask = (jax.random.uniform(next(keys), (B, 1, Ny)) < 0.2).astype(jnp.float32)

    out = decoder_dct_forward(x, y, x_mask, y_mask, params, head=HEAD)
    out = jax.block_until_ready(out)

    ref = decoder_dct_reference(x, y, x_mask, y_mask, params, head=HEAD)
    ref = jax.block_until_ready(ref)

    assert out.shape == (B, Nx, D)
    # bf16 MXU matmuls vs f32 reference -> loosened tolerance.
    assert jnp.max(jnp.abs(out - ref)) < 5e-2, "mismatch vs pure-JAX reference"

    print("KERNEL_OK")
</pallas_src>

<mosaic_0001>
module attributes {stable_mosaic.version = 11 : i64} {
  func.func @decoder_dct_kernel(%arg0: i32, %arg1: memref<2x8x128xf32, #tpu.memory_space<vmem>>, %arg2: memref<2x16x128xf32, #tpu.memory_space<vmem>>, %arg3: memref<2x1x8xf32, #tpu.memory_space<vmem>>, %arg4: memref<2x1x16xf32, #tpu.memory_space<vmem>>, %arg5: memref<128x384xbf16, #tpu.memory_space<vmem>>, %arg6: memref<1x384xf32, #tpu.memory_space<vmem>>, %arg7: memref<128x128xbf16, #tpu.memory_space<vmem>>, %arg8: memref<1x128xf32, #tpu.memory_space<vmem>>, %arg9: memref<128x128xbf16, #tpu.memory_space<vmem>>, %arg10: memref<1x128xf32, #tpu.memory_space<vmem>>, %arg11: memref<128x256xbf16, #tpu.memory_space<vmem>>, %arg12: memref<1x256xf32, #tpu.memory_space<vmem>>, %arg13: memref<128x128xbf16, #tpu.memory_space<vmem>>, %arg14: memref<1x128xf32, #tpu.memory_space<vmem>>, %arg15: memref<128x256xbf16, #tpu.memory_space<vmem>>, %arg16: memref<1x256xf32, #tpu.memory_space<vmem>>, %arg17: memref<256x128xbf16, #tpu.memory_space<vmem>>, %arg18: memref<1x128xf32, #tpu.memory_space<vmem>>, %arg19: memref<1x128xf32, #tpu.memory_space<vmem>>, %arg20: memref<1x128xf32, #tpu.memory_space<vmem>>, %arg21: memref<1x128xf32, #tpu.memory_space<vmem>>, %arg22: memref<1x128xf32, #tpu.memory_space<vmem>>, %arg23: memref<1x128xf32, #tpu.memory_space<vmem>>, %arg24: memref<1x128xf32, #tpu.memory_space<vmem>>, %arg25: memref<2x8x128xf32, #tpu.memory_space<vmem>>) attributes {dimension_semantics = [#tpu.dimension_semantics<parallel>], iteration_bounds = array<i64: 1>, scalar_prefetch = 0 : i64, scratch_operands = 0 : i64, tpu.core_type = #tpu.core_type<tc>, window_params = [{transform_indices = @transform_0, window_bounds = array<i64: 2, 8, 128>}, {transform_indices = @transform_1, window_bounds = array<i64: 2, 16, 128>}, {transform_indices = @transform_2, window_bounds = array<i64: 2, 1, 8>}, {transform_indices = @transform_3, window_bounds = array<i64: 2, 1, 16>}, {pipeline_mode = #tpu.pipeline_mode<synchronous>, transform_indices = @transform_4, window_bounds = array<i64: 128, 384>}, {pipeline_mode = #tpu.pipeline_mode<synchronous>, transform_indices = @transform_5, window_bounds = array<i64: 1, 384>}, {pipeline_mode = #tpu.pipeline_mode<synchronous>, transform_indices = @transform_6, window_bounds = array<i64: 128, 128>}, {pipeline_mode = #tpu.pipeline_mode<synchronous>, transform_indices = @transform_7, window_bounds = array<i64: 1, 128>}, {pipeline_mode = #tpu.pipeline_mode<synchronous>, transform_indices = @transform_8, window_bounds = array<i64: 128, 128>}, {pipeline_mode = #tpu.pipeline_mode<synchronous>, transform_indices = @transform_9, window_bounds = array<i64: 1, 128>}, {pipeline_mode = #tpu.pipeline_mode<synchronous>, transform_indices = @transform_10, window_bounds = array<i64: 128, 256>}, {pipeline_mode = #tpu.pipeline_mode<synchronous>, transform_indices = @transform_11, window_bounds = array<i64: 1, 256>}, {pipeline_mode = #tpu.pipeline_mode<synchronous>, transform_indices = @transform_12, window_bounds = array<i64: 128, 128>}, {pipeline_mode = #tpu.pipeline_mode<synchronous>, transform_indices = @transform_13, window_bounds = array<i64: 1, 128>}, {pipeline_mode = #tpu.pipeline_mode<synchronous>, transform_indices = @transform_14, window_bounds = array<i64: 128, 256>}, {pipeline_mode = #tpu.pipeline_mode<synchronous>, transform_indices = @transform_15, window_bounds = array<i64: 1, 256>}, {pipeline_mode = #tpu.pipeline_mode<synchronous>, transform_indices = @transform_16, window_bounds = array<i64: 256, 128>}, {pipeline_mode = #tpu.pipeline_mode<synchronous>, transform_indices = @transform_17, window_bounds = array<i64: 1, 128>}, {pipeline_mode = #tpu.pipeline_mode<synchronous>, transform_indices = @transform_18, window_bounds = array<i64: 1, 128>}, {pipeline_mode = #tpu.pipeline_mode<synchronous>, transform_indices = @transform_19, window_bounds = array<i64: 1, 128>}, {pipeline_mode = #tpu.pipeline_mode<synchronous>, transform_indices = @transform_20, window_bounds = array<i64: 1, 128>}, {pipeline_mode = #tpu.pipeline_mode<synchronous>, transform_indices = @transform_21, window_bounds = array<i64: 1, 128>}, {pipeline_mode = #tpu.pipeline_mode<synchronous>, transform_indices = @transform_22, window_bounds = array<i64: 1, 128>}, {pipeline_mode = #tpu.pipeline_mode<synchronous>, transform_indices = @transform_23, window_bounds = array<i64: 1, 128>}, {transform_indices = @transform_24, window_bounds = array<i64: 2, 8, 128>}]} {
    %c0 = arith.constant 0 : index
    %c0_0 = arith.constant 0 : index
    %c0_1 = arith.constant 0 : index
    %0 = vector.load %arg1[%c0, %c0_0, %c0_1] : memref<2x8x128xf32, #tpu.memory_space<vmem>>, vector<2x8x128xf32>
    %1 = vector.shape_cast %0 : vector<2x8x128xf32> to vector<16x128xf32>
    %c0_2 = arith.constant 0 : index
    %c0_3 = arith.constant 0 : index
    %c0_4 = arith.constant 0 : index
    %2 = vector.load %arg2[%c0_2, %c0_3, %c0_4] : memref<2x16x128xf32, #tpu.memory_space<vmem>>, vector<2x16x128xf32>
    %3 = vector.shape_cast %2 : vector<2x16x128xf32> to vector<32x128xf32>
    %c0_5 = arith.constant 0 : index
    %c0_6 = arith.constant 0 : index
    %c0_7 = arith.constant 0 : index
    %4 = vector.load %arg3[%c0_5, %c0_6, %c0_7] : memref<2x1x8xf32, #tpu.memory_space<vmem>>, vector<2x1x8xf32>
    %cst = arith.constant 5.000000e-01 : f32
    %5 = vector.broadcast %cst : f32 to vector<2x1x8xf32>
    %6 = arith.cmpf ogt, %4, %5 : vector<2x1x8xf32>
    %c0_8 = arith.constant 0 : index
    %c0_9 = arith.constant 0 : index
    %c0_10 = arith.constant 0 : index
    %7 = vector.load %arg4[%c0_8, %c0_9, %c0_10] : memref<2x1x16xf32, #tpu.memory_space<vmem>>, vector<2x1x16xf32>
    %cst_11 = arith.constant 5.000000e-01 : f32
    %8 = vector.broadcast %cst_11 : f32 to vector<2x1x16xf32>
    %9 = arith.cmpf ogt, %7, %8 : vector<2x1x16xf32>
    %10 = arith.truncf %1 : vector<16x128xf32> to vector<16x128xbf16>
    %c0_12 = arith.constant 0 : index
    %c0_13 = arith.constant 0 : index
    %11 = vector.load %arg5[%c0_12, %c0_13] : memref<128x384xbf16, #tpu.memory_space<vmem>>, vector<128x384xbf16>
    %cst_14 = arith.constant dense<0.000000e+00> : vector<16x384xf32>
    %12 = tpu.matmul %10, %11, %cst_14 {dimension_numbers = #tpu.dot_dimension_numbers<[1], [0], [0], [1], [0, 0, 1, 1], [], []>} : vector<16x128xbf16>, vector<128x384xbf16>, vector<16x384xf32> -> vector<16x384xf32>
    %c0_15 = arith.constant 0 : index
    %c0_16 = arith.constant 0 : index
    %13 = vector.load %arg6[%c0_15, %c0_16] : memref<1x384xf32, #tpu.memory_space<vmem>>, vector<1x384xf32>
    %14 = vector.broadcast %13 : vector<1x384xf32> to vector<16x384xf32>
    %15 = arith.addf %12, %14 : vector<16x384xf32>
    %16 = vector.extract_strided_slice %15 {offsets = [0, 0], sizes = [16, 128], strides = [1, 1]} : vector<16x384xf32> to vector<16x128xf32>
    %cst_17 = arith.constant 2.500000e-01 : f32
    %17 = vector.broadcast %cst_17 : f32 to vector<16x128xf32>
    %18 = arith.mulf %16, %17 : vector<16x128xf32>
    %19 = vector.extract_strided_slice %15 {offsets = [0, 128], sizes = [16, 128], strides = [1, 1]} : vector<16x384xf32> to vector<16x128xf32>
    %20 = vector.extract_strided_slice %15 {offsets = [0, 256], sizes = [16, 128], strides = [1, 1]} : vector<16x384xf32> to vector<16x128xf32>
    %21 = vector.shape_cast %18 : vector<16x128xf32> to vector<2x8x128xf32>
    %22 = arith.truncf %21 : vector<2x8x128xf32> to vector<2x8x128xbf16>
    %23 = vector.shape_cast %19 : vector<16x128xf32> to vector<2x8x128xf32>
    %24 = arith.truncf %23 : vector<2x8x128xf32> to vector<2x8x128xbf16>
    %25 = vector.shape_cast %20 : vector<16x128xf32> to vector<2x8x128xf32>
    %26 = arith.truncf %25 : vector<2x8x128xf32> to vector<2x8x128xbf16>
    %27 = vector.extract_strided_slice %22 {offsets = [0, 0, 0], sizes = [2, 8, 16], strides = [1, 1, 1]} : vector<2x8x128xbf16> to vector<2x8x16xbf16>
    %28 = vector.extract_strided_slice %24 {offsets = [0, 0, 0], sizes = [2, 8, 16], strides = [1, 1, 1]} : vector<2x8x128xbf16> to vector<2x8x16xbf16>
    "tpu.trace_start"() <{level = 10 : i32, message = "bqd,bkd->bqk"}> : () -> ()
    %cst_18 = arith.constant dense<0.000000e+00> : vector<2x8x8xf32>
    %29 = tpu.matmul %27, %28, %cst_18 {dimension_numbers = #tpu.dot_dimension_numbers<[2], [2], [1], [1], [0, 0, 0, 1, 1, 1], [0], [0]>} : vector<2x8x16xbf16>, vector<2x8x16xbf16>, vector<2x8x8xf32> -> vector<2x8x8xf32>
    %cst_19 = arith.constant -6.550400e+04 : f32
    "tpu.trace_stop"() : () -> ()
    %30 = vector.shape_cast %6 : vector<2x1x8xi1> to vector<2x1x8xi1>
    %31 = vector.broadcast %30 : vector<2x1x8xi1> to vector<2x8x8xi1>
    %32 = vector.broadcast %cst_19 : f32 to vector<2x8x8xf32>
    %33 = arith.select %31, %32, %29 : vector<2x8x8xi1>, vector<2x8x8xf32>
    %cst_20 = arith.constant dense<0xFF800000> : vector<2x8xf32>
    %34 = vector.multi_reduction <maximumf>, %33, %cst_20 [2] : vector<2x8x8xf32> to vector<2x8xf32>
    %35 = vector.shape_cast %34 : vector<2x8xf32> to vector<2x8x1xf32>
    %36 = vector.broadcast %35 : vector<2x8x1xf32> to vector<2x8x8xf32>
    %37 = arith.subf %33, %36 : vector<2x8x8xf32>
    %38 = math.exp %37 : vector<2x8x8xf32>
    %cst_21 = arith.constant dense<0.000000e+00> : vector<2x8xf32>
    %39 = vector.multi_reduction <add>, %38, %cst_21 [2] : vector<2x8x8xf32> to vector<2x8xf32>
    %40 = vector.shape_cast %39 : vector<2x8xf32> to vector<2x8x1xf32>
    %41 = tpu.reciprocal %40 {approx = true} : vector<2x8x1xf32> -> vector<2x8x1xf32>
    %42 = vector.broadcast %41 : vector<2x8x1xf32> to vector<2x8x8xf32>
    %43 = arith.mulf %38, %42 : vector<2x8x8xf32>
    %44 = arith.truncf %43 : vector<2x8x8xf32> to vector<2x8x8xbf16>
    %45 = vector.extract_strided_slice %26 {offsets = [0, 0, 0], sizes = [2, 8, 16], strides = [1, 1, 1]} : vector<2x8x128xbf16> to vector<2x8x16xbf16>
    "tpu.trace_start"() <{level = 10 : i32, message = "bqk,bkd->bqd"}> : () -> ()
    %cst_22 = arith.constant dense<0.000000e+00> : vector<2x8x16xf32>
    %46 = tpu.matmul %44, %45, %cst_22 {dimension_numbers = #tpu.dot_dimension_numbers<[2], [1], [1], [2], [0, 0, 0, 1, 1, 2], [0], [0]>} : vector<2x8x8xbf16>, vector<2x8x16xbf16>, vector<2x8x16xf32> -> vector<2x8x16xf32>
    "tpu.trace_stop"() : () -> ()
    %47 = vector.extract_strided_slice %22 {offsets = [0, 0, 16], sizes = [2, 8, 16], strides = [1, 1, 1]} : vector<2x8x128xbf16> to vector<2x8x16xbf16>
    %48 = vector.extract_strided_slice %24 {offsets = [0, 0, 16], sizes = [2, 8, 16], strides = [1, 1, 1]} : vector<2x8x128xbf16> to vector<2x8x16xbf16>
    "tpu.trace_start"() <{level = 10 : i32, message = "bqd,bkd->bqk"}> : () -> ()
    %cst_23 = arith.constant dense<0.000000e+00> : vector<2x8x8xf32>
    %49 = tpu.matmul %47, %48, %cst_23 {dimension_numbers = #tpu.dot_dimension_numbers<[2], [2], [1], [1], [0, 0, 0, 1, 1, 1], [0], [0]>} : vector<2x8x16xbf16>, vector<2x8x16xbf16>, vector<2x8x8xf32> -> vector<2x8x8xf32>
    %cst_24 = arith.constant -6.550400e+04 : f32
    "tpu.trace_stop"() : () -> ()
    %50 = vector.shape_cast %6 : vector<2x1x8xi1> to vector<2x1x8xi1>
    %51 = vector.broadcast %50 : vector<2x1x8xi1> to vector<2x8x8xi1>
    %52 = vector.broadcast %cst_24 : f32 to vector<2x8x8xf32>
    %53 = arith.select %51, %52, %49 : vector<2x8x8xi1>, vector<2x8x8xf32>
    %cst_25 = arith.constant dense<0xFF800000> : vector<2x8xf32>
    %54 = vector.multi_reduction <maximumf>, %53, %cst_25 [2] : vector<2x8x8xf32> to vector<2x8xf32>
    %55 = vector.shape_cast %54 : vector<2x8xf32> to vector<2x8x1xf32>
    %56 = vector.broadcast %55 : vector<2x8x1xf32> to vector<2x8x8xf32>
    %57 = arith.subf %53, %56 : vector<2x8x8xf32>
    %58 = math.exp %57 : vector<2x8x8xf32>
    %cst_26 = arith.constant dense<0.000000e+00> : vector<2x8xf32>
    %59 = vector.multi_reduction <add>, %58, %cst_26 [2] : vector<2x8x8xf32> to vector<2x8xf32>
    %60 = vector.shape_cast %59 : vector<2x8xf32> to vector<2x8x1xf32>
    %61 = tpu.reciprocal %60 {approx = true} : vector<2x8x1xf32> -> vector<2x8x1xf32>
    %62 = vector.broadcast %61 : vector<2x8x1xf32> to vector<2x8x8xf32>
    %63 = arith.mulf %58, %62 : vector<2x8x8xf32>
    %64 = arith.truncf %63 : vector<2x8x8xf32> to vector<2x8x8xbf16>
    %65 = vector.extract_strided_slice %26 {offsets = [0, 0, 16], sizes = [2, 8, 16], strides = [1, 1, 1]} : vector<2x8x128xbf16> to vector<2x8x16xbf16>
    "tpu.trace_start"() <{level = 10 : i32, message = "bqk,bkd->bqd"}> : () -> ()
    %cst_27 = arith.constant dense<0.000000e+00> : vector<2x8x16xf32>
    %66 = tpu.matmul %64, %65, %cst_27 {dimension_numbers = #tpu.dot_dimension_numbers<[2], [1], [1], [2], [0, 0, 0, 1, 1, 2], [0], [0]>} : vector<2x8x8xbf16>, vector<2x8x16xbf16>, vector<2x8x16xf32> -> vector<2x8x16xf32>
    "tpu.trace_stop"() : () -> ()
    %67 = vector.extract_strided_slice %22 {offsets = [0, 0, 32], sizes = [2, 8, 16], strides = [1, 1, 1]} : vector<2x8x128xbf16> to vector<2x8x16xbf16>
    %68 = vector.extract_strided_slice %24 {offsets = [0, 0, 32], sizes = [2, 8, 16], strides = [1, 1, 1]} : vector<2x8x128xbf16> to vector<2x8x16xbf16>
    "tpu.trace_start"() <{level = 10 : i32, message = "bqd,bkd->bqk"}> : () -> ()
    %cst_28 = arith.constant dense<0.000000e+00> : vector<2x8x8xf32>
    %69 = tpu.matmul %67, %68, %cst_28 {dimension_numbers = #tpu.dot_dimension_numbers<[2], [2], [1], [1], [0, 0, 0, 1, 1, 1], [0], [0]>} : vector<2x8x16xbf16>, vector<2x8x16xbf16>, vector<2x8x8xf32> -> vector<2x8x8xf32>
    %cst_29 = arith.constant -6.550400e+04 : f32
    "tpu.trace_stop"() : () -> ()
    %70 = vector.shape_cast %6 : vector<2x1x8xi1> to vector<2x1x8xi1>
    %71 = vector.broadcast %70 : vector<2x1x8xi1> to vector<2x8x8xi1>
    %72 = vector.broadcast %cst_29 : f32 to vector<2x8x8xf32>
    %73 = arith.select %71, %72, %69 : vector<2x8x8xi1>, vector<2x8x8xf32>
    %cst_30 = arith.constant dense<0xFF800000> : vector<2x8xf32>
    %74 = vector.multi_reduction <maximumf>, %73, %cst_30 [2] : vector<2x8x8xf32> to vector<2x8xf32>
    %75 = vector.shape_cast %74 : vector<2x8xf32> to vector<2x8x1xf32>
    %76 = vector.broadcast %75 : vector<2x8x1xf32> to vector<2x8x8xf32>
    %77 = arith.subf %73, %76 : vector<2x8x8xf32>
    %78 = math.exp %77 : vector<2x8x8xf32>
    %cst_31 = arith.constant dense<0.000000e+00> : vector<2x8xf32>
    %79 = vector.multi_reduction <add>, %78, %cst_31 [2] : vector<2x8x8xf32> to vector<2x8xf32>
    %80 = vector.shape_cast %79 : vector<2x8xf32> to vector<2x8x1xf32>
    %81 = tpu.reciprocal %80 {approx = true} : vector<2x8x1xf32> -> vector<2x8x1xf32>
    %82 = vector.broadcast %81 : vector<2x8x1xf32> to vector<2x8x8xf32>
    %83 = arith.mulf %78, %82 : vector<2x8x8xf32>
    %84 = arith.truncf %83 : vector<2x8x8xf32> to vector<2x8x8xbf16>
    %85 = vector.extract_strided_slice %26 {offsets = [0, 0, 32], sizes = [2, 8, 16], strides = [1, 1, 1]} : vector<2x8x128xbf16> to vector<2x8x16xbf16>
    "tpu.trace_start"() <{level = 10 : i32, message = "bqk,bkd->bqd"}> : () -> ()
    %cst_32 = arith.constant dense<0.000000e+00> : vector<2x8x16xf32>
    %86 = tpu.matmul %84, %85, %cst_32 {dimension_numbers = #tpu.dot_dimension_numbers<[2], [1], [1], [2], [0, 0, 0, 1, 1, 2], [0], [0]>} : vector<2x8x8xbf16>, vector<2x8x16xbf16>, vector<2x8x16xf32> -> vector<2x8x16xf32>
    "tpu.trace_stop"() : () -> ()
    %87 = vector.extract_strided_slice %22 {offsets = [0, 0, 48], sizes = [2, 8, 16], strides = [1, 1, 1]} : vector<2x8x128xbf16> to vector<2x8x16xbf16>
    %88 = vector.extract_strided_slice %24 {offsets = [0, 0, 48], sizes = [2, 8, 16], strides = [1, 1, 1]} : vector<2x8x128xbf16> to vector<2x8x16xbf16>
    "tpu.trace_start"() <{level = 10 : i32, message = "bqd,bkd->bqk"}> : () -> ()
    %cst_33 = arith.constant dense<0.000000e+00> : vector<2x8x8xf32>
    %89 = tpu.matmul %87, %88, %cst_33 {dimension_numbers = #tpu.dot_dimension_numbers<[2], [2], [1], [1], [0, 0, 0, 1, 1, 1], [0], [0]>} : vector<2x8x16xbf16>, vector<2x8x16xbf16>, vector<2x8x8xf32> -> vector<2x8x8xf32>
    %cst_34 = arith.constant -6.550400e+04 : f32
    "tpu.trace_stop"() : () -> ()
    %90 = vector.shape_cast %6 : vector<2x1x8xi1> to vector<2x1x8xi1>
    %91 = vector.broadcast %90 : vector<2x1x8xi1> to vector<2x8x8xi1>
    %92 = vector.broadcast %cst_34 : f32 to vector<2x8x8xf32>
    %93 = arith.select %91, %92, %89 : vector<2x8x8xi1>, vector<2x8x8xf32>
    %cst_35 = arith.constant dense<0xFF800000> : vector<2x8xf32>
    %94 = vector.multi_reduction <maximumf>, %93, %cst_35 [2] : vector<2x8x8xf32> to vector<2x8xf32>
    %95 = vector.shape_cast %94 : vector<2x8xf32> to vector<2x8x1xf32>
    %96 = vector.broadcast %95 : vector<2x8x1xf32> to vector<2x8x8xf32>
    %97 = arith.subf %93, %96 : vector<2x8x8xf32>
    %98 = math.exp %97 : vector<2x8x8xf32>
    %cst_36 = arith.constant dense<0.000000e+00> : vector<2x8xf32>
    %99 = vector.multi_reduction <add>, %98, %cst_36 [2] : vector<2x8x8xf32> to vector<2x8xf32>
    %100 = vector.shape_cast %99 : vector<2x8xf32> to vector<2x8x1xf32>
    %101 = tpu.reciprocal %100 {approx = true} : vector<2x8x1xf32> -> vector<2x8x1xf32>
    %102 = vector.broadcast %101 : vector<2x8x1xf32> to vector<2x8x8xf32>
    %103 = arith.mulf %98, %102 : vector<2x8x8xf32>
    %104 = arith.truncf %103 : vector<2x8x8xf32> to vector<2x8x8xbf16>
    %105 = vector.extract_strided_slice %26 {offsets = [0, 0, 48], sizes = [2, 8, 16], strides = [1, 1, 1]} : vector<2x8x128xbf16> to vector<2x8x16xbf16>
    "tpu.trace_start"() <{level = 10 : i32, message = "bqk,bkd->bqd"}> : () -> ()
    %cst_37 = arith.constant dense<0.000000e+00> : vector<2x8x16xf32>
    %106 = tpu.matmul %104, %105, %cst_37 {dimension_numbers = #tpu.dot_dimension_numbers<[2], [1], [1], [2], [0, 0, 0, 1, 1, 2], [0], [0]>} : vector<2x8x8xbf16>, vector<2x8x16xbf16>, vector<2x8x16xf32> -> vector<2x8x16xf32>
    "tpu.trace_stop"() : () -> ()
    %107 = vector.extract_strided_slice %22 {offsets = [0, 0, 64], sizes = [2, 8, 16], strides = [1, 1, 1]} : vector<2x8x128xbf16> to vector<2x8x16xbf16>
    %108 = vector.extract_strided_slice %24 {offsets = [0, 0, 64], sizes = [2, 8, 16], strides = [1, 1, 1]} : vector<2x8x128xbf16> to vector<2x8x16xbf16>
    "tpu.trace_start"() <{level = 10 : i32, message = "bqd,bkd->bqk"}> : () -> ()
    %cst_38 = arith.constant dense<0.000000e+00> : vector<2x8x8xf32>
    %109 = tpu.matmul %107, %108, %cst_38 {dimension_numbers = #tpu.dot_dimension_numbers<[2], [2], [1], [1], [0, 0, 0, 1, 1, 1], [0], [0]>} : vector<2x8x16xbf16>, vector<2x8x16xbf16>, vector<2x8x8xf32> -> vector<2x8x8xf32>
    %cst_39 = arith.constant -6.550400e+04 : f32
    "tpu.trace_stop"() : () -> ()
    %110 = vector.shape_cast %6 : vector<2x1x8xi1> to vector<2x1x8xi1>
    %111 = vector.broadcast %110 : vector<2x1x8xi1> to vector<2x8x8xi1>
    %112 = vector.broadcast %cst_39 : f32 to vector<2x8x8xf32>
    %113 = arith.select %111, %112, %109 : vector<2x8x8xi1>, vector<2x8x8xf32>
    %cst_40 = arith.constant dense<0xFF800000> : vector<2x8xf32>
    %114 = vector.multi_reduction <maximumf>, %113, %cst_40 [2] : vector<2x8x8xf32> to vector<2x8xf32>
    %115 = vector.shape_cast %114 : vector<2x8xf32> to vector<2x8x1xf32>
    %116 = vector.broadcast %115 : vector<2x8x1xf32> to vector<2x8x8xf32>
    %117 = arith.subf %113, %116 : vector<2x8x8xf32>
    %118 = math.exp %117 : vector<2x8x8xf32>
    %cst_41 = arith.constant dense<0.000000e+00> : vector<2x8xf32>
    %119 = vector.multi_reduction <add>, %118, %cst_41 [2] : vector<2x8x8xf32> to vector<2x8xf32>
    %120 = vector.shape_cast %119 : vector<2x8xf32> to vector<2x8x1xf32>
    %121 = tpu.reciprocal %120 {approx = true} : vector<2x8x1xf32> -> vector<2x8x1xf32>
    %122 = vector.broadcast %121 : vector<2x8x1xf32> to vector<2x8x8xf32>
    %123 = arith.mulf %118, %122 : vector<2x8x8xf32>
    %124 = arith.truncf %123 : vector<2x8x8xf32> to vector<2x8x8xbf16>
    %125 = vector.extract_strided_slice %26 {offsets = [0, 0, 64], sizes = [2, 8, 16], strides = [1, 1, 1]} : vector<2x8x128xbf16> to vector<2x8x16xbf16>
    "tpu.trace_start"() <{level = 10 : i32, message = "bqk,bkd->bqd"}> : () -> ()
    %cst_42 = arith.constant dense<0.000000e+00> : vector<2x8x16xf32>
    %126 = tpu.matmul %124, %125, %cst_42 {dimension_numbers = #tpu.dot_dimension_numbers<[2], [1], [1], [2], [0, 0, 0, 1, 1, 2], [0], [0]>} : vector<2x8x8xbf16>, vector<2x8x16xbf16>, vector<2x8x16xf32> -> vector<2x8x16xf32>
    "tpu.trace_stop"() : () -> ()
    %127 = vector.extract_strided_slice %22 {offsets = [0, 0, 80], sizes = [2, 8, 16], strides = [1, 1, 1]} : vector<2x8x128xbf16> to vector<2x8x16xbf16>
    %128 = vector.extract_strided_slice %24 {offsets = [0, 0, 80], sizes = [2, 8, 16], strides = [1, 1, 1]} : vector<2x8x128xbf16> to vector<2x8x16xbf16>
    "tpu.trace_start"() <{level = 10 : i32, message = "bqd,bkd->bqk"}> : () -> ()
    %cst_43 = arith.constant dense<0.000000e+00> : vector<2x8x8xf32>
    %129 = tpu.matmul %127, %128, %cst_43 {dimension_numbers = #tpu.dot_dimension_numbers<[2], [2], [1], [1], [0, 0, 0, 1, 1, 1], [0], [0]>} : vector<2x8x16xbf16>, vector<2x8x16xbf16>, vector<2x8x8xf32> -> vector<2x8x8xf32>
    %cst_44 = arith.constant -6.550400e+04 : f32
    "tpu.trace_stop"() : () -> ()
    %130 = vector.shape_cast %6 : vector<2x1x8xi1> to vector<2x1x8xi1>
    %131 = vector.broadcast %130 : vector<2x1x8xi1> to vector<2x8x8xi1>
    %132 = vector.broadcast %cst_44 : f32 to vector<2x8x8xf32>
    %133 = arith.select %131, %132, %129 : vector<2x8x8xi1>, vector<2x8x8xf32>
    %cst_45 = arith.constant dense<0xFF800000> : vector<2x8xf32>
    %134 = vector.multi_reduction <maximumf>, %133, %cst_45 [2] : vector<2x8x8xf32> to vector<2x8xf32>
    %135 = vector.shape_cast %134 : vector<2x8xf32> to vector<2x8x1xf32>
    %136 = vector.broadcast %135 : vector<2x8x1xf32> to vector<2x8x8xf32>
    %137 = arith.subf %133, %136 : vector<2x8x8xf32>
    %138 = math.exp %137 : vector<2x8x8xf32>
    %cst_46 = arith.constant dense<0.000000e+00> : vector<2x8xf32>
    %139 = vector.multi_reduction <add>, %138, %cst_46 [2] : vector<2x8x8xf32> to vector<2x8xf32>
    %140 = vector.shape_cast %139 : vector<2x8xf32> to vector<2x8x1xf32>
    %141 = tpu.reciprocal %140 {approx = true} : vector<2x8x1xf32> -> vector<2x8x1xf32>
    %142 = vector.broadcast %141 : vector<2x8x1xf32> to vector<2x8x8xf32>
    %143 = arith.mulf %138, %142 : vector<2x8x8xf32>
    %144 = arith.truncf %143 : vector<2x8x8xf32> to vector<2x8x8xbf16>
    %145 = vector.extract_strided_slice %26 {offsets = [0, 0, 80], sizes = [2, 8, 16], strides = [1, 1, 1]} : vector<2x8x128xbf16> to vector<2x8x16xbf16>
    "tpu.trace_start"() <{level = 10 : i32, message = "bqk,bkd->bqd"}> : () -> ()
    %cst_47 = arith.constant dense<0.000000e+00> : vector<2x8x16xf32>
    %146 = tpu.matmul %144, %145, %cst_47 {dimension_numbers = #tpu.dot_dimension_numbers<[2], [1], [1], [2], [0, 0, 0, 1, 1, 2], [0], [0]>} : vector<2x8x8xbf16>, vector<2x8x16xbf16>, vector<2x8x16xf32> -> vector<2x8x16xf32>
    "tpu.trace_stop"() : () -> ()
    %147 = vector.extract_strided_slice %22 {offsets = [0, 0, 96], sizes = [2, 8, 16], strides = [1, 1, 1]} : vector<2x8x128xbf16> to vector<2x8x16xbf16>
    %148 = vector.extract_strided_slice %24 {offsets = [0, 0, 96], sizes = [2, 8, 16], strides = [1, 1, 1]} : vector<2x8x128xbf16> to vector<2x8x16xbf16>
    "tpu.trace_start"() <{level = 10 : i32, message = "bqd,bkd->bqk"}> : () -> ()
    %cst_48 = arith.constant dense<0.000000e+00> : vector<2x8x8xf32>
    %149 = tpu.matmul %147, %148, %cst_48 {dimension_numbers = #tpu.dot_dimension_numbers<[2], [2], [1], [1], [0, 0, 0, 1, 1, 1], [0], [0]>} : vector<2x8x16xbf16>, vector<2x8x16xbf16>, vector<2x8x8xf32> -> vector<2x8x8xf32>
    %cst_49 = arith.constant -6.550400e+04 : f32
    "tpu.trace_stop"() : () -> ()
    %150 = vector.shape_cast %6 : vector<2x1x8xi1> to vector<2x1x8xi1>
    %151 = vector.broadcast %150 : vector<2x1x8xi1> to vector<2x8x8xi1>
    %152 = vector.broadcast %cst_49 : f32 to vector<2x8x8xf32>
    %153 = arith.select %151, %152, %149 : vector<2x8x8xi1>, vector<2x8x8xf32>
    %cst_50 = arith.constant dense<0xFF800000> : vector<2x8xf32>
    %154 = vector.multi_reduction <maximumf>, %153, %cst_50 [2] : vector<2x8x8xf32> to vector<2x8xf32>
    %155 = vector.shape_cast %154 : vector<2x8xf32> to vector<2x8x1xf32>
    %156 = vector.broadcast %155 : vector<2x8x1xf32> to vector<2x8x8xf32>
    %157 = arith.subf %153, %156 : vector<2x8x8xf32>
    %158 = math.exp %157 : vector<2x8x8xf32>
    %cst_51 = arith.constant dense<0.000000e+00> : vector<2x8xf32>
    %159 = vector.multi_reduction <add>, %158, %cst_51 [2] : vector<2x8x8xf32> to vector<2x8xf32>
    %160 = vector.shape_cast %159 : vector<2x8xf32> to vector<2x8x1xf32>
    %161 = tpu.reciprocal %160 {approx = true} : vector<2x8x1xf32> -> vector<2x8x1xf32>
    %162 = vector.broadcast %161 : vector<2x8x1xf32> to vector<2x8x8xf32>
    %163 = arith.mulf %158, %162 : vector<2x8x8xf32>
    %164 = arith.truncf %163 : vector<2x8x8xf32> to vector<2x8x8xbf16>
    %165 = vector.extract_strided_slice %26 {offsets = [0, 0, 96], sizes = [2, 8, 16], strides = [1, 1, 1]} : vector<2x8x128xbf16> to vector<2x8x16xbf16>
    "tpu.trace_start"() <{level = 10 : i32, message = "bqk,bkd->bqd"}> : () -> ()
    %cst_52 = arith.constant dense<0.000000e+00> : vector<2x8x16xf32>
    %166 = tpu.matmul %164, %165, %cst_52 {dimension_numbers = #tpu.dot_dimension_numbers<[2], [1], [1], [2], [0, 0, 0, 1, 1, 2], [0], [0]>} : vector<2x8x8xbf16>, vector<2x8x16xbf16>, vector<2x8x16xf32> -> vector<2x8x16xf32>
    "tpu.trace_stop"() : () -> ()
    %167 = vector.extract_strided_slice %22 {offsets = [0, 0, 112], sizes = [2, 8, 16], strides = [1, 1, 1]} : vector<2x8x128xbf16> to vector<2x8x16xbf16>
    %168 = vector.extract_strided_slice %24 {offsets = [0, 0, 112], sizes = [2, 8, 16], strides = [1, 1, 1]} : vector<2x8x128xbf16> to vector<2x8x16xbf16>
    "tpu.trace_start"() <{level = 10 : i32, message = "bqd,bkd->bqk"}> : () -> ()
    %cst_53 = arith.constant dense<0.000000e+00> : vector<2x8x8xf32>
    %169 = tpu.matmul %167, %168, %cst_53 {dimension_numbers = #tpu.dot_dimension_numbers<[2], [2], [1], [1], [0, 0, 0, 1, 1, 1], [0], [0]>} : vector<2x8x16xbf16>, vector<2x8x16xbf16>, vector<2x8x8xf32> -> vector<2x8x8xf32>
    %cst_54 = arith.constant -6.550400e+04 : f32
    "tpu.trace_stop"() : () -> ()
    %170 = vector.shape_cast %6 : vector<2x1x8xi1> to vector<2x1x8xi1>
    %171 = vector.broadcast %170 : vector<2x1x8xi1> to vector<2x8x8xi1>
    %172 = vector.broadcast %cst_54 : f32 to vector<2x8x8xf32>
    %173 = arith.select %171, %172, %169 : vector<2x8x8xi1>, vector<2x8x8xf32>
    %cst_55 = arith.constant dense<0xFF800000> : vector<2x8xf32>
    %174 = vector.multi_reduction <maximumf>, %173, %cst_55 [2] : vector<2x8x8xf32> to vector<2x8xf32>
    %175 = vector.shape_cast %174 : vector<2x8xf32> to vector<2x8x1xf32>
    %176 = vector.broadcast %175 : vector<2x8x1xf32> to vector<2x8x8xf32>
    %177 = arith.subf %173, %176 : vector<2x8x8xf32>
    %178 = math.exp %177 : vector<2x8x8xf32>
    %cst_56 = arith.constant dense<0.000000e+00> : vector<2x8xf32>
    %179 = vector.multi_reduction <add>, %178, %cst_56 [2] : vector<2x8x8xf32> to vector<2x8xf32>
    %180 = vector.shape_cast %179 : vector<2x8xf32> to vector<2x8x1xf32>
    %181 = tpu.reciprocal %180 {approx = true} : vector<2x8x1xf32> -> vector<2x8x1xf32>
    %182 = vector.broadcast %181 : vector<2x8x1xf32> to vector<2x8x8xf32>
    %183 = arith.mulf %178, %182 : vector<2x8x8xf32>
    %184 = arith.truncf %183 : vector<2x8x8xf32> to vector<2x8x8xbf16>
    %185 = vector.extract_strided_slice %26 {offsets = [0, 0, 112], sizes = [2, 8, 16], strides = [1, 1, 1]} : vector<2x8x128xbf16> to vector<2x8x16xbf16>
    "tpu.trace_start"() <{level = 10 : i32, message = "bqk,bkd->bqd"}> : () -> ()
    %cst_57 = arith.constant dense<0.000000e+00> : vector<2x8x16xf32>
    %186 = tpu.matmul %184, %185, %cst_57 {dimension_numbers = #tpu.dot_dimension_numbers<[2], [1], [1], [2], [0, 0, 0, 1, 1, 2], [0], [0]>} : vector<2x8x8xbf16>, vector<2x8x16xbf16>, vector<2x8x16xf32> -> vector<2x8x16xf32>
    "tpu.trace_stop"() : () -> ()
    %187 = tpu.concatenate %46, %66, %86, %106, %126, %146, %166, %186 in 2 : vector<2x8x16xf32>, vector<2x8x16xf32>, vector<2x8x16xf32>, vector<2x8x16xf32>, vector<2x8x16xf32>, vector<2x8x16xf32>, vector<2x8x16xf32>, vector<2x8x16xf32> -> vector<2x8x128xf32>
    %188 = vector.shape_cast %187 : vector<2x8x128xf32> to vector<16x128xf32>
    %189 = arith.truncf %188 : vector<16x128xf32> to vector<16x128xbf16>
    %c0_58 = arith.constant 0 : index
    %c0_59 = arith.constant 0 : index
    %190 = vector.load %arg7[%c0_58, %c0_59] : memref<128x128xbf16, #tpu.memory_space<vmem>>, vector<128x128xbf16>
    %cst_60 = arith.constant dense<0.000000e+00> : vector<16x128xf32>
    %191 = tpu.matmul %189, %190, %cst_60 {dimension_numbers = #tpu.dot_dimension_numbers<[1], [0], [0], [1], [0, 0, 1, 1], [], []>} : vector<16x128xbf16>, vector<128x128xbf16>, vector<16x128xf32> -> vector<16x128xf32>
    %c0_61 = arith.constant 0 : index
    %c0_62 = arith.constant 0 : index
    %192 = vector.load %arg8[%c0_61, %c0_62] : memref<1x128xf32, #tpu.memory_space<vmem>>, vector<1x128xf32>
    %193 = vector.broadcast %192 : vector<1x128xf32> to vector<16x128xf32>
    %194 = arith.addf %191, %193 : vector<16x128xf32>
    %195 = arith.addf %1, %194 : vector<16x128xf32>
    %cst_63 = arith.constant dense<0.000000e+00> : vector<16xf32>
    %196 = vector.multi_reduction <add>, %195, %cst_63 [1] : vector<16x128xf32> to vector<16xf32>
    %197 = vector.shape_cast %196 : vector<16xf32> to vector<16x1xf32>
    %cst_64 = arith.constant 1.280000e+02 : f32
    %198 = vector.broadcast %cst_64 : f32 to vector<16x1xf32>
    %199 = arith.divf %197, %198 : vector<16x1xf32>
    %200 = vector.broadcast %199 : vector<16x1xf32> to vector<16x128xf32>
    %201 = arith.subf %195, %200 : vector<16x128xf32>
    %202 = arith.mulf %201, %201 : vector<16x128xf32>
    %cst_65 = arith.constant dense<0.000000e+00> : vector<16xf32>
    %203 = vector.multi_reduction <add>, %202, %cst_65 [1] : vector<16x128xf32> to vector<16xf32>
    %204 = vector.shape_cast %203 : vector<16xf32> to vector<16x1xf32>
    %cst_66 = arith.constant 1.280000e+02 : f32
    %205 = vector.broadcast %cst_66 : f32 to vector<16x1xf32>
    %206 = arith.divf %204, %205 : vector<16x1xf32>
    %207 = vector.broadcast %199 : vector<16x1xf32> to vector<16x128xf32>
    %208 = arith.subf %195, %207 : vector<16x128xf32>
    %cst_67 = arith.constant 9.99999974E-6 : f32
    %209 = vector.broadcast %cst_67 : f32 to vector<16x1xf32>
    %210 = arith.addf %206, %209 : vector<16x1xf32>
    %211 = math.rsqrt %210 : vector<16x1xf32>
    %212 = vector.broadcast %211 : vector<16x1xf32> to vector<16x128xf32>
    %213 = arith.mulf %208, %212 : vector<16x128xf32>
    %c0_68 = arith.constant 0 : index
    %c0_69 = arith.constant 0 : index
    %214 = vector.load %arg19[%c0_68, %c0_69] : memref<1x128xf32, #tpu.memory_space<vmem>>, vector<1x128xf32>
    %215 = vector.broadcast %214 : vector<1x128xf32> to vector<16x128xf32>
    %216 = arith.mulf %213, %215 : vector<16x128xf32>
    %c0_70 = arith.constant 0 : index
    %c0_71 = arith.constant 0 : index
    %217 = vector.load %arg20[%c0_70, %c0_71] : memref<1x128xf32, #tpu.memory_space<vmem>>, vector<1x128xf32>
    %218 = vector.broadcast %217 : vector<1x128xf32> to vector<16x128xf32>
    %219 = arith.addf %216, %218 : vector<16x128xf32>
    %220 = arith.truncf %219 : vector<16x128xf32> to vector<16x128xbf16>
    %c0_72 = arith.constant 0 : index
    %c0_73 = arith.constant 0 : index
    %221 = vector.load %arg9[%c0_72, %c0_73] : memref<128x128xbf16, #tpu.memory_space<vmem>>, vector<128x128xbf16>
    %cst_74 = arith.constant dense<0.000000e+00> : vector<16x128xf32>
    %222 = tpu.matmul %220, %221, %cst_74 {dimension_numbers = #tpu.dot_dimension_numbers<[1], [0], [0], [1], [0, 0, 1, 1], [], []>} : vector<16x128xbf16>, vector<128x128xbf16>, vector<16x128xf32> -> vector<16x128xf32>
    %c0_75 = arith.constant 0 : index
    %c0_76 = arith.constant 0 : index
    %223 = vector.load %arg10[%c0_75, %c0_76] : memref<1x128xf32, #tpu.memory_space<vmem>>, vector<1x128xf32>
    %224 = vector.broadcast %223 : vector<1x128xf32> to vector<16x128xf32>
    %225 = arith.addf %222, %224 : vector<16x128xf32>
    %cst_77 = arith.constant 2.500000e-01 : f32
    %226 = vector.broadcast %cst_77 : f32 to vector<16x128xf32>
    %227 = arith.mulf %225, %226 : vector<16x128xf32>
    %228 = arith.truncf %3 : vector<32x128xf32> to vector<32x128xbf16>
    %c0_78 = arith.constant 0 : index
    %c0_79 = arith.constant 0 : index
    %229 = vector.load %arg11[%c0_78, %c0_79] : memref<128x256xbf16, #tpu.memory_space<vmem>>, vector<128x256xbf16>
    %cst_80 = arith.constant dense<0.000000e+00> : vector<32x256xf32>
    %230 = tpu.matmul %228, %229, %cst_80 {dimension_numbers = #tpu.dot_dimension_numbers<[1], [0], [0], [1], [0, 0, 1, 1], [], []>} : vector<32x128xbf16>, vector<128x256xbf16>, vector<32x256xf32> -> vector<32x256xf32>
    %c0_81 = arith.constant 0 : index
    %c0_82 = arith.constant 0 : index
    %231 = vector.load %arg12[%c0_81, %c0_82] : memref<1x256xf32, #tpu.memory_space<vmem>>, vector<1x256xf32>
    %232 = vector.broadcast %231 : vector<1x256xf32> to vector<32x256xf32>
    %233 = arith.addf %230, %232 : vector<32x256xf32>
    %234 = vector.extract_strided_slice %233 {offsets = [0, 0], sizes = [32, 128], strides = [1, 1]} : vector<32x256xf32> to vector<32x128xf32>
    %235 = vector.extract_strided_slice %233 {offsets = [0, 128], sizes = [32, 128], strides = [1, 1]} : vector<32x256xf32> to vector<32x128xf32>
    %236 = vector.shape_cast %227 : vector<16x128xf32> to vector<2x8x128xf32>
    %237 = arith.truncf %236 : vector<2x8x128xf32> to vector<2x8x128xbf16>
    %238 = vector.shape_cast %234 : vector<32x128xf32> to vector<2x16x128xf32>
    %239 = arith.truncf %238 : vector<2x16x128xf32> to vector<2x16x128xbf16>
    %240 = vector.shape_cast %235 : vector<32x128xf32> to vector<2x16x128xf32>
    %241 = arith.truncf %240 : vector<2x16x128xf32> to vector<2x16x128xbf16>
    %242 = vector.extract_strided_slice %237 {offsets = [0, 0, 0], sizes = [2, 8, 16], strides = [1, 1, 1]} : vector<2x8x128xbf16> to vector<2x8x16xbf16>
    %243 = vector.extract_strided_slice %239 {offsets = [0, 0, 0], sizes = [2, 16, 16], strides = [1, 1, 1]} : vector<2x16x128xbf16> to vector<2x16x16xbf16>
    "tpu.trace_start"() <{level = 10 : i32, message = "bqd,bkd->bqk"}> : () -> ()
    %cst_83 = arith.constant dense<0.000000e+00> : vector<2x8x16xf32>
    %244 = tpu.matmul %242, %243, %cst_83 {dimension_numbers = #tpu.dot_dimension_numbers<[2], [2], [1], [1], [0, 0, 0, 1, 1, 1], [0], [0]>} : vector<2x8x16xbf16>, vector<2x16x16xbf16>, vector<2x8x16xf32> -> vector<2x8x16xf32>
    %cst_84 = arith.constant -6.550400e+04 : f32
    "tpu.trace_stop"() : () -> ()
    %245 = vector.shape_cast %9 : vector<2x1x16xi1> to vector<2x1x16xi1>
    %246 = vector.broadcast %245 : vector<2x1x16xi1> to vector<2x8x16xi1>
    %247 = vector.broadcast %cst_84 : f32 to vector<2x8x16xf32>
    %248 = arith.select %246, %247, %244 : vector<2x8x16xi1>, vector<2x8x16xf32>
    %cst_85 = arith.constant dense<0xFF800000> : vector<2x8xf32>
    %249 = vector.multi_reduction <maximumf>, %248, %cst_85 [2] : vector<2x8x16xf32> to vector<2x8xf32>
    %250 = vector.shape_cast %249 : vector<2x8xf32> to vector<2x8x1xf32>
    %251 = vector.broadcast %250 : vector<2x8x1xf32> to vector<2x8x16xf32>
    %252 = arith.subf %248, %251 : vector<2x8x16xf32>
    %253 = math.exp %252 : vector<2x8x16xf32>
    %cst_86 = arith.constant dense<0.000000e+00> : vector<2x8xf32>
    %254 = vector.multi_reduction <add>, %253, %cst_86 [2] : vector<2x8x16xf32> to vector<2x8xf32>
    %255 = vector.shape_cast %254 : vector<2x8xf32> to vector<2x8x1xf32>
    %256 = tpu.reciprocal %255 {approx = true} : vector<2x8x1xf32> -> vector<2x8x1xf32>
    %257 = vector.broadcast %256 : vector<2x8x1xf32> to vector<2x8x16xf32>
    %258 = arith.mulf %253, %257 : vector<2x8x16xf32>
    %259 = arith.truncf %258 : vector<2x8x16xf32> to vector<2x8x16xbf16>
    %260 = vector.extract_strided_slice %241 {offsets = [0, 0, 0], sizes = [2, 16, 16], strides = [1, 1, 1]} : vector<2x16x128xbf16> to vector<2x16x16xbf16>
    "tpu.trace_start"() <{level = 10 : i32, message = "bqk,bkd->bqd"}> : () -> ()
    %cst_87 = arith.constant dense<0.000000e+00> : vector<2x8x16xf32>
    %261 = tpu.matmul %259, %260, %cst_87 {dimension_numbers = #tpu.dot_dimension_numbers<[2], [1], [1], [2], [0, 0, 0, 1, 1, 2], [0], [0]>} : vector<2x8x16xbf16>, vector<2x16x16xbf16>, vector<2x8x16xf32> -> vector<2x8x16xf32>
    "tpu.trace_stop"() : () -> ()
    %262 = vector.extract_strided_slice %237 {offsets = [0, 0, 16], sizes = [2, 8, 16], strides = [1, 1, 1]} : vector<2x8x128xbf16> to vector<2x8x16xbf16>
    %263 = vector.extract_strided_slice %239 {offsets = [0, 0, 16], sizes = [2, 16, 16], strides = [1, 1, 1]} : vector<2x16x128xbf16> to vector<2x16x16xbf16>
    "tpu.trace_start"() <{level = 10 : i32, message = "bqd,bkd->bqk"}> : () -> ()
    %cst_88 = arith.constant dense<0.000000e+00> : vector<2x8x16xf32>
    %264 = tpu.matmul %262, %263, %cst_88 {dimension_numbers = #tpu.dot_dimension_numbers<[2], [2], [1], [1], [0, 0, 0, 1, 1, 1], [0], [0]>} : vector<2x8x16xbf16>, vector<2x16x16xbf16>, vector<2x8x16xf32> -> vector<2x8x16xf32>
    %cst_89 = arith.constant -6.550400e+04 : f32
    "tpu.trace_stop"() : () -> ()
    %265 = vector.shape_cast %9 : vector<2x1x16xi1> to vector<2x1x16xi1>
    %266 = vector.broadcast %265 : vector<2x1x16xi1> to vector<2x8x16xi1>
    %267 = vector.broadcast %cst_89 : f32 to vector<2x8x16xf32>
    %268 = arith.select %266, %267, %264 : vector<2x8x16xi1>, vector<2x8x16xf32>
    %cst_90 = arith.constant dense<0xFF800000> : vector<2x8xf32>
    %269 = vector.multi_reduction <maximumf>, %268, %cst_90 [2] : vector<2x8x16xf32> to vector<2x8xf32>
    %270 = vector.shape_cast %269 : vector<2x8xf32> to vector<2x8x1xf32>
    %271 = vector.broadcast %270 : vector<2x8x1xf32> to vector<2x8x16xf32>
    %272 = arith.subf %268, %271 : vector<2x8x16xf32>
    %273 = math.exp %272 : vector<2x8x16xf32>
    %cst_91 = arith.constant dense<0.000000e+00> : vector<2x8xf32>
    %274 = vector.multi_reduction <add>, %273, %cst_91 [2] : vector<2x8x16xf32> to vector<2x8xf32>
    %275 = vector.shape_cast %274 : vector<2x8xf32> to vector<2x8x1xf32>
    %276 = tpu.reciprocal %275 {approx = true} : vector<2x8x1xf32> -> vector<2x8x1xf32>
    %277 = vector.broadcast %276 : vector<2x8x1xf32> to vector<2x8x16xf32>
    %278 = arith.mulf %273, %277 : vector<2x8x16xf32>
    %279 = arith.truncf %278 : vector<2x8x16xf32> to vector<2x8x16xbf16>
    %280 = vector.extract_strided_slice %241 {offsets = [0, 0, 16], sizes = [2, 16, 16], strides = [1, 1, 1]} : vector<2x16x128xbf16> to vector<2x16x16xbf16>
    "tpu.trace_start"() <{level = 10 : i32, message = "bqk,bkd->bqd"}> : () -> ()
    %cst_92 = arith.constant dense<0.000000e+00> : vector<2x8x16xf32>
    %281 = tpu.matmul %279, %280, %cst_92 {dimension_numbers = #tpu.dot_dimension_numbers<[2], [1], [1], [2], [0, 0, 0, 1, 1, 2], [0], [0]>} : vector<2x8x16xbf16>, vector<2x16x16xbf16>, vector<2x8x16xf32> -> vector<2x8x16xf32>
    "tpu.trace_stop"() : () -> ()
    %282 = vector.extract_strided_slice %237 {offsets = [0, 0, 32], sizes = [2, 8, 16], strides = [1, 1, 1]} : vector<2x8x128xbf16> to vector<2x8x16xbf16>
    %283 = vector.extract_strided_slice %239 {offsets = [0, 0, 32], sizes = [2, 16, 16], strides = [1, 1, 1]} : vector<2x16x128xbf16> to vector<2x16x16xbf16>
    "tpu.trace_start"() <{level = 10 : i32, message = "bqd,bkd->bqk"}> : () -> ()
    %cst_93 = arith.constant dense<0.000000e+00> : vector<2x8x16xf32>
    %284 = tpu.matmul %282, %283, %cst_93 {dimension_numbers = #tpu.dot_dimension_numbers<[2], [2], [1], [1], [0, 0, 0, 1, 1, 1], [0], [0]>} : vector<2x8x16xbf16>, vector<2x16x16xbf16>, vector<2x8x16xf32> -> vector<2x8x16xf32>
    %cst_94 = arith.constant -6.550400e+04 : f32
    "tpu.trace_stop"() : () -> ()
    %285 = vector.shape_cast %9 : vector<2x1x16xi1> to vector<2x1x16xi1>
    %286 = vector.broadcast %285 : vector<2x1x16xi1> to vector<2x8x16xi1>
    %287 = vector.broadcast %cst_94 : f32 to vector<2x8x16xf32>
    %288 = arith.select %286, %287, %284 : vector<2x8x16xi1>, vector<2x8x16xf32>
    %cst_95 = arith.constant dense<0xFF800000> : vector<2x8xf32>
    %289 = vector.multi_reduction <maximumf>, %288, %cst_95 [2] : vector<2x8x16xf32> to vector<2x8xf32>
    %290 = vector.shape_cast %289 : vector<2x8xf32> to vector<2x8x1xf32>
    %291 = vector.broadcast %290 : vector<2x8x1xf32> to vector<2x8x16xf32>
    %292 = arith.subf %288, %291 : vector<2x8x16xf32>
    %293 = math.exp %292 : vector<2x8x16xf32>
    %cst_96 = arith.constant dense<0.000000e+00> : vector<2x8xf32>
    %294 = vector.multi_reduction <add>, %293, %cst_96 [2] : vector<2x8x16xf32> to vector<2x8xf32>
    %295 = vector.shape_cast %294 : vector<2x8xf32> to vector<2x8x1xf32>
    %296 = tpu.reciprocal %295 {approx = true} : vector<2x8x1xf32> -> vector<2x8x1xf32>
    %297 = vector.broadcast %296 : vector<2x8x1xf32> to vector<2x8x16xf32>
    %298 = arith.mulf %293, %297 : vector<2x8x16xf32>
    %299 = arith.truncf %298 : vector<2x8x16xf32> to vector<2x8x16xbf16>
    %300 = vector.extract_strided_slice %241 {offsets = [0, 0, 32], sizes = [2, 16, 16], strides = [1, 1, 1]} : vector<2x16x128xbf16> to vector<2x16x16xbf16>
    "tpu.trace_start"() <{level = 10 : i32, message = "bqk,bkd->bqd"}> : () -> ()
    %cst_97 = arith.constant dense<0.000000e+00> : vector<2x8x16xf32>
    %301 = tpu.matmul %299, %300, %cst_97 {dimension_numbers = #tpu.dot_dimension_numbers<[2], [1], [1], [2], [0, 0, 0, 1, 1, 2], [0], [0]>} : vector<2x8x16xbf16>, vector<2x16x16xbf16>, vector<2x8x16xf32> -> vector<2x8x16xf32>
    "tpu.trace_stop"() : () -> ()
    %302 = vector.extract_strided_slice %237 {offsets = [0, 0, 48], sizes = [2, 8, 16], strides = [1, 1, 1]} : vector<2x8x128xbf16> to vector<2x8x16xbf16>
    %303 = vector.extract_strided_slice %239 {offsets = [0, 0, 48], sizes = [2, 16, 16], strides = [1, 1, 1]} : vector<2x16x128xbf16> to vector<2x16x16xbf16>
    "tpu.trace_start"() <{level = 10 : i32, message = "bqd,bkd->bqk"}> : () -> ()
    %cst_98 = arith.constant dense<0.000000e+00> : vector<2x8x16xf32>
    %304 = tpu.matmul %302, %303, %cst_98 {dimension_numbers = #tpu.dot_dimension_numbers<[2], [2], [1], [1], [0, 0, 0, 1, 1, 1], [0], [0]>} : vector<2x8x16xbf16>, vector<2x16x16xbf16>, vector<2x8x16xf32> -> vector<2x8x16xf32>
    %cst_99 = arith.constant -6.550400e+04 : f32
    "tpu.trace_stop"() : () -> ()
    %305 = vector.shape_cast %9 : vector<2x1x16xi1> to vector<2x1x16xi1>
    %306 = vector.broadcast %305 : vector<2x1x16xi1> to vector<2x8x16xi1>
    %307 = vector.broadcast %cst_99 : f32 to vector<2x8x16xf32>
    %308 = arith.select %306, %307, %304 : vector<2x8x16xi1>, vector<2x8x16xf32>
    %cst_100 = arith.constant dense<0xFF800000> : vector<2x8xf32>
    %309 = vector.multi_reduction <maximumf>, %308, %cst_100 [2] : vector<2x8x16xf32> to vector<2x8xf32>
    %310 = vector.shape_cast %309 : vector<2x8xf32> to vector<2x8x1xf32>
    %311 = vector.broadcast %310 : vector<2x8x1xf32> to vector<2x8x16xf32>
    %312 = arith.subf %308, %311 : vector<2x8x16xf32>
    %313 = math.exp %312 : vector<2x8x16xf32>
    %cst_101 = arith.constant dense<0.000000e+00> : vector<2x8xf32>
    %314 = vector.multi_reduction <add>, %313, %cst_101 [2] : vector<2x8x16xf32> to vector<2x8xf32>
    %315 = vector.shape_cast %314 : vector<2x8xf32> to vector<2x8x1xf32>
    %316 = tpu.reciprocal %315 {approx = true} : vector<2x8x1xf32> -> vector<2x8x1xf32>
    %317 = vector.broadcast %316 : vector<2x8x1xf32> to vector<2x8x16xf32>
    %318 = arith.mulf %313, %317 : vector<2x8x16xf32>
    %319 = arith.truncf %318 : vector<2x8x16xf32> to vector<2x8x16xbf16>
    %320 = vector.extract_strided_slice %241 {offsets = [0, 0, 48], sizes = [2, 16, 16], strides = [1, 1, 1]} : vector<2x16x128xbf16> to vector<2x16x16xbf16>
    "tpu.trace_start"() <{level = 10 : i32, message = "bqk,bkd->bqd"}> : () -> ()
    %cst_102 = arith.constant dense<0.000000e+00> : vector<2x8x16xf32>
    %321 = tpu.matmul %319, %320, %cst_102 {dimension_numbers = #tpu.dot_dimension_numbers<[2], [1], [1], [2], [0, 0, 0, 1, 1, 2], [0], [0]>} : vector<2x8x16xbf16>, vector<2x16x16xbf16>, vector<2x8x16xf32> -> vector<2x8x16xf32>
    "tpu.trace_stop"() : () -> ()
    %322 = vector.extract_strided_slice %237 {offsets = [0, 0, 64], sizes = [2, 8, 16], strides = [1, 1, 1]} : vector<2x8x128xbf16> to vector<2x8x16xbf16>
    %323 = vector.extract_strided_slice %239 {offsets = [0, 0, 64], sizes = [2, 16, 16], strides = [1, 1, 1]} : vector<2x16x128xbf16> to vector<2x16x16xbf16>
    "tpu.trace_start"() <{level = 10 : i32, message = "bqd,bkd->bqk"}> : () -> ()
    %cst_103 = arith.constant dense<0.000000e+00> : vector<2x8x16xf32>
    %324 = tpu.matmul %322, %323, %cst_103 {dimension_numbers = #tpu.dot_dimension_numbers<[2], [2], [1], [1], [0, 0, 0, 1, 1, 1], [0], [0]>} : vector<2x8x16xbf16>, vector<2x16x16xbf16>, vector<2x8x16xf32> -> vector<2x8x16xf32>
    %cst_104 = arith.constant -6.550400e+04 : f32
    "tpu.trace_stop"() : () -> ()
    %325 = vector.shape_cast %9 : vector<2x1x16xi1> to vector<2x1x16xi1>
    %326 = vector.broadcast %325 : vector<2x1x16xi1> to vector<2x8x16xi1>
    %327 = vector.broadcast %cst_104 : f32 to vector<2x8x16xf32>
    %328 = arith.select %326, %327, %324 : vector<2x8x16xi1>, vector<2x8x16xf32>
    %cst_105 = arith.constant dense<0xFF800000> : vector<2x8xf32>
    %329 = vector.multi_reduction <maximumf>, %328, %cst_105 [2] : vector<2x8x16xf32> to vector<2x8xf32>
    %330 = vector.shape_cast %329 : vector<2x8xf32> to vector<2x8x1xf32>
    %331 = vector.broadcast %330 : vector<2x8x1xf32> to vector<2x8x16xf32>
    %332 = arith.subf %328, %331 : vector<2x8x16xf32>
    %333 = math.exp %332 : vector<2x8x16xf32>
    %cst_106 = arith.constant dense<0.000000e+00> : vector<2x8xf32>
    %334 = vector.multi_reduction <add>, %333, %cst_106 [2] : vector<2x8x16xf32> to vector<2x8xf32>
    %335 = vector.shape_cast %334 : vector<2x8xf32> to vector<2x8x1xf32>
    %336 = tpu.reciprocal %335 {approx = true} : vector<2x8x1xf32> -> vector<2x8x1xf32>
    %337 = vector.broadcast %336 : vector<2x8x1xf32> to vector<2x8x16xf32>
    %338 = arith.mulf %333, %337 : vector<2x8x16xf32>
    %339 = arith.truncf %338 : vector<2x8x16xf32> to vector<2x8x16xbf16>
    %340 = vector.extract_strided_slice %241 {offsets = [0, 0, 64], sizes = [2, 16, 16], strides = [1, 1, 1]} : vector<2x16x128xbf16> to vector<2x16x16xbf16>
    "tpu.trace_start"() <{level = 10 : i32, message = "bqk,bkd->bqd"}> : () -> ()
    %cst_107 = arith.constant dense<0.000000e+00> : vector<2x8x16xf32>
    %341 = tpu.matmul %339, %340, %cst_107 {dimension_numbers = #tpu.dot_dimension_numbers<[2], [1], [1], [2], [0, 0, 0, 1, 1, 2], [0], [0]>} : vector<2x8x16xbf16>, vector<2x16x16xbf16>, vector<2x8x16xf32> -> vector<2x8x16xf32>
    "tpu.trace_stop"() : () -> ()
    %342 = vector.extract_strided_slice %237 {offsets = [0, 0, 80], sizes = [2, 8, 16], strides = [1, 1, 1]} : vector<2x8x128xbf16> to vector<2x8x16xbf16>
    %343 = vector.extract_strided_slice %239 {offsets = [0, 0, 80], sizes = [2, 16, 16], strides = [1, 1, 1]} : vector<2x16x128xbf16> to vector<2x16x16xbf16>
    "tpu.trace_start"() <{level = 10 : i32, message = "bqd,bkd->bqk"}> : () -> ()
    %cst_108 = arith.constant dense<0.000000e+00> : vector<2x8x16xf32>
    %344 = tpu.matmul %342, %343, %cst_108 {dimension_numbers = #tpu.dot_dimension_numbers<[2], [2], [1], [1], [0, 0, 0, 1, 1, 1], [0], [0]>} : vector<2x8x16xbf16>, vector<2x16x16xbf16>, vector<2x8x16xf32> -> vector<2x8x16xf32>
    %cst_109 = arith.constant -6.550400e+04 : f32
    "tpu.trace_stop"() : () -> ()
    %345 = vector.shape_cast %9 : vector<2x1x16xi1> to vector<2x1x16xi1>
    %346 = vector.broadcast %345 : vector<2x1x16xi1> to vector<2x8x16xi1>
    %347 = vector.broadcast %cst_109 : f32 to vector<2x8x16xf32>
    %348 = arith.select %346, %347, %344 : vector<2x8x16xi1>, vector<2x8x16xf32>
    %cst_110 = arith.constant dense<0xFF800000> : vector<2x8xf32>
    %349 = vector.multi_reduction <maximumf>, %348, %cst_110 [2] : vector<2x8x16xf32> to vector<2x8xf32>
    %350 = vector.shape_cast %349 : vector<2x8xf32> to vector<2x8x1xf32>
    %351 = vector.broadcast %350 : vector<2x8x1xf32> to vector<2x8x16xf32>
    %352 = arith.subf %348, %351 : vector<2x8x16xf32>
    %353 = math.exp %352 : vector<2x8x16xf32>
    %cst_111 = arith.constant dense<0.000000e+00> : vector<2x8xf32>
    %354 = vector.multi_reduction <add>, %353, %cst_111 [2] : vector<2x8x16xf32> to vector<2x8xf32>
    %355 = vector.shape_cast %354 : vector<2x8xf32> to vector<2x8x1xf32>
    %356 = tpu.reciprocal %355 {approx = true} : vector<2x8x1xf32> -> vector<2x8x1xf32>
    %357 = vector.broadcast %356 : vector<2x8x1xf32> to vector<2x8x16xf32>
    %358 = arith.mulf %353, %357 : vector<2x8x16xf32>
    %359 = arith.truncf %358 : vector<2x8x16xf32> to vector<2x8x16xbf16>
    %360 = vector.extract_strided_slice %241 {offsets = [0, 0, 80], sizes = [2, 16, 16], strides = [1, 1, 1]} : vector<2x16x128xbf16> to vector<2x16x16xbf16>
    "tpu.trace_start"() <{level = 10 : i32, message = "bqk,bkd->bqd"}> : () -> ()
    %cst_112 = arith.constant dense<0.000000e+00> : vector<2x8x16xf32>
    %361 = tpu.matmul %359, %360, %cst_112 {dimension_numbers = #tpu.dot_dimension_numbers<[2], [1], [1], [2], [0, 0, 0, 1, 1, 2], [0], [0]>} : vector<2x8x16xbf16>, vector<2x16x16xbf16>, vector<2x8x16xf32> -> vector<2x8x16xf32>
    "tpu.trace_stop"() : () -> ()
    %362 = vector.extract_strided_slice %237 {offsets = [0, 0, 96], sizes = [2, 8, 16], strides = [1, 1, 1]} : vector<2x8x128xbf16> to vector<2x8x16xbf16>
    %363 = vector.extract_strided_slice %239 {offsets = [0, 0, 96], sizes = [2, 16, 16], strides = [1, 1, 1]} : vector<2x16x128xbf16> to vector<2x16x16xbf16>
    "tpu.trace_start"() <{level = 10 : i32, message = "bqd,bkd->bqk"}> : () -> ()
    %cst_113 = arith.constant dense<0.000000e+00> : vector<2x8x16xf32>
    %364 = tpu.matmul %362, %363, %cst_113 {dimension_numbers = #tpu.dot_dimension_numbers<[2], [2], [1], [1], [0, 0, 0, 1, 1, 1], [0], [0]>} : vector<2x8x16xbf16>, vector<2x16x16xbf16>, vector<2x8x16xf32> -> vector<2x8x16xf32>
    %cst_114 = arith.constant -6.550400e+04 : f32
    "tpu.trace_stop"() : () -> ()
    %365 = vector.shape_cast %9 : vector<2x1x16xi1> to vector<2x1x16xi1>
    %366 = vector.broadcast %365 : vector<2x1x16xi1> to vector<2x8x16xi1>
    %367 = vector.broadcast %cst_114 : f32 to vector<2x8x16xf32>
    %368 = arith.select %366, %367, %364 : vector<2x8x16xi1>, vector<2x8x16xf32>
    %cst_115 = arith.constant dense<0xFF800000> : vector<2x8xf32>
    %369 = vector.multi_reduction <maximumf>, %368, %cst_115 [2] : vector<2x8x16xf32> to vector<2x8xf32>
    %370 = vector.shape_cast %369 : vector<2x8xf32> to vector<2x8x1xf32>
    %371 = vector.broadcast %370 : vector<2x8x1xf32> to vector<2x8x16xf32>
    %372 = arith.subf %368, %371 : vector<2x8x16xf32>
    %373 = math.exp %372 : vector<2x8x16xf32>
    %cst_116 = arith.constant dense<0.000000e+00> : vector<2x8xf32>
    %374 = vector.multi_reduction <add>, %373, %cst_116 [2] : vector<2x8x16xf32> to vector<2x8xf32>
    %375 = vector.shape_cast %374 : vector<2x8xf32> to vector<2x8x1xf32>
    %376 = tpu.reciprocal %375 {approx = true} : vector<2x8x1xf32> -> vector<2x8x1xf32>
    %377 = vector.broadcast %376 : vector<2x8x1xf32> to vector<2x8x16xf32>
    %378 = arith.mulf %373, %377 : vector<2x8x16xf32>
    %379 = arith.truncf %378 : vector<2x8x16xf32> to vector<2x8x16xbf16>
    %380 = vector.extract_strided_slice %241 {offsets = [0, 0, 96], sizes = [2, 16, 16], strides = [1, 1, 1]} : vector<2x16x128xbf16> to vector<2x16x16xbf16>
    "tpu.trace_start"() <{level = 10 : i32, message = "bqk,bkd->bqd"}> : () -> ()
    %cst_117 = arith.constant dense<0.000000e+00> : vector<2x8x16xf32>
    %381 = tpu.matmul %379, %380, %cst_117 {dimension_numbers = #tpu.dot_dimension_numbers<[2], [1], [1], [2], [0, 0, 0, 1, 1, 2], [0], [0]>} : vector<2x8x16xbf16>, vector<2x16x16xbf16>, vector<2x8x16xf32> -> vector<2x8x16xf32>
    "tpu.trace_stop"() : () -> ()
    %382 = vector.extract_strided_slice %237 {offsets = [0, 0, 112], sizes = [2, 8, 16], strides = [1, 1, 1]} : vector<2x8x128xbf16> to vector<2x8x16xbf16>
    %383 = vector.extract_strided_slice %239 {offsets = [0, 0, 112], sizes = [2, 16, 16], strides = [1, 1, 1]} : vector<2x16x128xbf16> to vector<2x16x16xbf16>
    "tpu.trace_start"() <{level = 10 : i32, message = "bqd,bkd->bqk"}> : () -> ()
    %cst_118 = arith.constant dense<0.000000e+00> : vector<2x8x16xf32>
    %384 = tpu.matmul %382, %383, %cst_118 {dimension_numbers = #tpu.dot_dimension_numbers<[2], [2], [1], [1], [0, 0, 0, 1, 1, 1], [0], [0]>} : vector<2x8x16xbf16>, vector<2x16x16xbf16>, vector<2x8x16xf32> -> vector<2x8x16xf32>
    %cst_119 = arith.constant -6.550400e+04 : f32
    "tpu.trace_stop"() : () -> ()
    %385 = vector.shape_cast %9 : vector<2x1x16xi1> to vector<2x1x16xi1>
    %386 = vector.broadcast %385 : vector<2x1x16xi1> to vector<2x8x16xi1>
    %387 = vector.broadcast %cst_119 : f32 to vector<2x8x16xf32>
    %388 = arith.select %386, %387, %384 : vector<2x8x16xi1>, vector<2x8x16xf32>
    %cst_120 = arith.constant dense<0xFF800000> : vector<2x8xf32>
    %389 = vector.multi_reduction <maximumf>, %388, %cst_120 [2] : vector<2x8x16xf32> to vector<2x8xf32>
    %390 = vector.shape_cast %389 : vector<2x8xf32> to vector<2x8x1xf32>
    %391 = vector.broadcast %390 : vector<2x8x1xf32> to vector<2x8x16xf32>
    %392 = arith.subf %388, %391 : vector<2x8x16xf32>
    %393 = math.exp %392 : vector<2x8x16xf32>
    %cst_121 = arith.constant dense<0.000000e+00> : vector<2x8xf32>
    %394 = vector.multi_reduction <add>, %393, %cst_121 [2] : vector<2x8x16xf32> to vector<2x8xf32>
    %395 = vector.shape_cast %394 : vector<2x8xf32> to vector<2x8x1xf32>
    %396 = tpu.reciprocal %395 {approx = true} : vector<2x8x1xf32> -> vector<2x8x1xf32>
    %397 = vector.broadcast %396 : vector<2x8x1xf32> to vector<2x8x16xf32>
    %398 = arith.mulf %393, %397 : vector<2x8x16xf32>
    %399 = arith.truncf %398 : vector<2x8x16xf32> to vector<2x8x16xbf16>
    %400 = vector.extract_strided_slice %241 {offsets = [0, 0, 112], sizes = [2, 16, 16], strides = [1, 1, 1]} : vector<2x16x128xbf16> to vector<2x16x16xbf16>
    "tpu.trace_start"() <{level = 10 : i32, message = "bqk,bkd->bqd"}> : () -> ()
    %cst_122 = arith.constant dense<0.000000e+00> : vector<2x8x16xf32>
    %401 = tpu.matmul %399, %400, %cst_122 {dimension_numbers = #tpu.dot_dimension_numbers<[2], [1], [1], [2], [0, 0, 0, 1, 1, 2], [0], [0]>} : vector<2x8x16xbf16>, vector<2x16x16xbf16>, vector<2x8x16xf32> -> vector<2x8x16xf32>
    "tpu.trace_stop"() : () -> ()
    %402 = tpu.concatenate %261, %281, %301, %321, %341, %361, %381, %401 in 2 : vector<2x8x16xf32>, vector<2x8x16xf32>, vector<2x8x16xf32>, vector<2x8x16xf32>, vector<2x8x16xf32>, vector<2x8x16xf32>, vector<2x8x16xf32>, vector<2x8x16xf32> -> vector<2x8x128xf32>
    %403 = vector.shape_cast %402 : vector<2x8x128xf32> to vector<16x128xf32>
    %404 = arith.truncf %403 : vector<16x128xf32> to vector<16x128xbf16>
    %c0_123 = arith.constant 0 : index
    %c0_124 = arith.constant 0 : index
    %405 = vector.load %arg13[%c0_123, %c0_124] : memref<128x128xbf16, #tpu.memory_space<vmem>>, vector<128x128xbf16>
    %cst_125 = arith.constant dense<0.000000e+00> : vector<16x128xf32>
    %406 = tpu.matmul %404, %405, %cst_125 {dimension_numbers = #tpu.dot_dimension_numbers<[1], [0], [0], [1], [0, 0, 1, 1], [], []>} : vector<16x128xbf16>, vector<128x128xbf16>, vector<16x128xf32> -> vector<16x128xf32>
    %c0_126 = arith.constant 0 : index
    %c0_127 = arith.constant 0 : index
    %407 = vector.load %arg14[%c0_126, %c0_127] : memref<1x128xf32, #tpu.memory_space<vmem>>, vector<1x128xf32>
    %408 = vector.broadcast %407 : vector<1x128xf32> to vector<16x128xf32>
    %409 = arith.addf %406, %408 : vector<16x128xf32>
    %410 = arith.addf %219, %409 : vector<16x128xf32>
    %cst_128 = arith.constant dense<0.000000e+00> : vector<16xf32>
    %411 = vector.multi_reduction <add>, %410, %cst_128 [1] : vector<16x128xf32> to vector<16xf32>
    %412 = vector.shape_cast %411 : vector<16xf32> to vector<16x1xf32>
    %cst_129 = arith.constant 1.280000e+02 : f32
    %413 = vector.broadcast %cst_129 : f32 to vector<16x1xf32>
    %414 = arith.divf %412, %413 : vector<16x1xf32>
    %415 = vector.broadcast %414 : vector<16x1xf32> to vector<16x128xf32>
    %416 = arith.subf %410, %415 : vector<16x128xf32>
    %417 = arith.mulf %416, %416 : vector<16x128xf32>
    %cst_130 = arith.constant dense<0.000000e+00> : vector<16xf32>
    %418 = vector.multi_reduction <add>, %417, %cst_130 [1] : vector<16x128xf32> to vector<16xf32>
    %419 = vector.shape_cast %418 : vector<16xf32> to vector<16x1xf32>
    %cst_131 = arith.constant 1.280000e+02 : f32
    %420 = vector.broadcast %cst_131 : f32 to vector<16x1xf32>
    %421 = arith.divf %419, %420 : vector<16x1xf32>
    %422 = vector.broadcast %414 : vector<16x1xf32> to vector<16x128xf32>
    %423 = arith.subf %410, %422 : vector<16x128xf32>
    %cst_132 = arith.constant 9.99999974E-6 : f32
    %424 = vector.broadcast %cst_132 : f32 to vector<16x1xf32>
    %425 = arith.addf %421, %424 : vector<16x1xf32>
    %426 = math.rsqrt %425 : vector<16x1xf32>
    %427 = vector.broadcast %426 : vector<16x1xf32> to vector<16x128xf32>
    %428 = arith.mulf %423, %427 : vector<16x128xf32>
    %c0_133 = arith.constant 0 : index
    %c0_134 = arith.constant 0 : index
    %429 = vector.load %arg21[%c0_133, %c0_134] : memref<1x128xf32, #tpu.memory_space<vmem>>, vector<1x128xf32>
    %430 = vector.broadcast %429 : vector<1x128xf32> to vector<16x128xf32>
    %431 = arith.mulf %428, %430 : vector<16x128xf32>
    %c0_135 = arith.constant 0 : index
    %c0_136 = arith.constant 0 : index
    %432 = vector.load %arg22[%c0_135, %c0_136] : memref<1x128xf32, #tpu.memory_space<vmem>>, vector<1x128xf32>
    %433 = vector.broadcast %432 : vector<1x128xf32> to vector<16x128xf32>
    %434 = arith.addf %431, %433 : vector<16x128xf32>
    %435 = arith.truncf %434 : vector<16x128xf32> to vector<16x128xbf16>
    %c0_137 = arith.constant 0 : index
    %c0_138 = arith.constant 0 : index
    %436 = vector.load %arg15[%c0_137, %c0_138] : memref<128x256xbf16, #tpu.memory_space<vmem>>, vector<128x256xbf16>
    %cst_139 = arith.constant dense<0.000000e+00> : vector<16x256xf32>
    %437 = tpu.matmul %435, %436, %cst_139 {dimension_numbers = #tpu.dot_dimension_numbers<[1], [0], [0], [1], [0, 0, 1, 1], [], []>} : vector<16x128xbf16>, vector<128x256xbf16>, vector<16x256xf32> -> vector<16x256xf32>
    %c0_140 = arith.constant 0 : index
    %c0_141 = arith.constant 0 : index
    %438 = vector.load %arg16[%c0_140, %c0_141] : memref<1x256xf32, #tpu.memory_space<vmem>>, vector<1x256xf32>
    %439 = vector.broadcast %438 : vector<1x256xf32> to vector<16x256xf32>
    %440 = arith.addf %437, %439 : vector<16x256xf32>
    %cst_142 = arith.constant 0.000000e+00 : f32
    %441 = vector.broadcast %cst_142 : f32 to vector<16x256xf32>
    %442 = arith.maximumf %440, %441 : vector<16x256xf32>
    %443 = arith.truncf %442 : vector<16x256xf32> to vector<16x256xbf16>
    %c0_143 = arith.constant 0 : index
    %c0_144 = arith.constant 0 : index
    %444 = vector.load %arg17[%c0_143, %c0_144] : memref<256x128xbf16, #tpu.memory_space<vmem>>, vector<256x128xbf16>
    %cst_145 = arith.constant dense<0.000000e+00> : vector<16x128xf32>
    %445 = tpu.matmul %443, %444, %cst_145 {dimension_numbers = #tpu.dot_dimension_numbers<[1], [0], [0], [1], [0, 0, 1, 1], [], []>} : vector<16x256xbf16>, vector<256x128xbf16>, vector<16x128xf32> -> vector<16x128xf32>
    %c0_146 = arith.constant 0 : index
    %c0_147 = arith.constant 0 : index
    %446 = vector.load %arg18[%c0_146, %c0_147] : memref<1x128xf32, #tpu.memory_space<vmem>>, vector<1x128xf32>
    %447 = vector.broadcast %446 : vector<1x128xf32> to vector<16x128xf32>
    %448 = arith.addf %445, %447 : vector<16x128xf32>
    %449 = arith.addf %434, %448 : vector<16x128xf32>
    %cst_148 = arith.constant dense<0.000000e+00> : vector<16xf32>
    %450 = vector.multi_reduction <add>, %449, %cst_148 [1] : vector<16x128xf32> to vector<16xf32>
    %451 = vector.shape_cast %450 : vector<16xf32> to vector<16x1xf32>
    %cst_149 = arith.constant 1.280000e+02 : f32
    %452 = vector.broadcast %cst_149 : f32 to vector<16x1xf32>
    %453 = arith.divf %451, %452 : vector<16x1xf32>
    %454 = vector.broadcast %453 : vector<16x1xf32> to vector<16x128xf32>
    %455 = arith.subf %449, %454 : vector<16x128xf32>
    %456 = arith.mulf %455, %455 : vector<16x128xf32>
    %cst_150 = arith.constant dense<0.000000e+00> : vector<16xf32>
    %457 = vector.multi_reduction <add>, %456, %cst_150 [1] : vector<16x128xf32> to vector<16xf32>
    %458 = vector.shape_cast %457 : vector<16xf32> to vector<16x1xf32>
    %cst_151 = arith.constant 1.280000e+02 : f32
    %459 = vector.broadcast %cst_151 : f32 to vector<16x1xf32>
    %460 = arith.divf %458, %459 : vector<16x1xf32>
    %461 = vector.broadcast %453 : vector<16x1xf32> to vector<16x128xf32>
    %462 = arith.subf %449, %461 : vector<16x128xf32>
    %cst_152 = arith.constant 9.99999974E-6 : f32
    %463 = vector.broadcast %cst_152 : f32 to vector<16x1xf32>
    %464 = arith.addf %460, %463 : vector<16x1xf32>
    %465 = math.rsqrt %464 : vector<16x1xf32>
    %466 = vector.broadcast %465 : vector<16x1xf32> to vector<16x128xf32>
    %467 = arith.mulf %462, %466 : vector<16x128xf32>
    %c0_153 = arith.constant 0 : index
    %c0_154 = arith.constant 0 : index
    %468 = vector.load %arg23[%c0_153, %c0_154] : memref<1x128xf32, #tpu.memory_space<vmem>>, vector<1x128xf32>
    %469 = vector.broadcast %468 : vector<1x128xf32> to vector<16x128xf32>
    %470 = arith.mulf %467, %469 : vector<16x128xf32>
    %c0_155 = arith.constant 0 : index
    %c0_156 = arith.constant 0 : index
    %471 = vector.load %arg24[%c0_155, %c0_156] : memref<1x128xf32, #tpu.memory_space<vmem>>, vector<1x128xf32>
    %472 = vector.broadcast %471 : vector<1x128xf32> to vector<16x128xf32>
    %473 = arith.addf %470, %472 : vector<16x128xf32>
    %474 = vector.shape_cast %473 : vector<16x128xf32> to vector<2x8x128xf32>
    %c0_157 = arith.constant 0 : index
    %c0_158 = arith.constant 0 : index
    %c0_159 = arith.constant 0 : index
    %475 = vector.load %arg25[%c0_157, %c0_158, %c0_159] : memref<2x8x128xf32, #tpu.memory_space<vmem>>, vector<2x8x128xf32>
    tpu.vector_store %arg25[%c0_157, %c0_158, %c0_159], %474 {strides = array<i32>} : memref<2x8x128xf32, #tpu.memory_space<vmem>>, vector<2x8x128xf32>,
    return
  }
  func.func @transform_0(%arg0: i32) -> (i32, i32, i32) {
    %c0_i32 = arith.constant 0 : i32
    %c0_i32_0 = arith.constant 0 : i32
    %c0_i32_1 = arith.constant 0 : i32
    return %arg0, %c0_i32, %c0_i32_0 : i32, i32, i32
  }
  func.func @transform_1(%arg0: i32) -> (i32, i32, i32) {
    %c0_i32 = arith.constant 0 : i32
    %c0_i32_0 = arith.constant 0 : i32
    %c0_i32_1 = arith.constant 0 : i32
    return %arg0, %c0_i32, %c0_i32_0 : i32, i32, i32
  }
  func.func @transform_2(%arg0: i32) -> (i32, i32, i32) {
    %c0_i32 = arith.constant 0 : i32
    %c0_i32_0 = arith.constant 0 : i32
    %c0_i32_1 = arith.constant 0 : i32
    return %arg0, %c0_i32, %c0_i32_0 : i32, i32, i32
  }
  func.func @transform_3(%arg0: i32) -> (i32, i32, i32) {
    %c0_i32 = arith.constant 0 : i32
    %c0_i32_0 = arith.constant 0 : i32
    %c0_i32_1 = arith.constant 0 : i32
    return %arg0, %c0_i32, %c0_i32_0 : i32, i32, i32
  }
  func.func @transform_4(%arg0: i32) -> (i32, i32) {
    %c0_i32 = arith.constant 0 : i32
    %c0_i32_0 = arith.constant 0 : i32
    %c0_i32_1 = arith.constant 0 : i32
    return %c0_i32, %c0_i32_0 : i32, i32
  }
  func.func @transform_5(%arg0: i32) -> (i32, i32) {
    %c0_i32 = arith.constant 0 : i32
    %c0_i32_0 = arith.constant 0 : i32
    %c0_i32_1 = arith.constant 0 : i32
    return %c0_i32, %c0_i32_0 : i32, i32
  }
  func.func @transform_6(%arg0: i32) -> (i32, i32) {
    %c0_i32 = arith.constant 0 : i32
    %c0_i32_0 = arith.constant 0 : i32
    %c0_i32_1 = arith.constant 0 : i32
    return %c0_i32, %c0_i32_0 : i32, i32
  }
  func.func @transform_7(%arg0: i32) -> (i32, i32) {
    %c0_i32 = arith.constant 0 : i32
    %c0_i32_0 = arith.constant 0 : i32
    %c0_i32_1 = arith.constant 0 : i32
    return %c0_i32, %c0_i32_0 : i32, i32
  }
  func.func @transform_8(%arg0: i32) -> (i32, i32) {
    %c0_i32 = arith.constant 0 : i32
    %c0_i32_0 = arith.constant 0 : i32
    %c0_i32_1 = arith.constant 0 : i32
    return %c0_i32, %c0_i32_0 : i32, i32
  }
  func.func @transform_9(%arg0: i32) -> (i32, i32) {
    %c0_i32 = arith.constant 0 : i32
    %c0_i32_0 = arith.constant 0 : i32
    %c0_i32_1 = arith.constant 0 : i32
    return %c0_i32, %c0_i32_0 : i32, i32
  }
  func.func @transform_10(%arg0: i32) -> (i32, i32) {
    %c0_i32 = arith.constant 0 : i32
    %c0_i32_0 = arith.constant 0 : i32
    %c0_i32_1 = arith.constant 0 : i32
    return %c0_i32, %c0_i32_0 : i32, i32
  }
  func.func @transform_11(%arg0: i32) -> (i32, i32) {
    %c0_i32 = arith.constant 0 : i32
    %c0_i32_0 = arith.constant 0 : i32
    %c0_i32_1 = arith.constant 0 : i32
    return %c0_i32, %c0_i32_0 : i32, i32
  }
  func.func @transform_12(%arg0: i32) -> (i32, i32) {
    %c0_i32 = arith.constant 0 : i32
    %c0_i32_0 = arith.constant 0 : i32
    %c0_i32_1 = arith.constant 0 : i32
    return %c0_i32, %c0_i32_0 : i32, i32
  }
  func.func @transform_13(%arg0: i32) -> (i32, i32) {
    %c0_i32 = arith.constant 0 : i32
    %c0_i32_0 = arith.constant 0 : i32
    %c0_i32_1 = arith.constant 0 : i32
    return %c0_i32, %c0_i32_0 : i32, i32
  }
  func.func @transform_14(%arg0: i32) -> (i32, i32) {
    %c0_i32 = arith.constant 0 : i32
    %c0_i32_0 = arith.constant 0 : i32
    %c0_i32_1 = arith.constant 0 : i32
    return %c0_i32, %c0_i32_0 : i32, i32
  }
  func.func @transform_15(%arg0: i32) -> (i32, i32) {
    %c0_i32 = arith.constant 0 : i32
    %c0_i32_0 = arith.constant 0 : i32
    %c0_i32_1 = arith.constant 0 : i32
    return %c0_i32, %c0_i32_0 : i32, i32
  }
  func.func @transform_16(%arg0: i32) -> (i32, i32) {
    %c0_i32 = arith.constant 0 : i32
    %c0_i32_0 = arith.constant 0 : i32
    %c0_i32_1 = arith.constant 0 : i32
    return %c0_i32, %c0_i32_0 : i32, i32
  }
  func.func @transform_17(%arg0: i32) -> (i32, i32) {
    %c0_i32 = arith.constant 0 : i32
    %c0_i32_0 = arith.constant 0 : i32
    %c0_i32_1 = arith.constant 0 : i32
    return %c0_i32, %c0_i32_0 : i32, i32
  }
  func.func @transform_18(%arg0: i32) -> (i32, i32) {
    %c0_i32 = arith.constant 0 : i32
    %c0_i32_0 = arith.constant 0 : i32
    %c0_i32_1 = arith.constant 0 : i32
    return %c0_i32, %c0_i32_0 : i32, i32
  }
  func.func @transform_19(%arg0: i32) -> (i32, i32) {
    %c0_i32 = arith.constant 0 : i32
    %c0_i32_0 = arith.constant 0 : i32
    %c0_i32_1 = arith.constant 0 : i32
    return %c0_i32, %c0_i32_0 : i32, i32
  }
  func.func @transform_20(%arg0: i32) -> (i32, i32) {
    %c0_i32 = arith.constant 0 : i32
    %c0_i32_0 = arith.constant 0 : i32
    %c0_i32_1 = arith.constant 0 : i32
    return %c0_i32, %c0_i32_0 : i32, i32
  }
  func.func @transform_21(%arg0: i32) -> (i32, i32) {
    %c0_i32 = arith.constant 0 : i32
    %c0_i32_0 = arith.constant 0 : i32
    %c0_i32_1 = arith.constant 0 : i32
    return %c0_i32, %c0_i32_0 : i32, i32
  }
  func.func @transform_22(%arg0: i32) -> (i32, i32) {
    %c0_i32 = arith.constant 0 : i32
    %c0_i32_0 = arith.constant 0 : i32
    %c0_i32_1 = arith.constant 0 : i32
    return %c0_i32, %c0_i32_0 : i32, i32
  }
  func.func @transform_23(%arg0: i32) -> (i32, i32) {
    %c0_i32 = arith.constant 0 : i32
    %c0_i32_0 = arith.constant 0 : i32
    %c0_i32_1 = arith.constant 0 : i32
    return %c0_i32, %c0_i32_0 : i32, i32
  }
  func.func @transform_24(%arg0: i32) -> (i32, i32, i32) {
    %c0_i32 = arith.constant 0 : i32
    %c0_i32_0 = arith.constant 0 : i32
    %c0_i32_1 = arith.constant 0 : i32
    return %arg0, %c0_i32, %c0_i32_0 : i32, i32, i32
  }
}

</mosaic_0001>

<bundles_post_ra>
// kernel: tpu_custom_call.1
= control target key start
LH: loop header
LB: loop body
LE: loop exit
PB: predicated region body
PF: predicated region fallthrough
CT: control target
= control target key end

     0   :  { %s7838_s0 = inlined_call_operand.hbm [shape: f32[2,8,128], index: 0, kind: input, shape index: {}]   ;;  %s7839_s1 = inlined_call_operand.hbm [shape: f32[2,16,128], index: 1, kind: input, shape index: {}]   ;;  %s7840_s2 = inlined_call_operand.vmem [shape: f32[2,1,8], index: 2, kind: input, shape index: {}]   ;;  %s7841_s3 = inlined_call_operand.vmem [shape: f32[2,1,16], index: 3, kind: input, shape index: {}]   ;;  %s7842_s4 = inlined_call_operand.hbm [shape: bf16[128,384], index: 4, kind: input, shape index: {}]   ;;  %s7843_s5 = inlined_call_operand.vmem [shape: f32[1,384], index: 5, kind: input, shape index: {}]   ;;  %s7844_s6 = inlined_call_operand.hbm [shape: bf16[128,128], index: 6, kind: input, shape index: {}]   ;;  %s7845_s7 = inlined_call_operand.vmem [shape: f32[1,128], index: 7, kind: input, shape index: {}]   ;;  %s7846_s8 = inlined_call_operand.hbm [shape: bf16[128,128], index: 8, kind: input, shape index: {}]   ;;  %s7847_s9 = inlined_call_operand.vmem [shape: f32[1,128], index: 9, kind: input, shape index: {}]   ;;  %s7848_s10 = inlined_call_operand.hbm [shape: bf16[128,256], index: 10, kind: input, shape index: {}]   ;;  %s7849_s11 = inlined_call_operand.vmem [shape: f32[1,256], index: 11, kind: input, shape index: {}]   ;;  %s7850_s12 = inlined_call_operand.hbm [shape: bf16[128,128], index: 12, kind: input, shape index: {}]   ;;  %s7851_s13 = inlined_call_operand.vmem [shape: f32[1,128], index: 13, kind: input, shape index: {}]   ;;  %s7852_s14 = inlined_call_operand.hbm [shape: bf16[128,256], index: 14, kind: input, shape index: {}]   ;;  %s7853_s15 = inlined_call_operand.vmem [shape: f32[1,256], index: 15, kind: input, shape index: {}]   ;;  %s7854_s16 = inlined_call_operand.hbm [shape: bf16[256,128], index: 16, kind: input, shape index: {}]   ;;  %s7855_s17 = inlined_call_operand.vmem [shape: f32[1,128], index: 17, kind: input, shape index: {}]   ;;  %s7856_s18 = inlined_call_operand.vmem [shape: f32[1,128], index: 18, kind: input, shape index: {}]   ;;  %s7857_s19 = inlined_call_operand.vmem [shape: f32[1,128], index: 19, kind: input, shape index: {}]   ;;  %s7858_s20 = inlined_call_operand.vmem [shape: f32[1,128], index: 20, kind: input, shape index: {}]   ;;  %s7859_s21 = inlined_call_operand.vmem [shape: f32[1,128], index: 21, kind: input, shape index: {}]   ;;  %s7860_s22 = inlined_call_operand.vmem [shape: f32[1,128], index: 22, kind: input, shape index: {}]   ;;  %s7861_s23 = inlined_call_operand.vmem [shape: f32[1,128], index: 23, kind: input, shape index: {}]   ;;  %s7862_s24 = inlined_call_operand.hbm [shape: f32[2,8,128], index: 24, kind: output, shape index: {}]  }
   0x1   :  { %7880 = sst [smem:[#allocation24_spill]] %s7838_s0 }
   0x2   :  { %7881 = sst [smem:[#allocation25_spill]] %s7839_s1 }
   0x3   :  { %7882 = sst [smem:[#allocation26_spill]] %s7840_s2 }
   0x4   :  { %7883 = sst [smem:[#allocation27_spill]] %s7841_s3 }
   0x5   :  { %7884 = sst [smem:[#allocation28_spill]] %s7842_s4 }
   0x6   :  { %7885 = sst [smem:[#allocation29_spill]] %s7843_s5 }
   0x7   :  { %7886 = sst [smem:[#allocation30_spill]] %s7844_s6 }
   0x8   :  { %7887 = sst [smem:[#allocation31_spill]] %s7845_s7 }
   0x9   :  { %7888 = sst [smem:[#allocation32_spill]] %s7846_s8 }
   0xa   :  { %7889 = sst [smem:[#allocation33_spill]] %s7861_s23 }
   0xb   :  { %7890 = sst [smem:[#allocation34_spill]] %s7862_s24 }
   0xc   :  { %29 = vsyncpa [#allocation3], 0 }
   0xd   :  { %30 = vsyncpa [#allocation6], 0 }
   0xe   :  { %31 = vsyncpa [#allocation9], 0 }
   0xf   :  { %32 = vsyncpa [#allocation12], 0 }
  0x10   :  { %33 = vsyncpa [#allocation15], 0 }
  0x11   :  { %34 = vsyncpa [#allocation4], 0  ;;  %s6567_s5 = smov [#allocation5]   ;;  %s6568_s27 = smov [#allocation8]  }
  0x12   :  { %s52_s26 = sshll.u32 %s6567_s5, 4  ;;  %s82_s28 = sshll.u32 %s6568_s27, 4  ;;  %s53_s26 = int_to_ptr.vmem [resolvable:$true] %s52_s26  ;;  %s6717_s28 = int_to_ptr.vmem [resolvable:$true] %s82_s28 }
  0x13   :  { %s7891_s29 = sld [smem:[#allocation25_spill]] }
  0x19   :  { %s6335_s0 = scalar_lea.hbm %s7891_s29, 512 }
  0x1a   :  { %p6336_p0 = scmp.ne.s32.totalorder %s7891_s29, %s6335_s0  ;;  %p6339_p1 = scmp.lt.u32.totalorder %s6335_s0, %s7891_s29 }
  0x1c   :  { %p6341_p2 = pnand %p6339_p1, %p6336_p0 }
  0x1e   :  { %6344 = shalt.err (!%p6341_p2)
}
  0x1f   :  { %s6345_s8 = scalar_lea.vmem %s53_s26, 512  ;;  %p6350_p4 = scmp.lt.s32.totalorder %s53_s26, %s53_s26 }
  0x20   :  { %p6346_p3 = scmp.ne.s32.totalorder %s53_s26, %s6345_s8  ;;  %p6351_p5 = scmp.lt.s32.totalorder %s6345_s8, %s6345_s8 }
  0x22   :  { %p6352_p6 = por %p6351_p5, %p6350_p4 }
  0x24   :  { %p6353_p7 = pnand %p6352_p6, %p6346_p3 }
  0x26   :  { %6356 = shalt.err (!%p6353_p7)
}
  0x27   :  { %s7871_s4 = smov 128   ;;  %s7873_s1 = smov 8  }
  0x28   :  { %58 = dma.hbm_to_vmem [thread:$0]  %s7891_s29, 512, %s53_s26, [#allocation6], %s7871_s4, %s7871_s4, %s7873_s1  }
  0x29   :  { %s7892_s0 = sld [smem:[#allocation30_spill]] }
  0x2f   :  { %s6357_s7 = scalar_lea.hbm %s7892_s0, 1024 }
  0x30   :  { %p6358_p8 = scmp.ne.s32.totalorder %s7892_s0, %s6357_s7  ;;  %p6361_p9 = scmp.lt.u32.totalorder %s6357_s7, %s7892_s0 }
  0x32   :  { %p6363_p10 = pnand %p6361_p9, %p6358_p8 }
  0x34   :  { %6366 = shalt.err (!%p6363_p10)
}
  0x35   :  { %s6367_s24 = scalar_lea.vmem %s6717_s28, 1024  ;;  %p6372_p12 = scmp.lt.s32.totalorder %s6717_s28, %s6717_s28 }
  0x36   :  { %p6368_p11 = scmp.ne.s32.totalorder %s6717_s28, %s6367_s24  ;;  %p6373_p13 = scmp.lt.s32.totalorder %s6367_s24, %s6367_s24 }
  0x38   :  { %p6374_p0 = por %p6373_p13, %p6372_p12 }
  0x3a   :  { %p6375_p1 = pnand %p6374_p0, %p6368_p11 }
  0x3c   :  { %6378 = shalt.err (!%p6375_p1)
}
  0x3d   :  { %s7875_s26 = smov 64   ;;  %s7877_s29 = smov 4  }
  0x3e   :  { %88 = dma.hbm_to_vmem [thread:$0]  %s7892_s0, 1024, %s6717_s28, [#allocation9], %s7875_s26, %s7875_s26, %s7877_s29  }
  0x3f   :  { %s6573_s6 = smov [#allocation11]   ;;  %s6574_s7 = smov [#allocation14]  }
  0x40   :  { %s110_s2 = sshll.u32 %s6573_s6, 4  ;;  %s138_s30 = sshll.u32 %s6574_s7, 4  ;;  %s111_s2 = int_to_ptr.vmem [resolvable:$true] %s110_s2  ;;  %s6754_s30 = int_to_ptr.vmem [resolvable:$true] %s138_s30 }
  0x41   :  { %s6379_s25 = scalar_lea.hbm %s7848_s10, 2048 }
  0x42   :  { %p6380_p2 = scmp.ne.s32.totalorder %s7848_s10, %s6379_s25  ;;  %p6383_p3 = scmp.lt.u32.totalorder %s6379_s25, %s7848_s10 }
  0x44   :  { %p6385_p4 = pnand %p6383_p3, %p6380_p2 }
  0x46   :  { %6388 = shalt.err (!%p6385_p4)
}
  0x47   :  { %s6389_s28 = scalar_lea.vmem %s111_s2, 2048  ;;  %p6394_p6 = scmp.lt.s32.totalorder %s111_s2, %s111_s2 }
  0x48   :  { %p6390_p5 = scmp.ne.s32.totalorder %s111_s2, %s6389_s28  ;;  %p6395_p7 = scmp.lt.s32.totalorder %s6389_s28, %s6389_s28 }
  0x4a   :  { %p6396_p8 = por %p6395_p7, %p6394_p6 }
  0x4c   :  { %p6397_p9 = pnand %p6396_p8, %p6390_p5 }
  0x4e   :  { %6400 = shalt.err (!%p6397_p9)
}
  0x4f   :  { %s7893_s0 = smov 8   ;;  %s7894_s5 = smov 128  }
  0x50   :  { %116 = dma.hbm_to_vmem [thread:$0]  %s7848_s10, 2048, %s111_s2, [#allocation12], %s7894_s5, %s7894_s5, %s7893_s0  }
  0x51   :  { %s6401_s23 = scalar_lea.hbm %s7852_s14, 2048 }
  0x52   :  { %p6402_p10 = scmp.ne.s32.totalorder %s7852_s14, %s6401_s23  ;;  %p6405_p11 = scmp.lt.u32.totalorder %s6401_s23, %s7852_s14 }
  0x54   :  { %p6407_p12 = pnand %p6405_p11, %p6402_p10 }
  0x56   :  { %6410 = shalt.err (!%p6407_p12)
}
  0x57   :  { %s6411_s8 = scalar_lea.vmem %s6754_s30, 2048  ;;  %p6416_p0 = scmp.lt.s32.totalorder %s6754_s30, %s6754_s30 }
  0x58   :  { %p6412_p13 = scmp.ne.s32.totalorder %s6754_s30, %s6411_s8  ;;  %p6417_p1 = scmp.lt.s32.totalorder %s6411_s8, %s6411_s8 }
  0x5a   :  { %p6418_p2 = por %p6417_p1, %p6416_p0 }
  0x5c   :  { %p6419_p3 = pnand %p6418_p2, %p6412_p13 }
  0x5e   :  { %6422 = shalt.err (!%p6419_p3)
}
  0x5f   :  { %144 = dma.hbm_to_vmem [thread:$0]  %s7852_s14, 2048, %s6754_s30, [#allocation15], %s7894_s5, %s7894_s5, %s7893_s0  }
  0x60   :  { %s6575_s28 = smov [#allocation2]   ;;  %s6576_s6 = smov [#allocation7]  }
  0x61   :  { %s40_s27 = sshll.u32 %s6575_s28, 4  ;;  %s68_s4 = sshll.u32 %s6576_s6, 4  ;;  %s41_s27 = int_to_ptr.vmem [resolvable:$true] %s40_s27  ;;  %s6791_s4 = int_to_ptr.vmem [resolvable:$true] %s68_s4 }
  0x62   :  { %s7895_s1 = sld [smem:[#allocation24_spill]] }
  0x68   :  { %s6423_s24 = scalar_lea.hbm %s7895_s1, 256 }
  0x69   :  { %p6424_p4 = scmp.ne.s32.totalorder %s7895_s1, %s6423_s24  ;;  %p6427_p5 = scmp.lt.u32.totalorder %s6423_s24, %s7895_s1 }
  0x6b   :  { %p6429_p6 = pnand %p6427_p5, %p6424_p4 }
  0x6d   :  { %6432 = shalt.err (!%p6429_p6)
}
  0x6e   :  { %s6433_s14 = scalar_lea.vmem %s41_s27, 256  ;;  %p6438_p8 = scmp.lt.s32.totalorder %s41_s27, %s41_s27 }
  0x6f   :  { %p6434_p7 = scmp.ne.s32.totalorder %s41_s27, %s6433_s14  ;;  %p6439_p9 = scmp.lt.s32.totalorder %s6433_s14, %s6433_s14 }
  0x71   :  { %p6440_p10 = por %p6439_p9, %p6438_p8 }
  0x73   :  { %p6441_p11 = pnand %p6440_p10, %p6434_p7 }
  0x75   :  { %6444 = shalt.err (!%p6441_p11)
}
  0x76   :  { %46 = dma.hbm_to_vmem [thread:$0]  %s7895_s1, 256, %s41_s27, [#allocation3], %s7894_s5, %s7894_s5, %s7893_s0  }
  0x77   :  { %s7896_s26 = sld [smem:[#allocation28_spill]] }
  0x7d   :  { %s6445_s6 = scalar_lea.hbm %s7896_s26, 3072 }
  0x7e   :  { %p6446_p12 = scmp.ne.s32.totalorder %s7896_s26, %s6445_s6  ;;  %p6449_p13 = scmp.lt.u32.totalorder %s6445_s6, %s7896_s26 }
  0x80   :  { %p6451_p0 = pnand %p6449_p13, %p6446_p12 }
  0x82   :  { %6454 = shalt.err (!%p6451_p0)
}
  0x83   :  { %s6455_s25 = scalar_lea.vmem %s6791_s4, 3072  ;;  %p6460_p2 = scmp.lt.s32.totalorder %s6791_s4, %s6791_s4 }
  0x84   :  { %p6456_p1 = scmp.ne.s32.totalorder %s6791_s4, %s6455_s25  ;;  %p6461_p3 = scmp.lt.s32.totalorder %s6455_s25, %s6455_s25 }
  0x86   :  { %p6462_p4 = por %p6461_p3, %p6460_p2 }
  0x88   :  { %p6463_p5 = pnand %p6462_p4, %p6456_p1 }
  0x8a   :  { %6466 = shalt.err (!%p6463_p5)
}
  0x8b   :  { %s6577_s27 = smov 192   ;;  %s6578_s1 = smov 12  }
  0x8c   :  { %74 = dma.hbm_to_vmem [thread:$0]  %s7896_s26, 3072, %s6791_s4, [#allocation6], %s6577_s27, %s6577_s27, %s6578_s1  }
  0x8d   :  { %s6579_s30 = smov [#allocation10]   ;;  %s6580_s2 = smov [#allocation13]  }
  0x8e   :  { %s96_s10 = sshll.u32 %s6579_s30, 4  ;;  %s124_s28 = sshll.u32 %s6580_s2, 4  ;;  %s97_s10 = int_to_ptr.vmem [resolvable:$true] %s96_s10  ;;  %s6825_s28 = int_to_ptr.vmem [resolvable:$true] %s124_s28 }
  0x8f   :  { %s7897_s23 = sld [smem:[#allocation32_spill]] }
  0x95   :  { %s6467_s24 = scalar_lea.hbm %s7897_s23, 1024 }
  0x96   :  { %p6468_p6 = scmp.ne.s32.totalorder %s7897_s23, %s6467_s24  ;;  %p6471_p7 = scmp.lt.u32.totalorder %s6467_s24, %s7897_s23 }
  0x98   :  { %p6473_p8 = pnand %p6471_p7, %p6468_p6 }
  0x9a   :  { %6476 = shalt.err (!%p6473_p8)
}
  0x9b   :  { %s6477_s4 = scalar_lea.vmem %s97_s10, 1024  ;;  %p6482_p10 = scmp.lt.s32.totalorder %s97_s10, %s97_s10 }
  0x9c   :  { %p6478_p9 = scmp.ne.s32.totalorder %s97_s10, %s6477_s4  ;;  %p6483_p11 = scmp.lt.s32.totalorder %s6477_s4, %s6477_s4 }
  0x9e   :  { %p6484_p12 = por %p6483_p11, %p6482_p10 }
  0xa0   :  { %p6485_p13 = pnand %p6484_p12, %p6478_p9 }
  0xa2   :  { %6488 = shalt.err (!%p6485_p13)
}
  0xa3   :  { %s7898_s26 = smov 4   ;;  %s7899_s27 = smov 64  }
  0xa4   :  { %102 = dma.hbm_to_vmem [thread:$0]  %s7897_s23, 1024, %s97_s10, [#allocation9], %s7899_s27, %s7899_s27, %s7898_s26  }
  0xa5   :  { %s6489_s29 = scalar_lea.hbm %s7850_s12, 1024 }
  0xa6   :  { %p6490_p0 = scmp.ne.s32.totalorder %s7850_s12, %s6489_s29  ;;  %p6493_p1 = scmp.lt.u32.totalorder %s6489_s29, %s7850_s12 }
  0xa8   :  { %p6495_p2 = pnand %p6493_p1, %p6490_p0 }
  0xaa   :  { %6498 = shalt.err (!%p6495_p2)
}
  0xab   :  { %s6499_s24 = scalar_lea.vmem %s6825_s28, 1024  ;;  %p6504_p4 = scmp.lt.s32.totalorder %s6825_s28, %s6825_s28 }
  0xac   :  { %p6500_p3 = scmp.ne.s32.totalorder %s6825_s28, %s6499_s24  ;;  %p6505_p5 = scmp.lt.s32.totalorder %s6499_s24, %s6499_s24 }
  0xae   :  { %p6506_p6 = por %p6505_p5, %p6504_p4 }
  0xb0   :  { %p6507_p7 = pnand %p6506_p6, %p6500_p3 }
  0xb2   :  { %6510 = shalt.err (!%p6507_p7)
}
  0xb3   :  { %130 = dma.hbm_to_vmem [thread:$0]  %s7850_s12, 1024, %s6825_s28, [#allocation12], %s7899_s27, %s7899_s27, %s7898_s26  }
  0xb4   :  { %s6581_s3 = smov [#allocation16]   ;;  %s6511_s8 = scalar_lea.hbm %s7854_s16, 2048 }
  0xb5   :  { %s152_s25 = sshll.u32 %s6581_s3, 4  ;;  %p6512_p8 = scmp.ne.s32.totalorder %s7854_s16, %s6511_s8  ;;  %s153_s25 = int_to_ptr.vmem [resolvable:$true] %s152_s25 }
  0xb6   :  { %p6515_p9 = scmp.lt.u32.totalorder %s6511_s8, %s7854_s16 }
  0xb8   :  { %p6517_p10 = pnand %p6515_p9, %p6512_p8 }
  0xba   :  { %6520 = shalt.err (!%p6517_p10)
}
  0xbb   :  { %s6521_s2 = scalar_lea.vmem %s153_s25, 2048  ;;  %p6526_p12 = scmp.lt.s32.totalorder %s153_s25, %s153_s25 }
  0xbc   :  { %p6522_p11 = scmp.ne.s32.totalorder %s153_s25, %s6521_s2  ;;  %p6527_p13 = scmp.lt.s32.totalorder %s6521_s2, %s6521_s2 }
  0xbe   :  { %p6528_p0 = por %p6527_p13, %p6526_p12 }
  0xc0   :  { %p6529_p1 = pnand %p6528_p0, %p6522_p11 }
  0xc2   :  { %6532 = shalt.err (!%p6529_p1)
}
  0xc3   :  { %158 = dma.hbm_to_vmem [thread:$0]  %s7854_s16, 2048, %s153_s25, [#allocation15], %s7899_s27, %s7899_s27, %s7898_s26  }
  0xc4   :  { %6555 = dma.done.wait [#allocation3], 256  }
  0xc5   :  { %6556 = vsyncadd [#allocation3], 4294967040 }
  0xc6   :  { %6557 = dma.done.wait [#allocation6], 3584  }
  0xc7   :  { %6558 = vsyncadd [#allocation6], 4294963712 }
  0xc8   :  { %6559 = dma.done.wait [#allocation9], 2048  }
  0xc9   :  { %6560 = vsyncadd [#allocation9], 4294965248 }
  0xca   :  { %6561 = dma.done.wait [#allocation12], 3072  }
  0xcb   :  { %6562 = vsyncadd [#allocation12], 4294964224 }
  0xcc   :  { %6563 = dma.done.wait [#allocation15], 4096  }
  0xcd   :  { %6564 = vsyncadd [#allocation15], 4294963200  ;;  %v6582_v0 = vmov 0   ;;  %v6073_v1 = vld [vmem:[#allocation7 + $0x4] ss:$12 sps:$4 sm:$0xff]   ;;  %v202_v18 = vld [vmem:[#allocation2 + $0x8] sm:$0xff]  ;;  %v250_v21 = vlaneseq }
  0xce   :  { %425 = vmatprep.mubr.bf16.mxu0 %v6582_v0  ;;  %v6075_v2 = vld [vmem:[#allocation7] ss:$12 sps:$4 sm:$0xff]   ;;  %393 = vmatprep.subr.bf16.mxu0 %v6073_v1  ;;  %v6076_v3 = vld [vmem:[#allocation7 + $0x1c] ss:$12 sps:$4 sm:$0xff]   ;;  %v6078_v4 = vld [vmem:[#allocation7 + $0x18] ss:$12 sps:$4 sm:$0xff]  }
  0xcf   :  { %394 = vmatpush1.bf16.msra.mxu0 %v6075_v2  ;;  %v6079_v5 = vld [vmem:[#allocation7 + $0x34] ss:$12 sps:$4 sm:$0xff]   ;;  %v6081_v6 = vld [vmem:[#allocation7 + $0x30] ss:$12 sps:$4 sm:$0xff]   ;;  %v6082_v7 = vld [vmem:[#allocation7 + $0x4c] ss:$12 sps:$4 sm:$0xff]  }
  0xd0   :  { %395 = vmatprep.subr.bf16.mxu0 %v6076_v3  ;;  %v6084_v8 = vld [vmem:[#allocation7 + $0x48] ss:$12 sps:$4 sm:$0xff]   ;;  %v6085_v9 = vld [vmem:[#allocation7 + $0x64] ss:$12 sps:$4 sm:$0xff]   ;;  %v6087_v10 = vld [vmem:[#allocation7 + $0x60] ss:$12 sps:$4 sm:$0xff]  }
  0xd1   :  { %v6088_v11 = vld [vmem:[#allocation7 + $0x7c] ss:$12 sps:$4 sm:$0xff]   ;;  %v6090_v12 = vld [vmem:[#allocation7 + $0x78] ss:$12 sps:$4 sm:$0xff]   ;;  %v6091_v13 = vld [vmem:[#allocation7 + $0x94] ss:$12 sps:$4 sm:$0xff]  }
  0xd2   :  { %v6093_v14 = vld [vmem:[#allocation7 + $0x90] ss:$12 sps:$4 sm:$0xff]   ;;  %v6094_v15 = vld [vmem:[#allocation7 + $0xac] ss:$12 sps:$4 sm:$0xff]   ;;  %v6096_v16 = vld [vmem:[#allocation7 + $0xa8] ss:$12 sps:$4 sm:$0xff]  }
  0xd3   :  { %396 = vmatpush1.bf16.msra.mxu0 %v6078_v4  ;;  %v201_v17 = vld [vmem:[#allocation2] sm:$0xff]  ;;  %v6583_v20 = vmov 0.0   ;;  %vm6584_vm0 = vmmov 0   ;;  %v6887_v22 = vshrl.u32 %v250_v21, 7  ;;  %s7900_s6 = sld [smem:[#allocation29_spill]]  ;;  %vm485_vm1 = vcmask 130048  }
  0xd4   :  { %397 = vmatprep.subr.bf16.mxu0 %v6079_v5  ;;  %v6878_v19 = vpack.c.bf16 %v202_v18, %v201_v17  ;;  %5514 = vmatprep.subr.bf16.mxu1 %v6583_v20  ;;  %s6585_s7 = smov 112   ;;  %v6097_v44 = vld [vmem:[#allocation7 + $0x8] ss:$12 sps:$4 sm:$0xff]   ;;  %v6098_v45 = vld [vmem:[#allocation7 + $0x20] ss:$12 sps:$4 sm:$0xff]   ;;  %s7901_s23 = sld [smem:[#allocation26_spill]] }
  0xd5   :  { %5530 = vmatprep.mubr.msk.bf16.mxu1 %vm6584_vm0, %v6583_v20  ;;  %v6890_v23 = vsub.s32 1, %v6887_v22  ;;  %v6898_v25 = vsub.s32 0, %v6887_v22  ;;  %5515 = vmatpush3.bf16.msra.mxu1 %v6097_v44  ;;  %v6099_v46 = vld [vmem:[#allocation7 + $0x38] ss:$12 sps:$4 sm:$0xff]   ;;  %v6100_v47 = vld [vmem:[#allocation7 + $0x50] ss:$12 sps:$4 sm:$0xff]  }
  0xd6   :  { %5516 = vmatprep.subr.bf16.mxu1 %v6583_v20  ;;  %v6101_v48 = vld [vmem:[#allocation7 + $0x68] ss:$12 sps:$4 sm:$0xff]   ;;  %v6102_v49 = vld [vmem:[#allocation7 + $0x80] ss:$12 sps:$4 sm:$0xff]   ;;  %v6103_v50 = vld [vmem:[#allocation7 + $0x98] ss:$12 sps:$4 sm:$0xff]  }
  0xd7   :  { %398 = vmatpush1.bf16.msra.mxu0 %v6081_v6  ;;  %v6104_v51 = vld [vmem:[#allocation7 + $0xb0] ss:$12 sps:$4 sm:$0xff]   ;;  %vm592_vm5 = vcmask 64512   ;;  %vm620_vm7 = vcmask 1043456   ;;  %s6586_s4 = smov 96   ;;  %s6587_s1 = smov 80  }
  0xd8   :  { %399 = vmatprep.subr.bf16.mxu0 %v6082_v7  ;;  %s6588_s8 = smov 48   ;;  %s6589_s14 = smov 32   ;;  %vm2328_vm8 = vcmask 261120   ;;  %vm2331_vm9 = vcmask 392192   ;;  %vm2334_vm10 = vcmask 523264   ;;  %vm2337_vm11 = vcmask 654336  }
  0xd9   :  { %v6895_v24 = vld [vmem:[%s7900_s6] sm:$0x7]  ;;  %5517 = vmatpush3.bf16.msra.mxu1 %v6098_v45  ;;  %s6590_s30 = smov 16   ;;  %vm2340_vm12 = vcmask 785408   ;;  %vm2343_vm13 = vcmask 916480   ;;  %s7906_s2 = sld [smem:[#allocation31_spill]] }
  0xda   :  { %v257_v26 = vrot.slane %v6895_v24, %v6890_v23  ;;  %v253_v27 = vrot.slane %v6895_v24, %v6898_v25  ;;  %5518 = vmatprep.subr.bf16.mxu1 %v6583_v20  ;;  %v207_v52 = vld [vmem:[%s7901_s23] sm:$0x1]  ;;  %v208_v54 = vld [vmem:[%s7901_s23 + $0x1] sm:$0x1]  ;;  %s7907_s10 = sld [smem:[#allocation27_spill]]  ;;  %s7912_s5 = sld [smem:[#allocation33_spill]] }
  0xdb   :  { %400 = vmatpush1.bf16.msra.mxu0 %v6084_v8  ;;  %vm209_vm2 = vcmp.gt.f32.partialorder %v207_v52, 0.5  ;;  %vm210_vm3 = vcmp.gt.f32.partialorder %v208_v54, 0.5 }
  0xdc   :  { %401 = vmatprep.subr.bf16.mxu0 %v6085_v9  ;;  %v578_v53 = vsel %vm209_vm2, 1, %v6582_v0  ;;  %v579_v57 = vsel %vm210_vm3, 1, %v6582_v0 }
  0xdd   :  { %5519 = vmatpush3.bf16.msra.mxu1 %v6099_v46  ;;  %v583_v55 = vrot.slane %v578_v53, %v6898_v25  ;;  %v587_v63 = vrot.slane %v579_v57, %v6898_v25 }
  0xde   :  { %5520 = vmatprep.subr.bf16.mxu1 %v6583_v20 }
  0xdf   :  { %402 = vmatpush1.bf16.msra.mxu0 %v6087_v10  ;;  %vm6947_vm4 = vcmp.eq.s32.totalorder %v583_v55, 1  ;;  %vm6956_vm6 = vcmp.eq.s32.totalorder %v587_v63, 1 }
  0xe0   :  { %403 = vmatprep.subr.bf16.mxu0 %v6088_v11 }
  0xe1   :  { %5521 = vmatpush3.bf16.msra.mxu1 %v6100_v47 }
  0xe2   :  { %5522 = vmatprep.subr.bf16.mxu1 %v6583_v20 }
  0xe3   :  { %404 = vmatpush1.bf16.msra.mxu0 %v6090_v12 }
  0xe4   :  { %405 = vmatprep.subr.bf16.mxu0 %v6091_v13 }
  0xe5   :  { %5523 = vmatpush3.bf16.msra.mxu1 %v6101_v48 }
  0xe6   :  { %5524 = vmatprep.subr.bf16.mxu1 %v6583_v20 }
  0xe7   :  { %406 = vmatpush1.bf16.msra.mxu0 %v6093_v14 }
  0xe8   :  { %407 = vmatprep.subr.bf16.mxu0 %v6094_v15 }
  0xe9   :  { %5525 = vmatpush3.bf16.msra.mxu1 %v6102_v49 }
  0xea   :  { %5526 = vmatprep.subr.bf16.mxu1 %v6583_v20 }
  0xeb   :  { %408 = vmatpush1.bf16.msra.mxu0 %v6096_v16 }
  0xec   :  { %5534 = vmatprep.subr.bf16.mxu0 %v6583_v20 }
  0xed   :  { %5527 = vmatpush3.bf16.msra.mxu1 %v6103_v50 }
  0xee   :  { %426 = vmatmul.mubr.bf16.vlgmr.msra.gmra.mrb[0].mxu0 %v6878_v19  ;;  %5528 = vmatprep.subr.bf16.mxu1 %v6583_v20 }
  0xef   :  { %5536 = vmatprep.mubr.msk.bf16.mxu0 %vm6584_vm0, %v6583_v20 }
  0xf1   :  { %5529 = vmatpush3.bf16.msra.mxu1 %v6104_v51 }
  0xf2   :  { %5552 = vmatprep.subr.bf16.mxu1 %v6583_v20 }
  0xf4   :  { %5531 = vmatmul.mubr.bf16.vlgmr.msra.gmra.mrb[0].mxu1 %v6878_v19  ;;  %v260_v19 = vsub.s32 2, %v6887_v22 }
  0xf5   :  { %5554 = vmatprep.mubr.msk.bf16.mxu1 %vm6584_vm0, %v6583_v20 }
  0xf6   :  { %v261_v21 = vrot.slane %v6895_v24, %v260_v19 }
 0x1c1   :  { %v427_v28 = vpop.f32.mrb[0].mxu0 }
 0x1c2   :  { %v429_v29 = vpop.f32.mrb[1].mxu0  ;;  %v428_v33 = vadd.f32 %v427_v28, %v253_v27 }
 0x1c3   :  { %v430_v30 = vadd.f32 %v429_v29, %v257_v26  ;;  %v431_v31 = vpop.f32.mrb[2].mxu0 }
 0x1c4   :  { %v433_v32 = vpop.f32.mrb[3].mxu0  ;;  %v477_v38 = vmul.f32 0.25, %v428_v33  ;;  %v432_v40 = vadd.f32 %v431_v31, %v253_v27 }
 0x1c5   :  { %v6904_v34 = vpack.c.bf16 %v430_v30, %v430_v30  ;;  %v434_v35 = vadd.f32 %v433_v32, %v257_v26 }
 0x1c6   :  { %v6913_v39 = vpack.c.bf16 %v477_v38, %v477_v38  ;;  %v478_v42 = vmul.f32 0.25, %v432_v40 }
 0x1c7   :  { %v6906_v36 = vpack.c.bf16 %v434_v35, %v434_v35  ;;  %v490_v37 = vsel %vm485_vm1, %v6904_v34, 0  ;;  %v470_v26 = vpop.f32.mrb[0].mxu1 }
 0x1c8   :  { %5535 = vmatpush3.bf16.xpose.msra.mxu0 %v490_v37  ;;  %v6922_v43 = vpack.c.bf16 %v478_v42, %v478_v42  ;;  %v471_v27 = vadd.f32 %v470_v26, %v261_v21  ;;  %v5532_v28 = vpop.f32.mrb[1].mxu1 }
 0x1c9   :  { %766 = vrot.lane.b32.xlu1 %v6906_v36, %s6585_s7  ;;  %5540 = vmatprep.subr.bf16.mxu0 %v6583_v20  ;;  %v536_v41 = vsel %vm485_vm1, %v6906_v36, 0  ;;  %v473_v29 = vpop.f32.mrb[2].mxu1 }
 0x1ca   :  { %v6969_v30 = vpack.c.bf16 %v471_v27, %v471_v27  ;;  %v474_v31 = vadd.f32 %v473_v29, %v261_v21  ;;  %v5533_v32 = vpop.f32.mrb[3].mxu1 }
 0x1cc   :  { %v6971_v33 = vpack.c.bf16 %v474_v31, %v474_v31  ;;  %v622_v35 = vsel %vm620_vm7, %v6969_v30, 0 }
 0x1ce   :  { %v668_v22 = vsel %vm620_vm7, %v6971_v33, 0 }
 0x1cf   :  { %5537 = vmatmul.mubr.msk.bf16.vlgmr.msra.gmra.mrb[4].mxu0 %vm485_vm1, %v6913_v39  ;;  %5553 = vmatpush3.bf16.msra.mxu1 %v668_v22 }
 0x1d0   :  { %5541 = vmatpush3.bf16.xpose.msra.mxu0 %v536_v41  ;;  %5542 = vmatprep.mubr.msk.bf16.mxu0 %vm6584_vm0, %v6583_v20 }
 0x1d1   :  { %5546 = vmatprep.subr.bf16.mxu0 %v6583_v20  ;;  %5564 = vmatprep.subr.bf16.mxu1 %v6583_v20 }
 0x1d7   :  { %5543 = vmatmul.mubr.msk.bf16.vlgmr.msra.gmra.mrb[8].mxu0 %vm485_vm1, %v6922_v43 }
 0x1d8   :  { %5548 = vmatprep.mubr.msk.bf16.mxu0 %vm6584_vm0, %v6583_v20  ;;  %5547 = vmatpush3.bf16.msra.mxu0 %v622_v35 }
 0x1d9   :  { %5558 = vmatprep.subr.bf16.mxu0 %v6583_v20 }
 0x23b   :  { %v767_v24 = vpop.permute.xlu1 %766 }
 0x23c   :  { %v772_v50 = vsel %vm485_vm1, %v767_v24, 0 }
 0x2a2   :  { %v526_v58 = vpop.f32.mrb[4].mxu0 }
 0x2a3   :  { %v590_v59 = vsel %vm6947_vm4, -65504.0, %v526_v58  ;;  %v5538_v60 = vpop.f32.mrb[5].mxu0 }
 0x2a4   :  { %v529_v61 = vpop.f32.mrb[6].mxu0  ;;  %v593_v62 = vsel %vm592_vm5, %v590_v59, -inf }
 0x2a5   :  { %594 = vmax.xlane.f32.xlu0 %v593_v62  ;;  %v5539_v1 = vpop.f32.mrb[7].mxu0 }
 0x2aa   :  { %v572_v3 = vpop.f32.mrb[8].mxu0 }
 0x2ab   :  { %v591_v4 = vsel %vm6956_vm6, -65504.0, %v572_v3  ;;  %v5544_v5 = vpop.f32.mrb[9].mxu0 }
 0x2ac   :  { %v575_v6 = vpop.f32.mrb[10].mxu0  ;;  %v596_v7 = vsel %vm592_vm5, %v591_v4, -inf }
 0x2ad   :  { %597 = vmax.xlane.f32.xlu0 %v596_v7  ;;  %v5545_v8 = vpop.f32.mrb[11].mxu0 }
 0x2c3   :  { %714 = vrot.lane.b32.xlu0 %v6904_v34, %s6585_s7 }
 0x332   :  { %v595_v9 = vpop.xlane.xlu0 %594 }
 0x333   :  { %v599_v10 = vsub.f32 %v590_v59, %v595_v9 }
 0x335   :  { %v601_v11 = vmul.f32 1.442695, %v599_v10 }
 0x337   :  { %6193 = vpow2.f32 %v601_v11 }
 0x33a   :  { %v598_v12 = vpop.xlane.xlu0 %597 }
 0x33b   :  { %v600_v13 = vsub.f32 %v591_v4, %v598_v12 }
 0x33d   :  { %v603_v14 = vmul.f32 1.442695, %v600_v13 }
 0x33e   :  { %v715_v42 = vpop.permute.xlu0 %714 }
 0x33f   :  { %6195 = vpow2.f32 %v603_v14  ;;  %v720_v45 = vsel %vm485_vm1, %v715_v42, 0 }
 0x341   :  { %v6194_v15 = vpop.eup %6193 }
 0x342   :  { %v605_v16 = vsel %vm592_vm5, %v6194_v15, 0.0 }
 0x343   :  { %606 = vadd.xlane.f32.xlu1 %v605_v16 }
 0x349   :  { %v6196_v17 = vpop.eup %6195 }
 0x34a   :  { %v608_v18 = vsel %vm592_vm5, %v6196_v17, 0.0 }
 0x34b   :  { %609 = vadd.xlane.f32.xlu1 %v608_v18 }
 0x35c   :  { %711 = vrot.lane.b32.xlu1 %v6913_v39, %s6585_s7 }
 0x360   :  { %763 = vrot.lane.b32.xlu1 %v6922_v43, %s6585_s7 }
 0x3d0   :  { %v607_v37 = vpop.xlane.xlu1 %606 }
 0x3d1   :  { %6197 = vrcp.f32 %v607_v37 }
 0x3d8   :  { %v610_v38 = vpop.xlane.xlu1 %609 }
 0x3d9   :  { %6199 = vrcp.f32 %v610_v38 }
 0x3db   :  { %v6198_v40 = vpop.eup %6197 }
 0x3dc   :  { %v613_v41 = vmul.f32 %v6198_v40, %v6194_v15  ;;  %v712_v49 = vpop.permute.xlu1 %711 }
 0x3de   :  { %v615_v44 = vpack.c.bf16 %v613_v41, %v613_v41 }
 0x3e0   :  { %5549 = vmatmul.mubr.msk.bf16.vlgmr.msra.gmra.mrb[12].mxu0 %vm592_vm5, %v615_v44  ;;  %v764_v51 = vpop.permute.xlu1 %763 }
 0x3e1   :  { %5559 = vmatpush3.bf16.xpose.msra.mxu0 %v720_v45  ;;  %5560 = vmatprep.mubr.msk.bf16.mxu0 %vm6584_vm0, %v6583_v20 }
 0x3e2   :  { %5570 = vmatprep.subr.bf16.mxu0 %v6583_v20 }
 0x3e3   :  { %v6200_v46 = vpop.eup %6199 }
 0x3e4   :  { %v614_v47 = vmul.f32 %v6200_v46, %v6196_v17 }
 0x3e6   :  { %v616_v48 = vpack.c.bf16 %v614_v47, %v614_v47 }
 0x3e8   :  { %5555 = vmatmul.mubr.msk.bf16.vlgmr.msra.gmra.mrb[4].mxu1 %vm592_vm5, %v616_v48  ;;  %5561 = vmatmul.mubr.msk.bf16.vlgmr.msra.gmra.mrb[16].mxu0 %vm485_vm1, %v712_v49 }
 0x3e9   :  { %5565 = vmatpush3.bf16.xpose.msra.mxu1 %v772_v50  ;;  %5566 = vmatprep.mubr.msk.bf16.mxu1 %vm6584_vm0, %v6583_v20 }
 0x3ea   :  { %5576 = vmatprep.subr.bf16.mxu1 %v6583_v20  ;;  %5572 = vmatprep.mubr.msk.bf16.mxu0 %vm6584_vm0, %v6583_v20 }
 0x3f0   :  { %5567 = vmatmul.mubr.msk.bf16.vlgmr.msra.gmra.mrb[8].mxu1 %vm485_vm1, %v764_v51 }
 0x3f1   :  { %5578 = vmatprep.mubr.msk.bf16.mxu1 %vm6584_vm0, %v6583_v20 }
 0x4b3   :  { %v6999_v52 = vpop.f32.mrb[12].mxu0 }
 0x4b4   :  { %v5550_v53 = vpop.f32.mrb[13].mxu0 }
 0x4b5   :  { %v661_v54 = vpop.f32.mrb[14].mxu0 }
 0x4b6   :  { %v5551_v55 = vpop.f32.mrb[15].mxu0 }
 0x4bb   :  { %v7001_v57 = vpop.f32.mrb[4].mxu1  ;;  %v756_v58 = vpop.f32.mrb[16].mxu0 }
 0x4bc   :  { %v814_v59 = vsel %vm6947_vm4, -65504.0, %v756_v58  ;;  %v5556_v60 = vpop.f32.mrb[5].mxu1  ;;  %v5562_v61 = vpop.f32.mrb[17].mxu0 }
 0x4bd   :  { %v707_v62 = vpop.f32.mrb[6].mxu1  ;;  %v759_v63 = vpop.f32.mrb[18].mxu0  ;;  %v816_v1 = vsel %vm592_vm5, %v814_v59, -inf }
 0x4be   :  { %v5557_v3 = vpop.f32.mrb[7].mxu1  ;;  %817 = vmax.xlane.f32.xlu0 %v816_v1  ;;  %v5563_v4 = vpop.f32.mrb[19].mxu0 }
 0x4c3   :  { %v808_v5 = vpop.f32.mrb[8].mxu1 }
 0x4c4   :  { %v815_v6 = vsel %vm6956_vm6, -65504.0, %v808_v5  ;;  %v5568_v7 = vpop.f32.mrb[9].mxu1 }
 0x4c5   :  { %v811_v8 = vpop.f32.mrb[10].mxu1  ;;  %v819_v9 = vsel %vm592_vm5, %v815_v6, -inf }
 0x4c6   :  { %820 = vmax.xlane.f32.xlu1 %v819_v9  ;;  %v5569_v10 = vpop.f32.mrb[11].mxu1 }
 0x4d7   :  { %890 = vrot.lane.b32.xlu1 %v6971_v33, %s6585_s7 }
 0x4db   :  { %940 = vrot.lane.b32.xlu1 %v6904_v34, %s6586_s4 }
 0x4df   :  { %990 = vrot.lane.b32.xlu1 %v6906_v36, %s6586_s4 }
 0x4e3   :  { %988 = vrot.lane.b32.xlu1 %v6922_v43, %s6586_s4 }
 0x54b   :  { %v818_v11 = vpop.xlane.xlu0 %817 }
 0x54c   :  { %v822_v12 = vsub.f32 %v814_v59, %v818_v11 }
 0x54e   :  { %v824_v13 = vmul.f32 1.442695, %v822_v12 }
 0x550   :  { %6201 = vpow2.f32 %v824_v13 }
 0x553   :  { %v821_v14 = vpop.xlane.xlu1 %820 }
 0x554   :  { %v823_v15 = vsub.f32 %v815_v6, %v821_v14 }
 0x556   :  { %v826_v16 = vmul.f32 1.442695, %v823_v15 }
 0x557   :  { %v891_v17 = vpop.permute.xlu1 %890 }
 0x558   :  { %6203 = vpow2.f32 %v826_v16  ;;  %v896_v18 = vsel %vm620_vm7, %v891_v17, 0 }
 0x559   :  { %5577 = vmatpush3.bf16.msra.mxu1 %v896_v18 }
 0x55a   :  { %v6202_v19 = vpop.eup %6201  ;;  %5588 = vmatprep.subr.bf16.mxu1 %v6583_v20 }
 0x55b   :  { %v828_v21 = vsel %vm592_vm5, %v6202_v19, 0.0  ;;  %v941_v37 = vpop.permute.xlu1 %940 }
 0x55c   :  { %829 = vadd.xlane.f32.xlu0 %v828_v21  ;;  %v946_v42 = vsel %vm485_vm1, %v941_v37, 0 }
 0x55f   :  { %v991_v41 = vpop.permute.xlu1 %990 }
 0x560   :  { %v996_v45 = vsel %vm485_vm1, %v991_v41, 0 }
 0x562   :  { %v6204_v26 = vpop.eup %6203 }
 0x563   :  { %v831_v27 = vsel %vm592_vm5, %v6204_v26, 0.0  ;;  %v989_v47 = vpop.permute.xlu1 %988 }
 0x564   :  { %832 = vadd.xlane.f32.xlu0 %v831_v27 }
 0x57a   :  { %841 = vrot.lane.b32.xlu0 %v6969_v30, %s6585_s7 }
 0x57e   :  { %938 = vrot.lane.b32.xlu0 %v6913_v39, %s6586_s4 }
 0x5e9   :  { %v830_v28 = vpop.xlane.xlu0 %829 }
 0x5ea   :  { %6205 = vrcp.f32 %v830_v28 }
 0x5f1   :  { %v833_v29 = vpop.xlane.xlu0 %832 }
 0x5f2   :  { %6207 = vrcp.f32 %v833_v29 }
 0x5f4   :  { %v6206_v31 = vpop.eup %6205 }
 0x5f5   :  { %v842_v32 = vpop.permute.xlu0 %841  ;;  %v836_v35 = vmul.f32 %v6206_v31, %v6202_v19 }
 0x5f6   :  { %v847_v22 = vsel %vm620_vm7, %v842_v32, 0 }
 0x5f7   :  { %5571 = vmatpush3.bf16.msra.mxu0 %v847_v22  ;;  %v838_v24 = vpack.c.bf16 %v836_v35, %v836_v35 }
 0x5f8   :  { %5582 = vmatprep.subr.bf16.mxu0 %v6583_v20 }
 0x5f9   :  { %v939_v46 = vpop.permute.xlu0 %938 }
 0x5fa   :  { %5573 = vmatmul.mubr.msk.bf16.vlgmr.msra.gmra.mrb[20].mxu0 %vm592_vm5, %v838_v24 }
 0x5fb   :  { %5584 = vmatprep.mubr.msk.bf16.mxu0 %vm6584_vm0, %v6583_v20 }
 0x5fc   :  { %v6208_v38 = vpop.eup %6207 }
 0x5fd   :  { %v837_v40 = vmul.f32 %v6208_v38, %v6204_v26 }
 0x5ff   :  { %v839_v44 = vpack.c.bf16 %v837_v40, %v837_v40 }
 0x600   :  { %5583 = vmatpush3.bf16.xpose.msra.mxu0 %v946_v42 }
 0x601   :  { %5579 = vmatmul.mubr.msk.bf16.vlgmr.msra.gmra.mrb[12].mxu1 %vm592_vm5, %v839_v44  ;;  %5594 = vmatprep.subr.bf16.mxu0 %v6583_v20 }
 0x602   :  { %5589 = vmatpush3.bf16.xpose.msra.mxu1 %v996_v45  ;;  %5590 = vmatprep.mubr.msk.bf16.mxu1 %vm6584_vm0, %v6583_v20 }
 0x603   :  { %5600 = vmatprep.subr.bf16.mxu1 %v6583_v20 }
 0x607   :  { %5585 = vmatmul.mubr.msk.bf16.vlgmr.msra.gmra.mrb[24].mxu0 %vm485_vm1, %v939_v46 }
 0x608   :  { %5596 = vmatprep.mubr.msk.bf16.mxu0 %vm6584_vm0, %v6583_v20 }
 0x609   :  { %5591 = vmatmul.mubr.msk.bf16.vlgmr.msra.gmra.mrb[16].mxu1 %vm485_vm1, %v989_v47 }
 0x60a   :  { %5602 = vmatprep.mubr.msk.bf16.mxu1 %vm6584_vm0, %v6583_v20 }
 0x6cd   :  { %v7043_v48 = vpop.f32.mrb[20].mxu0 }
 0x6ce   :  { %v5574_v49 = vpop.f32.mrb[21].mxu0 }
 0x6cf   :  { %v886_v50 = vpop.f32.mrb[22].mxu0 }
 0x6d0   :  { %v5575_v51 = vpop.f32.mrb[23].mxu0 }
 0x6d4   :  { %v7045_v53 = vpop.f32.mrb[12].mxu1 }
 0x6d5   :  { %v6003_v54 = vpack.i.bf16 %v7045_v53, %v7043_v48  ;;  %v5580_v55 = vpop.f32.mrb[13].mxu1 }
 0x6d6   :  { %v935_v58 = vpop.f32.mrb[14].mxu1 }
 0x6d7   :  { %v5581_v59 = vpop.f32.mrb[15].mxu1 }
 0x6da   :  { %v982_v60 = vpop.f32.mrb[24].mxu0 }
 0x6db   :  { %v1038_v61 = vsel %vm6947_vm4, -65504.0, %v982_v60  ;;  %v5586_v62 = vpop.f32.mrb[25].mxu0 }
 0x6dc   :  { %v985_v63 = vpop.f32.mrb[26].mxu0  ;;  %v1032_v1 = vpop.f32.mrb[16].mxu1  ;;  %v1040_v3 = vsel %vm592_vm5, %v1038_v61, -inf }
 0x6dd   :  { %v1039_v4 = vsel %vm6956_vm6, -65504.0, %v1032_v1  ;;  %v5592_v5 = vpop.f32.mrb[17].mxu1  ;;  %1041 = vmax.xlane.f32.xlu0 %v1040_v3  ;;  %v5587_v6 = vpop.f32.mrb[27].mxu0 }
 0x6de   :  { %v1035_v7 = vpop.f32.mrb[18].mxu1  ;;  %v1043_v8 = vsel %vm592_vm5, %v1039_v4, -inf }
 0x6df   :  { %1044 = vmax.xlane.f32.xlu1 %v1043_v8  ;;  %v5593_v9 = vpop.f32.mrb[19].mxu1 }
 0x6f0   :  { %1112 = vrot.lane.b32.xlu1 %v6971_v33, %s6586_s4 }
 0x6f4   :  { %1162 = vrot.lane.b32.xlu1 %v6904_v34, %s6587_s1 }
 0x6f8   :  { %1212 = vrot.lane.b32.xlu1 %v6906_v36, %s6587_s1 }
 0x6fc   :  { %1210 = vrot.lane.b32.xlu1 %v6922_v43, %s6587_s1 }
 0x76a   :  { %v1042_v10 = vpop.xlane.xlu0 %1041 }
 0x76b   :  { %v1046_v11 = vsub.f32 %v1038_v61, %v1042_v10 }
 0x76c   :  { %v1045_v12 = vpop.xlane.xlu1 %1044 }
 0x76d   :  { %v1048_v13 = vmul.f32 1.442695, %v1046_v11  ;;  %v1047_v14 = vsub.f32 %v1039_v4, %v1045_v12 }
 0x76f   :  { %6209 = vpow2.f32 %v1048_v13  ;;  %v1050_v15 = vmul.f32 1.442695, %v1047_v14 }
 0x770   :  { %v1113_v16 = vpop.permute.xlu1 %1112 }
 0x771   :  { %6211 = vpow2.f32 %v1050_v15  ;;  %v1118_v17 = vsel %vm620_vm7, %v1113_v16, 0 }
 0x772   :  { %5601 = vmatpush3.bf16.msra.mxu1 %v1118_v17 }
 0x773   :  { %5612 = vmatprep.subr.bf16.mxu1 %v6583_v20 }
 0x774   :  { %v1163_v35 = vpop.permute.xlu1 %1162 }
 0x775   :  { %v1168_v41 = vsel %vm485_vm1, %v1163_v35, 0 }
 0x778   :  { %v1213_v40 = vpop.permute.xlu1 %1212 }
 0x779   :  { %v6210_v18 = vpop.eup %6209  ;;  %v1218_v44 = vsel %vm485_vm1, %v1213_v40, 0 }
 0x77a   :  { %v1052_v19 = vsel %vm592_vm5, %v6210_v18, 0.0 }
 0x77b   :  { %v6212_v21 = vpop.eup %6211  ;;  %1053 = vadd.xlane.f32.xlu0 %v1052_v19 }
 0x77c   :  { %v1055_v26 = vsel %vm592_vm5, %v6212_v21, 0.0  ;;  %v1211_v46 = vpop.permute.xlu1 %1210 }
 0x77f   :  { %1056 = vadd.xlane.f32.xlu0 %v1055_v26 }
 0x795   :  { %1064 = vrot.lane.b32.xlu0 %v6969_v30, %s6586_s4 }
 0x799   :  { %1160 = vrot.lane.b32.xlu0 %v6913_v39, %s6587_s1 }
 0x808   :  { %v1054_v27 = vpop.xlane.xlu0 %1053 }
 0x809   :  { %6213 = vrcp.f32 %v1054_v27 }
 0x80c   :  { %v1057_v28 = vpop.xlane.xlu0 %1056 }
 0x80d   :  { %6215 = vrcp.f32 %v1057_v28 }
 0x810   :  { %v1065_v29 = vpop.permute.xlu0 %1064 }
 0x811   :  { %v1070_v31 = vsel %vm620_vm7, %v1065_v29, 0 }
 0x812   :  { %5595 = vmatpush3.bf16.msra.mxu0 %v1070_v31 }
 0x813   :  { %v6214_v32 = vpop.eup %6213  ;;  %5606 = vmatprep.subr.bf16.mxu0 %v6583_v20 }
 0x814   :  { %v1060_v22 = vmul.f32 %v6214_v32, %v6210_v18  ;;  %v1161_v45 = vpop.permute.xlu0 %1160 }
 0x816   :  { %v1062_v24 = vpack.c.bf16 %v1060_v22, %v1060_v22 }
 0x817   :  { %v6216_v37 = vpop.eup %6215 }
 0x818   :  { %5597 = vmatmul.mubr.msk.bf16.vlgmr.msra.gmra.mrb[28].mxu0 %vm592_vm5, %v1062_v24  ;;  %v1061_v38 = vmul.f32 %v6216_v37, %v6212_v21 }
 0x819   :  { %5608 = vmatprep.mubr.msk.bf16.mxu0 %vm6584_vm0, %v6583_v20 }
 0x81a   :  { %v1063_v42 = vpack.c.bf16 %v1061_v38, %v1061_v38 }
 0x81b   :  { %5607 = vmatpush3.bf16.xpose.msra.mxu0 %v1168_v41 }
 0x81c   :  { %5603 = vmatmul.mubr.msk.bf16.vlgmr.msra.gmra.mrb[20].mxu1 %vm592_vm5, %v1063_v42  ;;  %5618 = vmatprep.subr.bf16.mxu0 %v6583_v20 }
 0x81d   :  { %5613 = vmatpush3.bf16.xpose.msra.mxu1 %v1218_v44  ;;  %5614 = vmatprep.mubr.msk.bf16.mxu1 %vm6584_vm0, %v6583_v20 }
 0x81e   :  { %5624 = vmatprep.subr.bf16.mxu1 %v6583_v20 }
 0x822   :  { %5609 = vmatmul.mubr.msk.bf16.vlgmr.msra.gmra.mrb[32].mxu0 %vm485_vm1, %v1161_v45 }
 0x823   :  { %5620 = vmatprep.mubr.msk.bf16.mxu0 %vm6584_vm0, %v6583_v20 }
 0x824   :  { %5615 = vmatmul.mubr.msk.bf16.vlgmr.msra.gmra.mrb[24].mxu1 %vm485_vm1, %v1211_v46 }
 0x825   :  { %5626 = vmatprep.mubr.msk.bf16.mxu1 %vm6584_vm0, %v6583_v20 }
 0x8eb   :  { %v7089_v47 = vpop.f32.mrb[28].mxu0 }
 0x8ec   :  { %v5598_v49 = vpop.f32.mrb[29].mxu0 }
 0x8ed   :  { %v1109_v50 = vpop.f32.mrb[30].mxu0 }
 0x8ee   :  { %v5599_v51 = vpop.f32.mrb[31].mxu0 }
 0x8ef   :  { %v7091_v55 = vpop.f32.mrb[20].mxu1 }
 0x8f0   :  { %v6008_v58 = vpack.i.bf16 %v7091_v55, %v7089_v47  ;;  %v5604_v59 = vpop.f32.mrb[21].mxu1 }
 0x8f1   :  { %v1157_v60 = vpop.f32.mrb[22].mxu1 }
 0x8f2   :  { %v5605_v61 = vpop.f32.mrb[23].mxu1 }
 0x8f5   :  { %v1204_v62 = vpop.f32.mrb[32].mxu0 }
 0x8f6   :  { %v1260_v63 = vsel %vm6947_vm4, -65504.0, %v1204_v62  ;;  %v5610_v1 = vpop.f32.mrb[33].mxu0 }
 0x8f7   :  { %v1207_v3 = vpop.f32.mrb[34].mxu0  ;;  %v1254_v4 = vpop.f32.mrb[24].mxu1  ;;  %v1262_v5 = vsel %vm592_vm5, %v1260_v63, -inf }
 0x8f8   :  { %v1261_v6 = vsel %vm6956_vm6, -65504.0, %v1254_v4  ;;  %v5616_v7 = vpop.f32.mrb[25].mxu1  ;;  %1263 = vmax.xlane.f32.xlu0 %v1262_v5  ;;  %v5611_v8 = vpop.f32.mrb[35].mxu0 }
 0x8f9   :  { %v1257_v9 = vpop.f32.mrb[26].mxu1  ;;  %v1265_v10 = vsel %vm592_vm5, %v1261_v6, -inf }
 0x8fa   :  { %1266 = vmax.xlane.f32.xlu1 %v1265_v10  ;;  %v5617_v11 = vpop.f32.mrb[27].mxu1 }
 0x90b   :  { %1334 = vrot.lane.b32.xlu1 %v6971_v33, %s6587_s1 }
 0x90f   :  { %1384 = vrot.lane.b32.xlu1 %v6904_v34, %s7899_s27 }
 0x913   :  { %1434 = vrot.lane.b32.xlu1 %v6906_v36, %s7899_s27 }
 0x917   :  { %1432 = vrot.lane.b32.xlu1 %v6922_v43, %s7899_s27 }
 0x985   :  { %v1264_v12 = vpop.xlane.xlu0 %1263 }
 0x986   :  { %v1268_v13 = vsub.f32 %v1260_v63, %v1264_v12 }
 0x987   :  { %v1267_v14 = vpop.xlane.xlu1 %1266 }
 0x988   :  { %v1270_v15 = vmul.f32 1.442695, %v1268_v13  ;;  %v1269_v16 = vsub.f32 %v1261_v6, %v1267_v14 }
 0x98a   :  { %6217 = vpow2.f32 %v1270_v15  ;;  %v1272_v17 = vmul.f32 1.442695, %v1269_v16 }
 0x98b   :  { %v1335_v18 = vpop.permute.xlu1 %1334 }
 0x98c   :  { %6219 = vpow2.f32 %v1272_v17  ;;  %v1340_v19 = vsel %vm620_vm7, %v1335_v18, 0 }
 0x98d   :  { %5625 = vmatpush3.bf16.msra.mxu1 %v1340_v19 }
 0x98e   :  { %5636 = vmatprep.subr.bf16.mxu1 %v6583_v20 }
 0x98f   :  { %v1385_v24 = vpop.permute.xlu1 %1384 }
 0x990   :  { %v1390_v44 = vsel %vm485_vm1, %v1385_v24, 0 }
 0x993   :  { %v1435_v42 = vpop.permute.xlu1 %1434 }
 0x994   :  { %v6218_v21 = vpop.eup %6217  ;;  %v1440_v46 = vsel %vm485_vm1, %v1435_v42, 0 }
 0x995   :  { %v1274_v26 = vsel %vm592_vm5, %v6218_v21, 0.0 }
 0x996   :  { %v6220_v27 = vpop.eup %6219  ;;  %1275 = vadd.xlane.f32.xlu0 %v1274_v26 }
 0x997   :  { %v1277_v28 = vsel %vm592_vm5, %v6220_v27, 0.0  ;;  %v1433_v50 = vpop.permute.xlu1 %1432 }
 0x99a   :  { %1278 = vadd.xlane.f32.xlu0 %v1277_v28 }
 0x9b0   :  { %1286 = vrot.lane.b32.xlu0 %v6969_v30, %s6587_s1 }
 0x9b4   :  { %1382 = vrot.lane.b32.xlu0 %v6913_v39, %s7899_s27 }
 0xa23   :  { %v1276_v29 = vpop.xlane.xlu0 %1275 }
 0xa24   :  { %6221 = vrcp.f32 %v1276_v29 }
 0xa27   :  { %v1279_v31 = vpop.xlane.xlu0 %1278 }
 0xa28   :  { %6223 = vrcp.f32 %v1279_v31 }
 0xa2b   :  { %v1287_v32 = vpop.permute.xlu0 %1286 }
 0xa2c   :  { %v1292_v35 = vsel %vm620_vm7, %v1287_v32, 0 }
 0xa2d   :  { %5619 = vmatpush3.bf16.msra.mxu0 %v1292_v35 }
 0xa2e   :  { %v6222_v22 = vpop.eup %6221  ;;  %5630 = vmatprep.subr.bf16.mxu0 %v6583_v20 }
 0xa2f   :  { %v1282_v37 = vmul.f32 %v6222_v22, %v6218_v21  ;;  %v1383_v49 = vpop.permute.xlu0 %1382 }
 0xa31   :  { %v1284_v38 = vpack.c.bf16 %v1282_v37, %v1282_v37 }
 0xa32   :  { %v6224_v40 = vpop.eup %6223 }
 0xa33   :  { %5621 = vmatmul.mubr.msk.bf16.vlgmr.msra.gmra.mrb[36].mxu0 %vm592_vm5, %v1284_v38  ;;  %v1283_v41 = vmul.f32 %v6224_v40, %v6220_v27 }
 0xa34   :  { %5632 = vmatprep.mubr.msk.bf16.mxu0 %vm6584_vm0, %v6583_v20 }
 0xa35   :  { %v1285_v45 = vpack.c.bf16 %v1283_v41, %v1283_v41 }
 0xa36   :  { %5631 = vmatpush3.bf16.xpose.msra.mxu0 %v1390_v44 }
 0xa37   :  { %5627 = vmatmul.mubr.msk.bf16.vlgmr.msra.gmra.mrb[28].mxu1 %vm592_vm5, %v1285_v45  ;;  %5642 = vmatprep.subr.bf16.mxu0 %v6583_v20 }
 0xa38   :  { %5637 = vmatpush3.bf16.xpose.msra.mxu1 %v1440_v46  ;;  %5638 = vmatprep.mubr.msk.bf16.mxu1 %vm6584_vm0, %v6583_v20 }
 0xa39   :  { %5648 = vmatprep.subr.bf16.mxu1 %v6583_v20 }
 0xa3d   :  { %5633 = vmatmul.mubr.msk.bf16.vlgmr.msra.gmra.mrb[40].mxu0 %vm485_vm1, %v1383_v49 }
 0xa3e   :  { %5644 = vmatprep.mubr.msk.bf16.mxu0 %vm6584_vm0, %v6583_v20 }
 0xa3f   :  { %5639 = vmatmul.mubr.msk.bf16.vlgmr.msra.gmra.mrb[32].mxu1 %vm485_vm1, %v1433_v50 }
 0xa40   :  { %5650 = vmatprep.mubr.msk.bf16.mxu1 %vm6584_vm0, %v6583_v20 }
 0xb06   :  { %v7135_v51 = vpop.f32.mrb[36].mxu0 }
 0xb07   :  { %v5622_v59 = vpop.f32.mrb[37].mxu0 }
 0xb08   :  { %v1331_v60 = vpop.f32.mrb[38].mxu0 }
 0xb09   :  { %v5623_v61 = vpop.f32.mrb[39].mxu0 }
 0xb0a   :  { %v7137_v62 = vpop.f32.mrb[28].mxu1 }
 0xb0b   :  { %v6013_v63 = vpack.i.bf16 %v7137_v62, %v7135_v51  ;;  %v5628_v1 = vpop.f32.mrb[29].mxu1 }
 0xb0c   :  { %v1379_v3 = vpop.f32.mrb[30].mxu1 }
 0xb0d   :  { %v5629_v4 = vpop.f32.mrb[31].mxu1 }
 0xb10   :  { %v1426_v5 = vpop.f32.mrb[40].mxu0 }
 0xb11   :  { %v1482_v6 = vsel %vm6947_vm4, -65504.0, %v1426_v5  ;;  %v5634_v7 = vpop.f32.mrb[41].mxu0 }
 0xb12   :  { %v1429_v8 = vpop.f32.mrb[42].mxu0  ;;  %v1476_v9 = vpop.f32.mrb[32].mxu1  ;;  %v1484_v10 = vsel %vm592_vm5, %v1482_v6, -inf }
 0xb13   :  { %v1483_v11 = vsel %vm6956_vm6, -65504.0, %v1476_v9  ;;  %v5640_v12 = vpop.f32.mrb[33].mxu1  ;;  %1485 = vmax.xlane.f32.xlu0 %v1484_v10  ;;  %v5635_v13 = vpop.f32.mrb[43].mxu0 }
 0xb14   :  { %v1479_v14 = vpop.f32.mrb[34].mxu1  ;;  %v1487_v15 = vsel %vm592_vm5, %v1483_v11, -inf }
 0xb15   :  { %1488 = vmax.xlane.f32.xlu1 %v1487_v15  ;;  %v5641_v16 = vpop.f32.mrb[35].mxu1 }
 0xb26   :  { %1556 = vrot.lane.b32.xlu1 %v6971_v33, %s7899_s27 }
 0xb2a   :  { %1606 = vrot.lane.b32.xlu1 %v6904_v34, %s6588_s8 }
 0xb2e   :  { %1656 = vrot.lane.b32.xlu1 %v6906_v36, %s6588_s8 }
 0xb32   :  { %1654 = vrot.lane.b32.xlu1 %v6922_v43, %s6588_s8 }
 0xba0   :  { %v1486_v17 = vpop.xlane.xlu0 %1485 }
 0xba1   :  { %v1490_v18 = vsub.f32 %v1482_v6, %v1486_v17 }
 0xba2   :  { %v1489_v19 = vpop.xlane.xlu1 %1488 }
 0xba3   :  { %v1492_v21 = vmul.f32 1.442695, %v1490_v18  ;;  %v1491_v26 = vsub.f32 %v1483_v11, %v1489_v19 }
 0xba5   :  { %6225 = vpow2.f32 %v1492_v21  ;;  %v1494_v27 = vmul.f32 1.442695, %v1491_v26 }
 0xba6   :  { %v1557_v28 = vpop.permute.xlu1 %1556 }
 0xba7   :  { %6227 = vpow2.f32 %v1494_v27  ;;  %v1562_v29 = vsel %vm620_vm7, %v1557_v28, 0 }
 0xba8   :  { %5649 = vmatpush3.bf16.msra.mxu1 %v1562_v29 }
 0xba9   :  { %5660 = vmatprep.subr.bf16.mxu1 %v6583_v20 }
 0xbaa   :  { %v1607_v42 = vpop.permute.xlu1 %1606 }
 0xbab   :  { %v1612_v59 = vsel %vm485_vm1, %v1607_v42, 0 }
 0xbae   :  { %v1657_v50 = vpop.permute.xlu1 %1656 }
 0xbaf   :  { %v6226_v31 = vpop.eup %6225  ;;  %v1662_v61 = vsel %vm485_vm1, %v1657_v50, 0 }
 0xbb0   :  { %v1496_v32 = vsel %vm592_vm5, %v6226_v31, 0.0 }
 0xbb1   :  { %v6228_v35 = vpop.eup %6227  ;;  %1497 = vadd.xlane.f32.xlu0 %v1496_v32 }
 0xbb2   :  { %v1499_v22 = vsel %vm592_vm5, %v6228_v35, 0.0  ;;  %v1655_v3 = vpop.permute.xlu1 %1654 }
 0xbb5   :  { %1500 = vadd.xlane.f32.xlu0 %v1499_v22 }
 0xbcb   :  { %1508 = vrot.lane.b32.xlu0 %v6969_v30, %s7899_s27 }
 0xbcf   :  { %1604 = vrot.lane.b32.xlu0 %v6913_v39, %s6588_s8 }
 0xc3e   :  { %v1498_v24 = vpop.xlane.xlu0 %1497 }
 0xc3f   :  { %6229 = vrcp.f32 %v1498_v24 }
 0xc42   :  { %v1501_v37 = vpop.xlane.xlu0 %1500 }
 0xc43   :  { %6231 = vrcp.f32 %v1501_v37 }
 0xc46   :  { %v1509_v38 = vpop.permute.xlu0 %1508 }
 0xc47   :  { %v1514_v40 = vsel %vm620_vm7, %v1509_v38, 0 }
 0xc48   :  { %5643 = vmatpush3.bf16.msra.mxu0 %v1514_v40 }
 0xc49   :  { %v6230_v41 = vpop.eup %6229  ;;  %5654 = vmatprep.subr.bf16.mxu0 %v6583_v20 }
 0xc4a   :  { %v1504_v44 = vmul.f32 %v6230_v41, %v6226_v31  ;;  %v1605_v1 = vpop.permute.xlu0 %1604 }
 0xc4c   :  { %v1506_v45 = vpack.c.bf16 %v1504_v44, %v1504_v44 }
 0xc4d   :  { %v6232_v46 = vpop.eup %6231 }
 0xc4e   :  { %5645 = vmatmul.mubr.msk.bf16.vlgmr.msra.gmra.mrb[44].mxu0 %vm592_vm5, %v1506_v45  ;;  %v1505_v49 = vmul.f32 %v6232_v46, %v6228_v35 }
 0xc4f   :  { %5656 = vmatprep.mubr.msk.bf16.mxu0 %vm6584_vm0, %v6583_v20 }
 0xc50   :  { %v1507_v60 = vpack.c.bf16 %v1505_v49, %v1505_v49 }
 0xc51   :  { %5655 = vmatpush3.bf16.xpose.msra.mxu0 %v1612_v59 }
 0xc52   :  { %5651 = vmatmul.mubr.msk.bf16.vlgmr.msra.gmra.mrb[36].mxu1 %vm592_vm5, %v1507_v60  ;;  %5666 = vmatprep.subr.bf16.mxu0 %v6583_v20 }
 0xc53   :  { %5661 = vmatpush3.bf16.xpose.msra.mxu1 %v1662_v61  ;;  %5662 = vmatprep.mubr.msk.bf16.mxu1 %vm6584_vm0, %v6583_v20 }
 0xc54   :  { %5672 = vmatprep.subr.bf16.mxu1 %v6583_v20 }
 0xc58   :  { %5657 = vmatmul.mubr.msk.bf16.vlgmr.msra.gmra.mrb[48].mxu0 %vm485_vm1, %v1605_v1 }
 0xc59   :  { %5668 = vmatprep.mubr.msk.bf16.mxu0 %vm6584_vm0, %v6583_v20 }
 0xc5a   :  { %5663 = vmatmul.mubr.msk.bf16.vlgmr.msra.gmra.mrb[40].mxu1 %vm485_vm1, %v1655_v3 }
 0xc5b   :  { %5674 = vmatprep.mubr.msk.bf16.mxu1 %vm6584_vm0, %v6583_v20 }
 0xd21   :  { %v7181_v4 = vpop.f32.mrb[44].mxu0 }
 0xd22   :  { %v5646_v5 = vpop.f32.mrb[45].mxu0 }
 0xd23   :  { %v1553_v6 = vpop.f32.mrb[46].mxu0 }
 0xd24   :  { %v5647_v7 = vpop.f32.mrb[47].mxu0 }
 0xd25   :  { %v7183_v8 = vpop.f32.mrb[36].mxu1 }
 0xd26   :  { %v6018_v9 = vpack.i.bf16 %v7183_v8, %v7181_v4  ;;  %v5652_v10 = vpop.f32.mrb[37].mxu1 }
 0xd27   :  { %v1601_v11 = vpop.f32.mrb[38].mxu1 }
 0xd28   :  { %v5653_v12 = vpop.f32.mrb[39].mxu1 }
 0xd2b   :  { %v1648_v13 = vpop.f32.mrb[48].mxu0 }
 0xd2c   :  { %v1704_v14 = vsel %vm6947_vm4, -65504.0, %v1648_v13  ;;  %v5658_v15 = vpop.f32.mrb[49].mxu0 }
 0xd2d   :  { %v1651_v16 = vpop.f32.mrb[50].mxu0  ;;  %v1698_v17 = vpop.f32.mrb[40].mxu1  ;;  %v1706_v18 = vsel %vm592_vm5, %v1704_v14, -inf }
 0xd2e   :  { %v1705_v19 = vsel %vm6956_vm6, -65504.0, %v1698_v17  ;;  %v5664_v21 = vpop.f32.mrb[41].mxu1  ;;  %1707 = vmax.xlane.f32.xlu0 %v1706_v18  ;;  %v5659_v26 = vpop.f32.mrb[51].mxu0 }
 0xd2f   :  { %v1701_v27 = vpop.f32.mrb[42].mxu1  ;;  %v1709_v28 = vsel %vm592_vm5, %v1705_v19, -inf }
 0xd30   :  { %1710 = vmax.xlane.f32.xlu1 %v1709_v28  ;;  %v5665_v29 = vpop.f32.mrb[43].mxu1 }
 0xd41   :  { %1778 = vrot.lane.b32.xlu1 %v6971_v33, %s6588_s8 }
 0xd45   :  { %1828 = vrot.lane.b32.xlu1 %v6904_v34, %s6589_s14 }
 0xd49   :  { %1878 = vrot.lane.b32.xlu1 %v6906_v36, %s6589_s14 }
 0xd4d   :  { %1876 = vrot.lane.b32.xlu1 %v6922_v43, %s6589_s14 }
 0xdbb   :  { %v1708_v31 = vpop.xlane.xlu0 %1707 }
 0xdbc   :  { %v1712_v32 = vsub.f32 %v1704_v14, %v1708_v31 }
 0xdbd   :  { %v1711_v35 = vpop.xlane.xlu1 %1710 }
 0xdbe   :  { %v1714_v22 = vmul.f32 1.442695, %v1712_v32  ;;  %v1713_v24 = vsub.f32 %v1705_v19, %v1711_v35 }
 0xdc0   :  { %6233 = vpow2.f32 %v1714_v22  ;;  %v1716_v37 = vmul.f32 1.442695, %v1713_v24 }
 0xdc1   :  { %v1779_v38 = vpop.permute.xlu1 %1778 }
 0xdc2   :  { %6235 = vpow2.f32 %v1716_v37  ;;  %v1784_v40 = vsel %vm620_vm7, %v1779_v38, 0 }
 0xdc3   :  { %5673 = vmatpush3.bf16.msra.mxu1 %v1784_v40 }
 0xdc4   :  { %5684 = vmatprep.subr.bf16.mxu1 %v6583_v20 }
 0xdc5   :  { %v1829_v61 = vpop.permute.xlu1 %1828 }
 0xdc6   :  { %v1834_v10 = vsel %vm485_vm1, %v1829_v61, 0 }
 0xdc9   :  { %v1879_v7 = vpop.permute.xlu1 %1878 }
 0xdca   :  { %v6234_v41 = vpop.eup %6233  ;;  %v1884_v12 = vsel %vm485_vm1, %v1879_v7, 0 }
 0xdcb   :  { %v1718_v42 = vsel %vm592_vm5, %v6234_v41, 0.0 }
 0xdcc   :  { %v6236_v44 = vpop.eup %6235  ;;  %1719 = vadd.xlane.f32.xlu0 %v1718_v42 }
 0xdcd   :  { %v1721_v45 = vsel %vm592_vm5, %v6236_v44, 0.0  ;;  %v1877_v14 = vpop.permute.xlu1 %1876 }
 0xdd0   :  { %1722 = vadd.xlane.f32.xlu0 %v1721_v45 }
 0xde6   :  { %1730 = vrot.lane.b32.xlu0 %v6969_v30, %s6588_s8 }
 0xdea   :  { %1826 = vrot.lane.b32.xlu0 %v6913_v39, %s6589_s14 }
 0xe59   :  { %v1720_v46 = vpop.xlane.xlu0 %1719 }
 0xe5a   :  { %6237 = vrcp.f32 %v1720_v46 }
 0xe5d   :  { %v1723_v49 = vpop.xlane.xlu0 %1722 }
 0xe5e   :  { %6239 = vrcp.f32 %v1723_v49 }
 0xe61   :  { %v1731_v50 = vpop.permute.xlu0 %1730 }
 0xe62   :  { %v1736_v59 = vsel %vm620_vm7, %v1731_v50, 0 }
 0xe63   :  { %5667 = vmatpush3.bf16.msra.mxu0 %v1736_v59 }
 0xe64   :  { %v6238_v60 = vpop.eup %6237  ;;  %5678 = vmatprep.subr.bf16.mxu0 %v6583_v20 }
 0xe65   :  { %v1726_v1 = vmul.f32 %v6238_v60, %v6234_v41  ;;  %v1827_v13 = vpop.permute.xlu0 %1826 }
 0xe67   :  { %v1728_v3 = vpack.c.bf16 %v1726_v1, %v1726_v1 }
 0xe68   :  { %v6240_v5 = vpop.eup %6239 }
 0xe69   :  { %5669 = vmatmul.mubr.msk.bf16.vlgmr.msra.gmra.mrb[52].mxu0 %vm592_vm5, %v1728_v3  ;;  %v1727_v6 = vmul.f32 %v6240_v5, %v6236_v44 }
 0xe6a   :  { %5680 = vmatprep.mubr.msk.bf16.mxu0 %vm6584_vm0, %v6583_v20 }
 0xe6b   :  { %v1729_v11 = vpack.c.bf16 %v1727_v6, %v1727_v6 }
 0xe6c   :  { %5679 = vmatpush3.bf16.xpose.msra.mxu0 %v1834_v10 }
 0xe6d   :  { %5675 = vmatmul.mubr.msk.bf16.vlgmr.msra.gmra.mrb[44].mxu1 %vm592_vm5, %v1729_v11  ;;  %5690 = vmatprep.subr.bf16.mxu0 %v6583_v20 }
 0xe6e   :  { %5685 = vmatpush3.bf16.xpose.msra.mxu1 %v1884_v12  ;;  %5686 = vmatprep.mubr.msk.bf16.mxu1 %vm6584_vm0, %v6583_v20 }
 0xe6f   :  { %5696 = vmatprep.subr.bf16.mxu1 %v6583_v20 }
 0xe73   :  { %5681 = vmatmul.mubr.msk.bf16.vlgmr.msra.gmra.mrb[56].mxu0 %vm485_vm1, %v1827_v13 }
 0xe74   :  { %5692 = vmatprep.mubr.msk.bf16.mxu0 %vm6584_vm0, %v6583_v20 }
 0xe75   :  { %5687 = vmatmul.mubr.msk.bf16.vlgmr.msra.gmra.mrb[48].mxu1 %vm485_vm1, %v1877_v14 }
 0xe76   :  { %5698 = vmatprep.mubr.msk.bf16.mxu1 %vm6584_vm0, %v6583_v20 }
 0xf3c   :  { %v7227_v15 = vpop.f32.mrb[52].mxu0 }
 0xf3d   :  { %v5670_v16 = vpop.f32.mrb[53].mxu0 }
 0xf3e   :  { %v1775_v17 = vpop.f32.mrb[54].mxu0 }
 0xf3f   :  { %v5671_v18 = vpop.f32.mrb[55].mxu0 }
 0xf40   :  { %v7229_v19 = vpop.f32.mrb[44].mxu1 }
 0xf41   :  { %v6023_v21 = vpack.i.bf16 %v7229_v19, %v7227_v15  ;;  %v5676_v26 = vpop.f32.mrb[45].mxu1  ;;  %v6105_v15 = vld [vmem:[#allocation8] sm:$0xff]   ;;  %v6106_v19 = vld [vmem:[#allocation8 + $0x8] sm:$0xff]  }
 0xf42   :  { %v1823_v27 = vpop.f32.mrb[46].mxu1 }
 0xf43   :  { %v5677_v28 = vpop.f32.mrb[47].mxu1 }
 0xf46   :  { %v1870_v29 = vpop.f32.mrb[56].mxu0 }
 0xf47   :  { %v1926_v31 = vsel %vm6947_vm4, -65504.0, %v1870_v29  ;;  %v5682_v32 = vpop.f32.mrb[57].mxu0 }
 0xf48   :  { %v1873_v35 = vpop.f32.mrb[58].mxu0  ;;  %v1920_v22 = vpop.f32.mrb[48].mxu1  ;;  %v1928_v24 = vsel %vm592_vm5, %v1926_v31, -inf }
 0xf49   :  { %v1927_v37 = vsel %vm6956_vm6, -65504.0, %v1920_v22  ;;  %v5688_v38 = vpop.f32.mrb[49].mxu1  ;;  %1929 = vmax.xlane.f32.xlu0 %v1928_v24  ;;  %v5683_v40 = vpop.f32.mrb[59].mxu0 }
 0xf4a   :  { %v1923_v41 = vpop.f32.mrb[50].mxu1  ;;  %v1931_v42 = vsel %vm592_vm5, %v1927_v37, -inf }
 0xf4b   :  { %1932 = vmax.xlane.f32.xlu1 %v1931_v42  ;;  %v5689_v44 = vpop.f32.mrb[51].mxu1 }
 0xf5c   :  { %2000 = vrot.lane.b32.xlu1 %v6971_v33, %s6589_s14 }
 0xf60   :  { %2050 = vrot.lane.b32.xlu1 %v6904_v34, %s6590_s30 }
 0xf64   :  { %2100 = vrot.lane.b32.xlu1 %v6906_v36, %s6590_s30 }
 0xf68   :  { %2098 = vrot.lane.b32.xlu1 %v6922_v43, %s6590_s30 }
 0xfd6   :  { %v1930_v45 = vpop.xlane.xlu0 %1929 }
 0xfd7   :  { %v1934_v46 = vsub.f32 %v1926_v31, %v1930_v45 }
 0xfd8   :  { %v1933_v49 = vpop.xlane.xlu1 %1932 }
 0xfd9   :  { %v1936_v50 = vmul.f32 1.442695, %v1934_v46  ;;  %v1935_v59 = vsub.f32 %v1927_v37, %v1933_v49 }
 0xfdb   :  { %6241 = vpow2.f32 %v1936_v50  ;;  %v1938_v60 = vmul.f32 1.442695, %v1935_v59 }
 0xfdc   :  { %v2001_v61 = vpop.permute.xlu1 %2000 }
 0xfdd   :  { %6243 = vpow2.f32 %v1938_v60  ;;  %v2006_v1 = vsel %vm620_vm7, %v2001_v61, 0 }
 0xfde   :  { %5697 = vmatpush3.bf16.msra.mxu1 %v2006_v1 }
 0xfdf   :  { %5708 = vmatprep.subr.bf16.mxu1 %v6583_v20 }
 0xfe0   :  { %v2051_v12 = vpop.permute.xlu1 %2050 }
 0xfe4   :  { %v2101_v18 = vpop.permute.xlu1 %2100 }
 0xfe5   :  { %v6242_v34 = vpop.eup %6241  ;;  %v2106_v27 = vsel %vm485_vm1, %v2101_v18, 0 }
 0xfe6   :  { %v1940_v36 = vsel %vm592_vm5, %v6242_v34, 0.0 }
 0xfe7   :  { %v6244_v3 = vpop.eup %6243  ;;  %1941 = vadd.xlane.f32.xlu0 %v1940_v36 }
 0xfe8   :  { %v1943_v43 = vsel %vm592_vm5, %v6244_v3, 0.0  ;;  %v2099_v29 = vpop.permute.xlu1 %2098 }
 0xfeb   :  { %1944 = vadd.xlane.f32.xlu0 %v1943_v43 }
0x1001   :  { %1952 = vrot.lane.b32.xlu0 %v6969_v30, %s6589_s14 }
0x1005   :  { %2048 = vrot.lane.b32.xlu0 %v6913_v39, %s6590_s30  ;;  %v2056_v39 = vsel %vm485_vm1, %v2051_v12, 0  ;;  %v6109_v12 = vld [vmem:[#allocation8 + $0x20] sm:$0xff]  }
0x1074   :  { %v1942_v5 = vpop.xlane.xlu0 %1941 }
0x1075   :  { %6245 = vrcp.f32 %v1942_v5 }
0x1078   :  { %v1945_v6 = vpop.xlane.xlu0 %1944 }
0x1079   :  { %6247 = vrcp.f32 %v1945_v6 }
0x107c   :  { %v1953_v7 = vpop.permute.xlu0 %1952 }
0x107d   :  { %v1958_v10 = vsel %vm620_vm7, %v1953_v7, 0 }
0x107e   :  { %5691 = vmatpush3.bf16.msra.mxu0 %v1958_v10 }
0x107f   :  { %v6246_v11 = vpop.eup %6245  ;;  %5702 = vmatprep.subr.bf16.mxu0 %v6583_v20 }
0x1080   :  { %v1948_v13 = vmul.f32 %v6246_v11, %v6242_v34  ;;  %v2049_v28 = vpop.permute.xlu0 %2048  ;;  %v6108_v11 = vld [vmem:[#allocation8 + $0x18] sm:$0xff]  }
0x1082   :  { %v1950_v14 = vpack.c.bf16 %v1948_v13, %v1948_v13  ;;  %v6110_v13 = vld [vmem:[#allocation8 + $0x28] sm:$0xff]  }
0x1083   :  { %v6248_v16 = vpop.eup %6247 }
0x1084   :  { %5693 = vmatmul.mubr.msk.bf16.vlgmr.msra.gmra.mrb[60].mxu0 %vm592_vm5, %v1950_v14  ;;  %v1949_v17 = vmul.f32 %v6248_v16, %v6244_v3  ;;  %v6111_v14 = vld [vmem:[#allocation8 + $0x30] sm:$0xff]   ;;  %v6112_v16 = vld [vmem:[#allocation8 + $0x38] sm:$0xff]  }
0x1085   :  { %5704 = vmatprep.mubr.msk.bf16.mxu0 %vm6584_vm0, %v6583_v20 }
0x1086   :  { %v1951_v26 = vpack.c.bf16 %v1949_v17, %v1949_v17 }
0x1087   :  { %5703 = vmatpush3.bf16.xpose.msra.mxu0 %v2056_v39 }
0x1088   :  { %5699 = vmatmul.mubr.msk.bf16.vlgmr.msra.gmra.mrb[52].mxu1 %vm592_vm5, %v1951_v26  ;;  %5714 = vmatprep.subr.bf16.mxu0 %v6583_v20 }
0x1089   :  { %5709 = vmatpush3.bf16.xpose.msra.mxu1 %v2106_v27  ;;  %5710 = vmatprep.mubr.msk.bf16.mxu1 %vm6584_vm0, %v6583_v20 }
0x108a   :  { %5720 = vmatprep.subr.bf16.mxu1 %v6583_v20 }
0x108e   :  { %5705 = vmatmul.mubr.msk.bf16.vlgmr.msra.gmra.mrb[64].mxu0 %vm485_vm1, %v2049_v28 }
0x108f   :  { %5716 = vmatprep.mubr.msk.bf16.mxu0 %vm6584_vm0, %v6583_v20 }
0x1090   :  { %5711 = vmatmul.mubr.msk.bf16.vlgmr.msra.gmra.mrb[56].mxu1 %vm485_vm1, %v2099_v29 }
0x1091   :  { %5722 = vmatprep.mubr.msk.bf16.mxu1 %vm6584_vm0, %v6583_v20 }
0x1157   :  { %v1994_v31 = vpop.f32.mrb[60].mxu0 }
0x1158   :  { %v5694_v32 = vpop.f32.mrb[61].mxu0 }
0x1159   :  { %v1997_v35 = vpop.f32.mrb[62].mxu0 }
0x115a   :  { %v5695_v22 = vpop.f32.mrb[63].mxu0 }
0x115b   :  { %v2042_v24 = vpop.f32.mrb[52].mxu1 }
0x115c   :  { %v6028_v37 = vpack.i.bf16 %v2042_v24, %v1994_v31  ;;  %v5700_v38 = vpop.f32.mrb[53].mxu1 }
0x115d   :  { %v2045_v40 = vpop.f32.mrb[54].mxu1 }
0x115e   :  { %v5701_v41 = vpop.f32.mrb[55].mxu1 }
0x1161   :  { %v2092_v42 = vpop.f32.mrb[64].mxu0 }
0x1162   :  { %v2148_v44 = vsel %vm6947_vm4, -65504.0, %v2092_v42  ;;  %v5706_v45 = vpop.f32.mrb[65].mxu0 }
0x1163   :  { %v2095_v46 = vpop.f32.mrb[66].mxu0  ;;  %v2142_v49 = vpop.f32.mrb[56].mxu1  ;;  %v2150_v50 = vsel %vm592_vm5, %v2148_v44, -inf }
0x1164   :  { %v2149_v59 = vsel %vm6956_vm6, -65504.0, %v2142_v49  ;;  %v5712_v60 = vpop.f32.mrb[57].mxu1  ;;  %2151 = vmax.xlane.f32.xlu0 %v2150_v50  ;;  %v5707_v61 = vpop.f32.mrb[67].mxu0 }
0x1165   :  { %v2145_v1 = vpop.f32.mrb[58].mxu1  ;;  %v2153_v34 = vsel %vm592_vm5, %v2149_v59, -inf }
0x1166   :  { %2154 = vmax.xlane.f32.xlu1 %v2153_v34  ;;  %v5713_v36 = vpop.f32.mrb[59].mxu1 }
0x1177   :  { %2222 = vrot.lane.b32.xlu1 %v6971_v33, %s6590_s30 }
0x117b   :  { %6004 = vrot.lane.b32.xlu1 %v6003_v54, %s6590_s30 }
0x117f   :  { %6009 = vrot.lane.b32.xlu1 %v6008_v58, %s6589_s14 }
0x1183   :  { %6019 = vrot.lane.b32.xlu1 %v6018_v9, %s7899_s27 }
0x1187   :  { %6029 = vrot.lane.b32.xlu1 %v6028_v37, %s6586_s4 }
0x11f1   :  { %v2152_v56 = vpop.xlane.xlu0 %2151 }
0x11f2   :  { %v2156_v2 = vsub.f32 %v2148_v44, %v2152_v56 }
0x11f3   :  { %v2155_v33 = vpop.xlane.xlu1 %2154 }
0x11f4   :  { %v2158_v3 = vmul.f32 1.442695, %v2156_v2  ;;  %v2157_v43 = vsub.f32 %v2149_v59, %v2155_v33 }
0x11f6   :  { %6249 = vpow2.f32 %v2158_v3  ;;  %v2160_v48 = vmul.f32 1.442695, %v2157_v43 }
0x11f7   :  { %v2223_v53 = vpop.permute.xlu1 %2222 }
0x11f8   :  { %6251 = vpow2.f32 %v2160_v48  ;;  %v2228_v54 = vsel %vm620_vm7, %v2223_v53, 0 }
0x11f9   :  { %5721 = vmatpush3.bf16.msra.mxu1 %v2228_v54 }
0x11fa   :  { %5746 = vmatprep.subr.bf16.mxu1 %v6583_v20 }
0x11fb   :  { %v6005_v35 = vpop.permute.xlu1 %6004 }
0x11fc   :  { %v6007_v37 = vunpack.i.h.bf16 %v6005_v35  ;;  %v6006_v38 = vunpack.i.l.bf16 %v6005_v35 }
0x11fe   :  { %v2327_v49 = vsel %vm485_vm1, %v7001_v57, %v6007_v37  ;;  %v2326_v50 = vsel %vm485_vm1, %v6999_v52, %v6006_v38  ;;  %v6126_v38 = vld [vmem:[#allocation10 + $0x8] sm:$0xff]  }
0x11ff   :  { %v6010_v22 = vpop.permute.xlu1 %6009 }
0x1200   :  { %v6250_v47 = vpop.eup %6249  ;;  %v6012_v40 = vunpack.i.h.bf16 %v6010_v22  ;;  %v6011_v41 = vunpack.i.l.bf16 %v6010_v22 }
0x1201   :  { %v2162_v55 = vsel %vm592_vm5, %v6250_v47, 0.0 }
0x1202   :  { %v6252_v58 = vpop.eup %6251  ;;  %2163 = vadd.xlane.f32.xlu0 %v2162_v55  ;;  %v2329_v59 = vsel %vm2328_vm8, %v2326_v50, %v6011_v41  ;;  %v2330_v60 = vsel %vm2328_vm8, %v2327_v49, %v6012_v40  ;;  %v6129_v40 = vld [vmem:[#allocation11 + $0x44] ss:$8 sps:$4 sm:$0xff]   ;;  %v6127_v41 = vld [vmem:[#allocation11 + $0x40] ss:$8 sps:$4 sm:$0xff]  }
0x1203   :  { %v2165_v4 = vsel %vm592_vm5, %v6252_v58, 0.0  ;;  %v6020_v42 = vpop.permute.xlu1 %6019  ;;  %v6137_v49 = vld [vmem:[#allocation11 + $0x64] ss:$8 sps:$4 sm:$0xff]   ;;  %v6135_v50 = vld [vmem:[#allocation11 + $0x60] ss:$8 sps:$4 sm:$0xff]  }
0x1204   :  { %v6022_v56 = vunpack.i.h.bf16 %v6020_v42  ;;  %v6021_v2 = vunpack.i.l.bf16 %v6020_v42  ;;  %v6130_v42 = vld [vmem:[#allocation10 + $0x10] sm:$0xff]  }
0x1206   :  { %2166 = vadd.xlane.f32.xlu0 %v2165_v4 }
0x1207   :  { %v6030_v33 = vpop.permute.xlu1 %6029 }
0x1208   :  { %v6032_v48 = vunpack.i.h.bf16 %v6030_v33  ;;  %v6031_v53 = vunpack.i.l.bf16 %v6030_v33  ;;  %v205_v33 = vld [vmem:[#allocation5 + $0x10] sm:$0xff] }
0x121c   :  { %2174 = vrot.lane.b32.xlu0 %v6969_v30, %s6590_s30 }
0x1220   :  { %6014 = vrot.lane.b32.xlu0 %v6013_v63, %s6588_s8 }
0x1224   :  { %6024 = vrot.lane.b32.xlu0 %v6023_v21, %s6587_s1  ;;  %v6107_v21 = vld [vmem:[#allocation8 + $0x10] sm:$0xff]  }
0x128f   :  { %v2164_v8 = vpop.xlane.xlu0 %2163 }
0x1290   :  { %6253 = vrcp.f32 %v2164_v8 }
0x1293   :  { %v2167_v9 = vpop.xlane.xlu0 %2166 }
0x1294   :  { %6255 = vrcp.f32 %v2167_v9 }
0x1297   :  { %v2175_v5 = vpop.permute.xlu0 %2174 }
0x1298   :  { %v2180_v6 = vsel %vm620_vm7, %v2175_v5, 0 }
0x1299   :  { %5715 = vmatpush3.bf16.msra.mxu0 %v2180_v6  ;;  %v5214_v6 = vld [vmem:[%s7906_s2] ss:$0 sm:$0xff]  ;;  %s6591_s2 = smov [#allocation17]  }
0x129a   :  { %v6254_v7 = vpop.eup %6253  ;;  %5726 = vmatprep.subr.bf16.mxu0 %v6583_v20  ;;  %s5142_s12 = sshll.u32 %s6591_s2, 4  ;;  %s5143_s12 = int_to_ptr.vmem [resolvable:$true] %s5142_s12 }
0x129b   :  { %v2170_v30 = vmul.f32 %v6254_v7, %v6250_v47  ;;  %v6015_v24 = vpop.permute.xlu0 %6014  ;;  %s6533_s28 = scalar_lea.vmem %s5143_s12, 256  ;;  %p6538_p3 = scmp.lt.s32.totalorder %s5143_s12, %s5143_s12 }
0x129c   :  { %v6017_v44 = vunpack.i.h.bf16 %v6015_v24  ;;  %v6016_v45 = vunpack.i.l.bf16 %v6015_v24  ;;  %p6534_p2 = scmp.ne.s32.totalorder %s5143_s12, %s6533_s28  ;;  %p6539_p4 = scmp.lt.s32.totalorder %s6533_s28, %s6533_s28 }
0x129d   :  { %v2172_v10 = vpack.c.bf16 %v2170_v30, %v2170_v30 }
0x129e   :  { %v6256_v51 = vpop.eup %6255  ;;  %v2333_v61 = vsel %vm2331_vm9, %v2330_v60, %v6017_v44  ;;  %v2332_v1 = vsel %vm2331_vm9, %v2329_v59, %v6016_v45  ;;  %v6133_v44 = vld [vmem:[#allocation11 + $0x54] ss:$8 sps:$4 sm:$0xff]   ;;  %v6131_v45 = vld [vmem:[#allocation11 + $0x50] ss:$8 sps:$4 sm:$0xff]   ;;  %v6138_v59 = vld [vmem:[#allocation10 + $0x20] sm:$0xff]   ;;  %p6540_p5 = por %p6539_p4, %p6538_p3 }
0x129f   :  { %5717 = vmatmul.mubr.msk.bf16.vlgmr.msra.gmra.mrb[68].mxu0 %vm592_vm5, %v2172_v10  ;;  %v2171_v62 = vmul.f32 %v6256_v51, %v6252_v58  ;;  %v6025_v46 = vpop.permute.xlu0 %6024  ;;  %v2335_v57 = vsel %vm2334_vm10, %v2332_v1, %v6021_v2  ;;  %v2336_v3 = vsel %vm2334_vm10, %v2333_v61, %v6022_v56  ;;  %v6141_v60 = vld [vmem:[#allocation11 + $0x74] ss:$8 sps:$4 sm:$0xff]   ;;  %v6139_v61 = vld [vmem:[#allocation11 + $0x70] ss:$8 sps:$4 sm:$0xff]   ;;  %v203_v1 = vld [vmem:[#allocation5] sm:$0xff] }
0x12a0   :  { %5742 = vmatprep.mubr.msk.bf16.mxu0 %vm6584_vm0, %v6583_v20  ;;  %5727 = vmatpush3.bf16.msra.mxu0 %v6105_v15  ;;  %v6027_v34 = vunpack.i.h.bf16 %v6025_v46  ;;  %v6026_v36 = vunpack.i.l.bf16 %v6025_v46  ;;  %v6333_v15 = vld [vmem:[#allocation2] sm:$0xff]  ;;  %v6134_v46 = vld [vmem:[#allocation10 + $0x18] sm:$0xff]   ;;  %p6541_p6 = pnand %p6540_p5, %p6534_p2 }
0x12a1   :  { %v2173_v63 = vpack.c.bf16 %v2171_v62, %v2171_v62  ;;  %5728 = vmatprep.subr.bf16.mxu0 %v6583_v20  ;;  %v6143_v2 = vld [vmem:[#allocation10 + $0x30] sm:$0xff]  }
0x12a2   :  { %v2338_v52 = vsel %vm2337_vm11, %v2335_v57, %v6026_v36  ;;  %v2339_v43 = vsel %vm2337_vm11, %v2336_v3, %v6027_v34  ;;  %v204_v34 = vld [vmem:[#allocation5 + $0x8] sm:$0xff]  ;;  %v206_v57 = vld [vmem:[#allocation5 + $0x18] sm:$0xff] }
0x12a3   :  { %5723 = vmatmul.mubr.msk.bf16.vlgmr.msra.gmra.mrb[60].mxu1 %vm592_vm5, %v2173_v63  ;;  %v2341_v58 = vsel %vm2340_vm12, %v2338_v52, %v6031_v53  ;;  %v2342_v4 = vsel %vm2340_vm12, %v2339_v43, %v6032_v48  ;;  %v6142_v36 = vld [vmem:[#allocation10 + $0x28] sm:$0xff]   ;;  %v2617_v56 = vpack.c.bf16 %v204_v34, %v203_v1  ;;  %v6144_v3 = vld [vmem:[#allocation10 + $0x38] sm:$0xff]   ;;  %v2618_v52 = vpack.c.bf16 %v206_v57, %v205_v33 }
0x12a4   :  { %5762 = vmatprep.mubr.msk.bf16.mxu1 %vm6584_vm0, %v6583_v20  ;;  %5729 = vmatpush3.bf16.msra.mxu0 %v6106_v19 }
0x12a5   :  { %5730 = vmatprep.subr.bf16.mxu0 %v6583_v20 }
0x12a8   :  { %5731 = vmatpush3.bf16.msra.mxu0 %v6107_v21  ;;  %v6334_v21 = vld [vmem:[#allocation2 + $0x8] sm:$0xff] }
0x12a9   :  { %5732 = vmatprep.subr.bf16.mxu0 %v6583_v20 }
0x12ac   :  { %5733 = vmatpush3.bf16.msra.mxu0 %v6108_v11 }
0x12ad   :  { %5734 = vmatprep.subr.bf16.mxu0 %v6583_v20 }
0x12b0   :  { %5735 = vmatpush3.bf16.msra.mxu0 %v6109_v12  ;;  %v6113_v12 = vld [vmem:[#allocation11] ss:$8 sps:$4 sm:$0xff]  }
0x12b1   :  { %5736 = vmatprep.subr.bf16.mxu0 %v6583_v20 }
0x12b4   :  { %5737 = vmatpush3.bf16.msra.mxu0 %v6110_v13  ;;  %v6115_v13 = vld [vmem:[#allocation11 + $0x4] ss:$8 sps:$4 sm:$0xff]  }
0x12b5   :  { %5738 = vmatprep.subr.bf16.mxu0 %v6583_v20 }
0x12b8   :  { %5739 = vmatpush3.bf16.msra.mxu0 %v6111_v14  ;;  %v6118_v14 = vld [vmem:[#allocation11 + $0x14] ss:$8 sps:$4 sm:$0xff]  }
0x12b9   :  { %5740 = vmatprep.subr.bf16.mxu0 %v6583_v20 }
0x12bc   :  { %5741 = vmatpush3.bf16.msra.mxu0 %v6112_v16  ;;  %v6122_v16 = vld [vmem:[#allocation10] sm:$0xff]  }
0x12bd   :  { %2727 = vmatprep.subr.bf16.mxu0 %v6115_v13  ;;  %5747 = vmatpush3.bf16.msra.mxu1 %v6122_v16 }
0x12be   :  { %5748 = vmatprep.subr.bf16.mxu1 %v6583_v20 }
0x12c1   :  { %5749 = vmatpush3.bf16.msra.mxu1 %v6126_v38 }
0x12c2   :  { %5750 = vmatprep.subr.bf16.mxu1 %v6583_v20 }
0x12c5   :  { %5751 = vmatpush3.bf16.msra.mxu1 %v6130_v42 }
0x12c6   :  { %5752 = vmatprep.subr.bf16.mxu1 %v6583_v20 }
0x12c9   :  { %5753 = vmatpush3.bf16.msra.mxu1 %v6134_v46 }
0x12ca   :  { %5754 = vmatprep.subr.bf16.mxu1 %v6583_v20 }
0x12cd   :  { %5755 = vmatpush3.bf16.msra.mxu1 %v6138_v59 }
0x12ce   :  { %5756 = vmatprep.subr.bf16.mxu1 %v6583_v20 }
0x12d1   :  { %5757 = vmatpush3.bf16.msra.mxu1 %v6142_v36  ;;  %v211_v36 = vld [vmem:[%s7907_s10] sm:$0x1] }
0x12d2   :  { %5758 = vmatprep.subr.bf16.mxu1 %v6583_v20  ;;  %vm213_vm14 = vcmp.gt.f32.partialorder %v211_v36, 0.5 }
0x12d5   :  { %5759 = vmatpush3.bf16.msra.mxu1 %v6143_v2  ;;  %v212_v2 = vld [vmem:[%s7907_s10 + $0x1] sm:$0x1] }
0x12d6   :  { %5760 = vmatprep.subr.bf16.mxu1 %v6583_v20  ;;  %vm214_vm15 = vcmp.gt.f32.partialorder %v212_v2, 0.5 }
0x12d9   :  { %5761 = vmatpush3.bf16.msra.mxu1 %v6144_v3  ;;  %v2879_v3 = vsel %vm214_vm15, 1, %v6582_v0 }
0x12da   :  { %5766 = vmatprep.subr.bf16.mxu1 %v6583_v20 }
0x1372   :  { %v2216_v17 = vpop.f32.mrb[68].mxu0 }
0x1373   :  { %v5718_v18 = vpop.f32.mrb[69].mxu0 }
0x1374   :  { %v2219_v39 = vpop.f32.mrb[70].mxu0  ;;  %v6121_v18 = vld [vmem:[#allocation11 + $0x24] ss:$8 sps:$4 sm:$0xff]  }
0x1375   :  { %v5719_v26 = vpop.f32.mrb[71].mxu0  ;;  %v6119_v39 = vld [vmem:[#allocation11 + $0x20] ss:$8 sps:$4 sm:$0xff]  }
0x1376   :  { %v2264_v27 = vpop.f32.mrb[60].mxu1  ;;  %v6125_v26 = vld [vmem:[#allocation11 + $0x34] ss:$8 sps:$4 sm:$0xff]  }
0x1377   :  { %v6033_v28 = vpack.i.bf16 %v2264_v27, %v2216_v17  ;;  %v5724_v29 = vpop.f32.mrb[61].mxu1  ;;  %v6116_v17 = vld [vmem:[#allocation11 + $0x10] ss:$8 sps:$4 sm:$0xff]  }
0x1378   :  { %v2267_v31 = vpop.f32.mrb[62].mxu1  ;;  %v6123_v27 = vld [vmem:[#allocation11 + $0x30] ss:$8 sps:$4 sm:$0xff]  }
0x1379   :  { %v5725_v32 = vpop.f32.mrb[63].mxu1  ;;  %6034 = vrot.lane.b32.xlu0 %v6033_v28, %s6585_s7 }
0x13eb   :  { %v6035_v54 = vpop.permute.xlu0 %6034 }
0x13ec   :  { %v6037_v47 = vunpack.i.h.bf16 %v6035_v54  ;;  %v6036_v55 = vunpack.i.l.bf16 %v6035_v54 }
0x13ee   :  { %v2345_v8 = vsel %vm2343_vm13, %v2342_v4, %v6037_v47  ;;  %v2344_v9 = vsel %vm2343_vm13, %v2341_v58, %v6036_v55 }
0x13ef   :  { %v2346_v5 = vpack.c.bf16 %v2345_v8, %v2344_v9  ;;  %v5223_v8 = vld [vmem:[%s7856_s18] ss:$0 sm:$0xff] }
0x13f1   :  { %5743 = vmatmul.mubr.bf16.vlgmr.msra.gmra.mrb[72].mxu0 %v2346_v5 }
0x13f2   :  { %2759 = vmatprep.mubr.bf16.mxu0 %v6582_v0  ;;  %2728 = vmatpush1.bf16.msra.mxu0 %v6113_v12 }
0x13f3   :  { %2729 = vmatprep.subr.bf16.mxu0 %v6118_v14 }
0x13f6   :  { %2730 = vmatpush1.bf16.msra.mxu0 %v6116_v17 }
0x13f7   :  { %2731 = vmatprep.subr.bf16.mxu0 %v6121_v18 }
0x13fa   :  { %2732 = vmatpush1.bf16.msra.mxu0 %v6119_v39 }
0x13fb   :  { %2733 = vmatprep.subr.bf16.mxu0 %v6125_v26 }
0x13fe   :  { %2734 = vmatpush1.bf16.msra.mxu0 %v6123_v27 }
0x13ff   :  { %2735 = vmatprep.subr.bf16.mxu0 %v6129_v40 }
0x1402   :  { %2736 = vmatpush1.bf16.msra.mxu0 %v6127_v41  ;;  %v5225_v41 = vld [vmem:[%s7847_s9] ss:$0 sm:$0xff] }
0x1403   :  { %2737 = vmatprep.subr.bf16.mxu0 %v6133_v44 }
0x1406   :  { %2738 = vmatpush1.bf16.msra.mxu0 %v6131_v45 }
0x1407   :  { %2739 = vmatprep.subr.bf16.mxu0 %v6137_v49 }
0x140a   :  { %2740 = vmatpush1.bf16.msra.mxu0 %v6135_v50 }
0x140b   :  { %2741 = vmatprep.subr.bf16.mxu0 %v6141_v60 }
0x140e   :  { %2742 = vmatpush1.bf16.msra.mxu0 %v6139_v61 }
0x140f   :  { %5796 = vmatprep.subr.bf16.mxu0 %v6583_v20 }
0x1411   :  { %2760 = vmatmul.mubr.bf16.vlgmr.msra.gmra.mrb[76].mxu0 %v2617_v56  ;;  %v2878_v56 = vsel %vm213_vm14, 1, %v6582_v0 }
0x1412   :  { %2769 = vmatprep.mubr.bf16.mxu0 %v6582_v0  ;;  %v2883_v33 = vrot.slane %v2878_v56, %v6898_v25 }
0x1414   :  { %vm7424_vm2 = vcmp.eq.s32.totalorder %v2883_v33, 1 }
0x1419   :  { %2770 = vmatmul.mubr.bf16.gmra.mrb[80].mxu0 %v2618_v52 }
0x141a   :  { %5798 = vmatprep.mubr.msk.bf16.mxu0 %vm6584_vm0, %v6583_v20 }
0x14c4   :  { %v2452_v7 = vpop.f32.mrb[72].mxu0 }
0x14c5   :  { %v2453_v30 = vadd.f32 %v5214_v6, %v2452_v7  ;;  %v5744_v10 = vpop.f32.mrb[73].mxu0  ;;  %v5224_v7 = vld [vmem:[%s7857_s19] ss:$0 sm:$0xff] }
0x14c6   :  { %v2455_v51 = vpop.f32.mrb[74].mxu0 }
0x14c7   :  { %v2456_v62 = vadd.f32 %v5214_v6, %v2455_v51  ;;  %v5745_v63 = vpop.f32.mrb[75].mxu0  ;;  %v2459_v19 = vadd.f32 %v6333_v15, %v2453_v30 }
0x14c8   :  { %v2635_v63 = vld [vmem:[%s7849_s11] sm:$0x3] }
0x14c9   :  { %2461 = vadd.xlane.f32.xlu1 %v2459_v19  ;;  %v2460_v11 = vadd.f32 %v6334_v21, %v2456_v62  ;;  %v2640_v15 = vrot.slane %v2635_v63, %v6898_v25 }
0x14cb   :  { %2463 = vadd.xlane.f32.xlu0 %v2460_v11 }
0x14e4   :  { %v2761_v21 = vpop.f32.mrb[76].mxu0 }
0x14e5   :  { %v2763_v12 = vpop.f32.mrb[77].mxu0 }
0x14e6   :  { %v2765_v14 = vpop.f32.mrb[78].mxu0 }
0x14e7   :  { %v2766_v16 = vadd.f32 %v2765_v14, %v2640_v15  ;;  %v2767_v17 = vpop.f32.mrb[79].mxu0 }
0x1556   :  { %v2462_v28 = vpop.xlane.xlu1 %2461 }
0x1557   :  { %v2466_v29 = vmul.f32 0.0078125, %v2462_v28  ;;  %v2771_v28 = vpop.f32.mrb[80].mxu0 }
0x1558   :  { %v2464_v31 = vpop.xlane.xlu0 %2463 }
0x1559   :  { %v7345_v32 = vsub.f32 %v2459_v19, %v2466_v29  ;;  %v2467_v35 = vmul.f32 0.0078125, %v2464_v31  ;;  %v2644_v19 = vrot.slane %v2635_v63, %v6890_v23  ;;  %v2772_v29 = vadd.f32 %v2771_v28, %v2640_v15  ;;  %v2773_v31 = vpop.f32.mrb[81].mxu0 }
0x155b   :  { %v7347_v22 = vsub.f32 %v2460_v11, %v2467_v35  ;;  %v2470_v24 = vmul.f32 %v7345_v32, %v7345_v32  ;;  %v2762_v11 = vadd.f32 %v2761_v21, %v2640_v15  ;;  %v2764_v13 = vadd.f32 %v2763_v12, %v2644_v19  ;;  %v2775_v35 = vpop.f32.mrb[82].mxu0 }
0x155c   :  { %v2768_v18 = vadd.f32 %v2767_v17, %v2644_v19 }
0x155d   :  { %2472 = vadd.xlane.f32.xlu0 %v2470_v24  ;;  %v2471_v37 = vmul.f32 %v7347_v22, %v7347_v22  ;;  %v7385_v39 = vpack.c.bf16 %v2766_v16, %v2762_v11  ;;  %v2777_v24 = vpop.f32.mrb[83].mxu0 }
0x155e   :  { %v7387_v26 = vpack.c.bf16 %v2768_v18, %v2764_v13 }
0x155f   :  { %v2790_v27 = vsel %vm485_vm1, %v7385_v39, 0 }
0x1561   :  { %2474 = vadd.xlane.f32.xlu0 %v2471_v37  ;;  %v2778_v37 = vadd.f32 %v2777_v24, %v2644_v19 }
0x15ea   :  { %v2473_v43 = vpop.xlane.xlu0 %2472 }
0x15eb   :  { %v2476_v48 = vmul.f32 0.0078125, %v2473_v43 }
0x15ed   :  { %v2478_v53 = vadd.f32 1e-05, %v2476_v48 }
0x15ee   :  { %v2475_v54 = vpop.xlane.xlu0 %2474 }
0x15ef   :  { %6257 = vrsqrt.f32 %v2478_v53  ;;  %v2477_v47 = vmul.f32 0.0078125, %v2475_v54 }
0x15f1   :  { %v2479_v55 = vadd.f32 1e-05, %v2477_v47  ;;  %v2887_v47 = vrot.slane %v2879_v3, %v6898_v25 }
0x15f3   :  { %6259 = vrsqrt.f32 %v2479_v55  ;;  %vm7433_vm3 = vcmp.eq.s32.totalorder %v2887_v47, 1 }
0x15f9   :  { %v6258_v58 = vpop.eup %6257 }
0x15fa   :  { %v2482_v4 = vmul.f32 %v6258_v58, %v7345_v32  ;;  %v2774_v32 = vadd.f32 %v2773_v31, %v2644_v19 }
0x15fc   :  { %v2491_v6 = vmul.f32 %v5223_v8, %v2482_v4  ;;  %v7394_v40 = vpack.c.bf16 %v2778_v37, %v2774_v32 }
0x15fd   :  { %v6260_v9 = vpop.eup %6259 }
0x15fe   :  { %v2483_v5 = vmul.f32 %v6260_v9, %v7347_v22  ;;  %v7372_v10 = vadd.f32 %v5224_v7, %v2491_v6  ;;  %v2776_v22 = vadd.f32 %v2775_v35, %v2640_v15 }
0x1600   :  { %v2492_v30 = vmul.f32 %v5223_v8, %v2483_v5  ;;  %v7392_v38 = vpack.c.bf16 %v2776_v22, %v2772_v29 }
0x1602   :  { %v7374_v51 = vadd.f32 %v5224_v7, %v2492_v30  ;;  %v2836_v61 = vsel %vm485_vm1, %v7392_v38, 0 }
0x1604   :  { %v2502_v62 = vpack.c.bf16 %v7374_v51, %v7372_v10 }
0x1606   :  { %5763 = vmatmul.mubr.bf16.vlgmr.msra.gmra.mrb[64].mxu1 %v2502_v62 }
0x1607   :  { %5768 = vmatprep.mubr.msk.bf16.mxu1 %vm6584_vm0, %v6583_v20  ;;  %5767 = vmatpush3.bf16.xpose.msra.mxu1 %v2790_v27 }
0x1608   :  { %5772 = vmatprep.subr.bf16.mxu1 %v6583_v20 }
0x16d9   :  { %v2608_v42 = vpop.f32.mrb[64].mxu1 }
0x16da   :  { %v2609_v44 = vadd.f32 %v5225_v41, %v2608_v42  ;;  %v5764_v45 = vpop.f32.mrb[65].mxu1 }
0x16db   :  { %v2611_v46 = vpop.f32.mrb[66].mxu1 }
0x16dc   :  { %v2615_v49 = vmul.f32 0.25, %v2609_v44  ;;  %v5765_v50 = vpop.f32.mrb[67].mxu1  ;;  %v2612_v60 = vadd.f32 %v5225_v41, %v2611_v46 }
0x16de   :  { %v7399_v59 = vpack.c.bf16 %v2615_v49, %v2615_v49  ;;  %v2616_v1 = vmul.f32 0.25, %v2612_v60 }
0x16e0   :  { %5769 = vmatmul.mubr.msk.bf16.vlgmr.msra.gmra.mrb[68].mxu1 %vm485_vm1, %v7399_v59  ;;  %v7408_v34 = vpack.c.bf16 %v2616_v1, %v2616_v1 }
0x16e1   :  { %5773 = vmatpush3.bf16.xpose.msra.mxu1 %v2836_v61  ;;  %5774 = vmatprep.mubr.msk.bf16.mxu1 %vm6584_vm0, %v6583_v20 }
0x16e2   :  { %5778 = vmatprep.subr.bf16.mxu1 %v6583_v20 }
0x16e8   :  { %5775 = vmatmul.mubr.msk.bf16.vlgmr.msra.gmra.mrb[72].mxu1 %vm485_vm1, %v7408_v34 }
0x16e9   :  { %5779 = vmatpush3.bf16.msra.mxu1 %v7387_v26  ;;  %5780 = vmatprep.mubr.msk.bf16.mxu1 %vm6584_vm0, %v6583_v20 }
0x16ea   :  { %5784 = vmatprep.subr.bf16.mxu1 %v6583_v20 }
0x17b3   :  { %v2826_v52 = vpop.f32.mrb[68].mxu1 }
0x17b4   :  { %v2890_v43 = vsel %vm7424_vm2, -65504.0, %v2826_v52  ;;  %v5770_v48 = vpop.f32.mrb[69].mxu1 }
0x17b5   :  { %v2829_v53 = vpop.f32.mrb[70].mxu1  ;;  %v2892_v54 = vsel %vm485_vm1, %v2890_v43, -inf }
0x17b6   :  { %2893 = vmax.xlane.f32.xlu1 %v2892_v54  ;;  %v5771_v55 = vpop.f32.mrb[71].mxu1 }
0x17bb   :  { %v2872_v4 = vpop.f32.mrb[72].mxu1 }
0x17bc   :  { %v2891_v8 = vsel %vm7433_vm3, -65504.0, %v2872_v4  ;;  %v5776_v9 = vpop.f32.mrb[73].mxu1 }
0x17bd   :  { %v2875_v5 = vpop.f32.mrb[74].mxu1  ;;  %v2895_v6 = vsel %vm485_vm1, %v2891_v8, -inf }
0x17be   :  { %2896 = vmax.xlane.f32.xlu0 %v2895_v6  ;;  %v5777_v7 = vpop.f32.mrb[75].mxu1 }
0x1843   :  { %v2894_v30 = vpop.xlane.xlu1 %2893 }
0x1844   :  { %v2898_v62 = vsub.f32 %v2890_v43, %v2894_v30 }
0x1846   :  { %v2900_v63 = vmul.f32 1.442695, %v2898_v62 }
0x1848   :  { %6261 = vpow2.f32 %v2900_v63 }
0x184b   :  { %v2897_v15 = vpop.xlane.xlu0 %2896 }
0x184c   :  { %v2899_v19 = vsub.f32 %v2891_v8, %v2897_v15 }
0x184e   :  { %v2902_v21 = vmul.f32 1.442695, %v2899_v19 }
0x1850   :  { %6263 = vpow2.f32 %v2902_v21 }
0x1852   :  { %v6262_v11 = vpop.eup %6261 }
0x1853   :  { %v2904_v12 = vsel %vm485_vm1, %v6262_v11, 0.0 }
0x1854   :  { %2905 = vadd.xlane.f32.xlu1 %v2904_v12 }
0x185a   :  { %v6264_v13 = vpop.eup %6263 }
0x185b   :  { %v2907_v14 = vsel %vm485_vm1, %v6264_v13, 0.0 }
0x185c   :  { %2908 = vadd.xlane.f32.xlu0 %v2907_v14 }
0x1865   :  { %3006 = vrot.lane.b32.xlu1 %v7385_v39, %s6585_s7 }
0x1869   :  { %3003 = vrot.lane.b32.xlu1 %v7399_v59, %s6585_s7 }
0x186d   :  { %3055 = vrot.lane.b32.xlu1 %v7408_v34, %s6585_s7 }
0x1872   :  { %3058 = vrot.lane.b32.xlu0 %v7392_v38, %s6585_s7 }
0x18e1   :  { %v2906_v16 = vpop.xlane.xlu1 %2905 }
0x18e2   :  { %6265 = vrcp.f32 %v2906_v16 }
0x18e5   :  { %v3007_v17 = vpop.permute.xlu1 %3006 }
0x18e6   :  { %v3012_v42 = vsel %vm485_vm1, %v3007_v17, 0 }
0x18e9   :  { %v2909_v18 = vpop.xlane.xlu0 %2908  ;;  %v3004_v32 = vpop.permute.xlu1 %3003 }
0x18ea   :  { %6267 = vrcp.f32 %v2909_v18 }
0x18ec   :  { %v6266_v27 = vpop.eup %6265 }
0x18ed   :  { %v2912_v28 = vmul.f32 %v6266_v27, %v6262_v11  ;;  %v3059_v29 = vpop.permute.xlu0 %3058  ;;  %v3056_v37 = vpop.permute.xlu1 %3055 }
0x18ee   :  { %v3064_v31 = vsel %vm485_vm1, %v3059_v29, 0 }
0x18ef   :  { %5797 = vmatpush3.bf16.xpose.msra.mxu0 %v3064_v31  ;;  %v2914_v35 = vpack.c.bf16 %v2912_v28, %v2912_v28 }
0x18f0   :  { %5808 = vmatprep.subr.bf16.mxu0 %v6583_v20 }
0x18f1   :  { %5781 = vmatmul.mubr.msk.bf16.vlgmr.msra.gmra.mrb[76].mxu1 %vm485_vm1, %v2914_v35 }
0x18f2   :  { %5785 = vmatpush3.bf16.msra.mxu1 %v7394_v40  ;;  %5786 = vmatprep.mubr.msk.bf16.mxu1 %vm6584_vm0, %v6583_v20 }
0x18f3   :  { %5790 = vmatprep.subr.bf16.mxu1 %v6583_v20 }
0x18f4   :  { %v6268_v22 = vpop.eup %6267 }
0x18f5   :  { %v2913_v24 = vmul.f32 %v6268_v22, %v6264_v13 }
0x18f6   :  { %5799 = vmatmul.mubr.msk.bf16.vlgmr.msra.gmra.mrb[84].mxu0 %vm485_vm1, %v3056_v37 }
0x18f7   :  { %v2915_v41 = vpack.c.bf16 %v2913_v24, %v2913_v24  ;;  %5810 = vmatprep.mubr.msk.bf16.mxu0 %vm6584_vm0, %v6583_v20 }
0x18f9   :  { %5787 = vmatmul.mubr.msk.bf16.vlgmr.msra.gmra.mrb[80].mxu1 %vm485_vm1, %v2915_v41 }
0x18fa   :  { %5792 = vmatprep.mubr.msk.bf16.mxu1 %vm6584_vm0, %v6583_v20 }
0x18fb   :  { %5791 = vmatpush3.bf16.xpose.msra.mxu1 %v3012_v42 }
0x18fc   :  { %5802 = vmatprep.subr.bf16.mxu1 %v6583_v20 }
0x1902   :  { %5793 = vmatmul.mubr.msk.bf16.vlgmr.msra.gmra.mrb[84].mxu1 %vm485_vm1, %v3004_v32 }
0x1903   :  { %5804 = vmatprep.mubr.msk.bf16.mxu1 %vm6584_vm0, %v6583_v20 }
0x19c4   :  { %v7468_v44 = vpop.f32.mrb[76].mxu1 }
0x19c5   :  { %v5782_v45 = vpop.f32.mrb[77].mxu1 }
0x19c6   :  { %v2956_v46 = vpop.f32.mrb[78].mxu1 }
0x19c7   :  { %v5783_v49 = vpop.f32.mrb[79].mxu1 }
0x19c9   :  { %v3100_v50 = vpop.f32.mrb[84].mxu0 }
0x19ca   :  { %v3107_v60 = vsel %vm7433_vm3, -65504.0, %v3100_v50  ;;  %v5800_v61 = vpop.f32.mrb[85].mxu0 }
0x19cb   :  { %v3103_v1 = vpop.f32.mrb[86].mxu0  ;;  %v3111_v36 = vsel %vm485_vm1, %v3107_v60, -inf }
0x19cc   :  { %3112 = vmax.xlane.f32.xlu0 %v3111_v36  ;;  %v7473_v56 = vpop.f32.mrb[80].mxu1  ;;  %v5801_v2 = vpop.f32.mrb[87].mxu0 }
0x19cd   :  { %v5788_v33 = vpop.f32.mrb[81].mxu1 }
0x19ce   :  { %v2999_v3 = vpop.f32.mrb[82].mxu1 }
0x19cf   :  { %v5789_v52 = vpop.f32.mrb[83].mxu1 }
0x19d5   :  { %v3048_v43 = vpop.f32.mrb[84].mxu1 }
0x19d6   :  { %v3106_v48 = vsel %vm7424_vm2, -65504.0, %v3048_v43  ;;  %v5794_v53 = vpop.f32.mrb[85].mxu1 }
0x19d7   :  { %v3051_v54 = vpop.f32.mrb[86].mxu1  ;;  %v3108_v47 = vsel %vm485_vm1, %v3106_v48, -inf }
0x19d8   :  { %3109 = vmax.xlane.f32.xlu1 %v3108_v47  ;;  %v5795_v55 = vpop.f32.mrb[87].mxu1 }
0x19e9   :  { %3133 = vrot.lane.b32.xlu1 %v7387_v26, %s6585_s7 }
0x19ed   :  { %3228 = vrot.lane.b32.xlu1 %v7385_v39, %s6586_s4 }
0x19f1   :  { %3278 = vrot.lane.b32.xlu1 %v7392_v38, %s6586_s4 }
0x19f5   :  { %3226 = vrot.lane.b32.xlu1 %v7399_v59, %s6586_s4 }
0x1a59   :  { %v3113_v4 = vpop.xlane.xlu0 %3112 }
0x1a5a   :  { %v3115_v8 = vsub.f32 %v3107_v60, %v3113_v4 }
0x1a5c   :  { %v3118_v9 = vmul.f32 1.442695, %v3115_v8 }
0x1a5e   :  { %6269 = vpow2.f32 %v3118_v9 }
0x1a65   :  { %v3110_v5 = vpop.xlane.xlu1 %3109 }
0x1a66   :  { %v3114_v6 = vsub.f32 %v3106_v48, %v3110_v5 }
0x1a68   :  { %v6270_v7 = vpop.eup %6269  ;;  %v3116_v30 = vmul.f32 1.442695, %v3114_v6 }
0x1a69   :  { %v3134_v62 = vpop.permute.xlu1 %3133  ;;  %v3123_v63 = vsel %vm485_vm1, %v6270_v7, 0.0 }
0x1a6a   :  { %6271 = vpow2.f32 %v3116_v30  ;;  %5803 = vmatpush3.bf16.msra.mxu1 %v3134_v62  ;;  %3124 = vadd.xlane.f32.xlu0 %v3123_v63 }
0x1a6b   :  { %5814 = vmatprep.subr.bf16.mxu1 %v6583_v20 }
0x1a6d   :  { %v3229_v14 = vpop.permute.xlu1 %3228 }
0x1a6e   :  { %v3234_v32 = vsel %vm485_vm1, %v3229_v14, 0 }
0x1a71   :  { %v3279_v18 = vpop.permute.xlu1 %3278 }
0x1a72   :  { %v3284_v29 = vsel %vm485_vm1, %v3279_v18, 0 }
0x1a74   :  { %v6272_v15 = vpop.eup %6271 }
0x1a75   :  { %v3120_v19 = vsel %vm485_vm1, %v6272_v15, 0.0  ;;  %v3227_v22 = vpop.permute.xlu1 %3226 }
0x1a76   :  { %3121 = vadd.xlane.f32.xlu0 %v3120_v19 }
0x1a8c   :  { %3180 = vrot.lane.b32.xlu0 %v7394_v40, %s6585_s7 }
0x1a90   :  { %3276 = vrot.lane.b32.xlu0 %v7408_v34, %s6586_s4 }
0x1af7   :  { %v3125_v21 = vpop.xlane.xlu0 %3124 }
0x1af8   :  { %6273 = vrcp.f32 %v3125_v21 }
0x1b02   :  { %v6274_v11 = vpop.eup %6273 }
0x1b03   :  { %v3122_v12 = vpop.xlane.xlu0 %3121  ;;  %v3129_v13 = vmul.f32 %v6274_v11, %v6270_v7 }
0x1b04   :  { %6275 = vrcp.f32 %v3122_v12 }
0x1b05   :  { %v3131_v17 = vpack.c.bf16 %v3129_v13, %v3129_v13 }
0x1b07   :  { %v3181_v16 = vpop.permute.xlu0 %3180 }
0x1b08   :  { %5809 = vmatpush3.bf16.msra.mxu0 %v3181_v16 }
0x1b09   :  { %5820 = vmatprep.subr.bf16.mxu0 %v6583_v20 }
0x1b0b   :  { %5811 = vmatmul.mubr.msk.bf16.vlgmr.msra.gmra.mrb[88].mxu0 %vm485_vm1, %v3131_v17  ;;  %v3277_v35 = vpop.permute.xlu0 %3276 }
0x1b0c   :  { %5822 = vmatprep.mubr.msk.bf16.mxu0 %vm6584_vm0, %v6583_v20 }
0x1b0e   :  { %v6276_v27 = vpop.eup %6275 }
0x1b0f   :  { %v3128_v28 = vmul.f32 %v6276_v27, %v6272_v15 }
0x1b11   :  { %5821 = vmatpush3.bf16.xpose.msra.mxu0 %v3284_v29  ;;  %v3130_v31 = vpack.c.bf16 %v3128_v28, %v3128_v28 }
0x1b12   :  { %5832 = vmatprep.subr.bf16.mxu0 %v6583_v20 }
0x1b13   :  { %5805 = vmatmul.mubr.msk.bf16.vlgmr.msra.gmra.mrb[88].mxu1 %vm485_vm1, %v3130_v31 }
0x1b14   :  { %5815 = vmatpush3.bf16.xpose.msra.mxu1 %v3234_v32  ;;  %5816 = vmatprep.mubr.msk.bf16.mxu1 %vm6584_vm0, %v6583_v20 }
0x1b15   :  { %5826 = vmatprep.subr.bf16.mxu1 %v6583_v20 }
0x1b18   :  { %5823 = vmatmul.mubr.msk.bf16.vlgmr.msra.gmra.mrb[92].mxu0 %vm485_vm1, %v3277_v35 }
0x1b19   :  { %5834 = vmatprep.mubr.msk.bf16.mxu0 %vm6584_vm0, %v6583_v20 }
0x1b1b   :  { %5817 = vmatmul.mubr.msk.bf16.vlgmr.msra.gmra.mrb[92].mxu1 %vm485_vm1, %v3227_v22 }
0x1b1c   :  { %5828 = vmatprep.mubr.msk.bf16.mxu1 %vm6584_vm0, %v6583_v20 }
0x1bde   :  { %v7510_v24 = vpop.f32.mrb[88].mxu0 }
0x1bdf   :  { %v5812_v37 = vpop.f32.mrb[89].mxu0 }
0x1be0   :  { %v3223_v41 = vpop.f32.mrb[90].mxu0 }
0x1be1   :  { %v5813_v42 = vpop.f32.mrb[91].mxu0 }
0x1be6   :  { %v7512_v45 = vpop.f32.mrb[88].mxu1 }
0x1be7   :  { %v6038_v46 = vpack.i.bf16 %v7510_v24, %v7512_v45  ;;  %v5806_v49 = vpop.f32.mrb[89].mxu1 }
0x1be8   :  { %v3176_v50 = vpop.f32.mrb[90].mxu1 }
0x1be9   :  { %v5807_v60 = vpop.f32.mrb[91].mxu1 }
0x1beb   :  { %v3320_v61 = vpop.f32.mrb[92].mxu0 }
0x1bec   :  { %v3327_v1 = vsel %vm7433_vm3, -65504.0, %v3320_v61  ;;  %v5824_v36 = vpop.f32.mrb[93].mxu0 }
0x1bed   :  { %v3331_v2 = vsel %vm485_vm1, %v3327_v1, -inf  ;;  %v3323_v33 = vpop.f32.mrb[94].mxu0 }
0x1bee   :  { %3332 = vmax.xlane.f32.xlu0 %v3331_v2  ;;  %v3270_v3 = vpop.f32.mrb[92].mxu1  ;;  %v5825_v52 = vpop.f32.mrb[95].mxu0 }
0x1bef   :  { %v3326_v43 = vsel %vm7424_vm2, -65504.0, %v3270_v3  ;;  %v5818_v48 = vpop.f32.mrb[93].mxu1 }
0x1bf0   :  { %v3328_v53 = vsel %vm485_vm1, %v3326_v43, -inf  ;;  %v3273_v54 = vpop.f32.mrb[94].mxu1 }
0x1bf1   :  { %3329 = vmax.xlane.f32.xlu1 %v3328_v53  ;;  %v5819_v47 = vpop.f32.mrb[95].mxu1 }
0x1c02   :  { %3352 = vrot.lane.b32.xlu1 %v7387_v26, %s6586_s4 }
0x1c06   :  { %3446 = vrot.lane.b32.xlu1 %v7385_v39, %s6587_s1 }
0x1c0a   :  { %3496 = vrot.lane.b32.xlu1 %v7392_v38, %s6587_s1 }
0x1c0e   :  { %3444 = vrot.lane.b32.xlu1 %v7399_v59, %s6587_s1 }
0x1c7b   :  { %v3333_v55 = vpop.xlane.xlu0 %3332 }
0x1c7c   :  { %v3335_v4 = vsub.f32 %v3327_v1, %v3333_v55 }
0x1c7e   :  { %v3338_v8 = vmul.f32 1.442695, %v3335_v4  ;;  %v3330_v9 = vpop.xlane.xlu1 %3329 }
0x1c7f   :  { %v3334_v5 = vsub.f32 %v3326_v43, %v3330_v9 }
0x1c80   :  { %6277 = vpow2.f32 %v3338_v8 }
0x1c81   :  { %v3336_v6 = vmul.f32 1.442695, %v3334_v5 }
0x1c82   :  { %v3353_v7 = vpop.permute.xlu1 %3352 }
0x1c83   :  { %6279 = vpow2.f32 %v3336_v6  ;;  %5827 = vmatpush3.bf16.msra.mxu1 %v3353_v7 }
0x1c84   :  { %5838 = vmatprep.subr.bf16.mxu1 %v6583_v20 }
0x1c86   :  { %v3447_v11 = vpop.permute.xlu1 %3446 }
0x1c87   :  { %v3452_v31 = vsel %vm485_vm1, %v3447_v11, 0 }
0x1c8a   :  { %v6278_v30 = vpop.eup %6277  ;;  %v3497_v16 = vpop.permute.xlu1 %3496 }
0x1c8b   :  { %v3343_v62 = vsel %vm485_vm1, %v6278_v30, 0.0  ;;  %v3502_v28 = vsel %vm485_vm1, %v3497_v16, 0 }
0x1c8c   :  { %3344 = vadd.xlane.f32.xlu0 %v3343_v62 }
0x1c8d   :  { %v6280_v63 = vpop.eup %6279 }
0x1c8e   :  { %v3340_v15 = vsel %vm485_vm1, %v6280_v63, 0.0  ;;  %v3445_v35 = vpop.permute.xlu1 %3444 }
0x1c90   :  { %3341 = vadd.xlane.f32.xlu0 %v3340_v15 }
0x1ca6   :  { %3398 = vrot.lane.b32.xlu0 %v7394_v40, %s6586_s4 }
0x1caa   :  { %3494 = vrot.lane.b32.xlu0 %v7408_v34, %s6587_s1 }
0x1d19   :  { %v3345_v19 = vpop.xlane.xlu0 %3344 }
0x1d1a   :  { %6281 = vrcp.f32 %v3345_v19 }
0x1d1d   :  { %v3342_v21 = vpop.xlane.xlu0 %3341 }
0x1d1e   :  { %6283 = vrcp.f32 %v3342_v21 }
0x1d21   :  { %v3399_v12 = vpop.permute.xlu0 %3398 }
0x1d22   :  { %5833 = vmatpush3.bf16.msra.mxu0 %v3399_v12 }
0x1d23   :  { %5844 = vmatprep.subr.bf16.mxu0 %v6583_v20 }
0x1d24   :  { %v6282_v13 = vpop.eup %6281 }
0x1d25   :  { %v3349_v14 = vmul.f32 %v6282_v13, %v6278_v30  ;;  %v3495_v32 = vpop.permute.xlu0 %3494 }
0x1d27   :  { %v3351_v17 = vpack.c.bf16 %v3349_v14, %v3349_v14 }
0x1d28   :  { %v6284_v18 = vpop.eup %6283 }
0x1d29   :  { %v3348_v27 = vmul.f32 %v6284_v18, %v6280_v63  ;;  %5835 = vmatmul.mubr.msk.bf16.vlgmr.msra.gmra.mrb[96].mxu0 %vm485_vm1, %v3351_v17 }
0x1d2a   :  { %5846 = vmatprep.mubr.msk.bf16.mxu0 %vm6584_vm0, %v6583_v20 }
0x1d2b   :  { %5845 = vmatpush3.bf16.xpose.msra.mxu0 %v3502_v28  ;;  %v3350_v29 = vpack.c.bf16 %v3348_v27, %v3348_v27 }
0x1d2c   :  { %5856 = vmatprep.subr.bf16.mxu0 %v6583_v20 }
0x1d2d   :  { %5829 = vmatmul.mubr.msk.bf16.vlgmr.msra.gmra.mrb[96].mxu1 %vm485_vm1, %v3350_v29 }
0x1d2e   :  { %5839 = vmatpush3.bf16.xpose.msra.mxu1 %v3452_v31  ;;  %5840 = vmatprep.mubr.msk.bf16.mxu1 %vm6584_vm0, %v6583_v20 }
0x1d2f   :  { %5850 = vmatprep.subr.bf16.mxu1 %v6583_v20 }
0x1d32   :  { %5847 = vmatmul.mubr.msk.bf16.vlgmr.msra.gmra.mrb[100].mxu0 %vm485_vm1, %v3495_v32 }
0x1d33   :  { %5858 = vmatprep.mubr.msk.bf16.mxu0 %vm6584_vm0, %v6583_v20 }
0x1d35   :  { %5841 = vmatmul.mubr.msk.bf16.vlgmr.msra.gmra.mrb[100].mxu1 %vm485_vm1, %v3445_v35 }
0x1d36   :  { %5852 = vmatprep.mubr.msk.bf16.mxu1 %vm6584_vm0, %v6583_v20 }
0x1dfc   :  { %v7554_v22 = vpop.f32.mrb[96].mxu0 }
0x1dfd   :  { %v5836_v37 = vpop.f32.mrb[97].mxu0 }
0x1dfe   :  { %v3441_v41 = vpop.f32.mrb[98].mxu0 }
0x1dff   :  { %v5837_v42 = vpop.f32.mrb[99].mxu0 }
0x1e00   :  { %v7556_v49 = vpop.f32.mrb[96].mxu1 }
0x1e01   :  { %v6043_v50 = vpack.i.bf16 %v7554_v22, %v7556_v49  ;;  %v5830_v60 = vpop.f32.mrb[97].mxu1 }
0x1e02   :  { %v3395_v61 = vpop.f32.mrb[98].mxu1 }
0x1e03   :  { %v5831_v1 = vpop.f32.mrb[99].mxu1 }
0x1e05   :  { %v3538_v36 = vpop.f32.mrb[100].mxu0 }
0x1e06   :  { %v3545_v2 = vsel %vm7433_vm3, -65504.0, %v3538_v36  ;;  %v5848_v33 = vpop.f32.mrb[101].mxu0 }
0x1e07   :  { %v3549_v3 = vsel %vm485_vm1, %v3545_v2, -inf  ;;  %v3541_v52 = vpop.f32.mrb[102].mxu0 }
0x1e08   :  { %3550 = vmax.xlane.f32.xlu0 %v3549_v3  ;;  %v3488_v43 = vpop.f32.mrb[100].mxu1  ;;  %v5849_v48 = vpop.f32.mrb[103].mxu0 }
0x1e09   :  { %v3544_v53 = vsel %vm7424_vm2, -65504.0, %v3488_v43  ;;  %v5842_v54 = vpop.f32.mrb[101].mxu1 }
0x1e0a   :  { %v3546_v47 = vsel %vm485_vm1, %v3544_v53, -inf  ;;  %v3491_v55 = vpop.f32.mrb[102].mxu1 }
0x1e0b   :  { %3547 = vmax.xlane.f32.xlu1 %v3546_v47  ;;  %v5843_v4 = vpop.f32.mrb[103].mxu1 }
0x1e1c   :  { %3570 = vrot.lane.b32.xlu1 %v7387_v26, %s6587_s1 }
0x1e20   :  { %3664 = vrot.lane.b32.xlu1 %v7385_v39, %s7899_s27 }
0x1e24   :  { %3714 = vrot.lane.b32.xlu1 %v7392_v38, %s7899_s27 }
0x1e28   :  { %3662 = vrot.lane.b32.xlu1 %v7399_v59, %s7899_s27 }
0x1e95   :  { %v3551_v8 = vpop.xlane.xlu0 %3550 }
0x1e96   :  { %v3553_v9 = vsub.f32 %v3545_v2, %v3551_v8 }
0x1e98   :  { %v3556_v5 = vmul.f32 1.442695, %v3553_v9  ;;  %v3548_v6 = vpop.xlane.xlu1 %3547 }
0x1e99   :  { %v3552_v7 = vsub.f32 %v3544_v53, %v3548_v6 }
0x1e9a   :  { %6285 = vpow2.f32 %v3556_v5 }
0x1e9b   :  { %v3554_v30 = vmul.f32 1.442695, %v3552_v7 }
0x1e9c   :  { %v3571_v62 = vpop.permute.xlu1 %3570 }
0x1e9d   :  { %6287 = vpow2.f32 %v3554_v30  ;;  %5851 = vmatpush3.bf16.msra.mxu1 %v3571_v62 }
0x1e9e   :  { %5862 = vmatprep.subr.bf16.mxu1 %v6583_v20 }
0x1ea0   :  { %v3665_v13 = vpop.permute.xlu1 %3664 }
0x1ea1   :  { %v3670_v35 = vsel %vm485_vm1, %v3665_v13, 0 }
0x1ea4   :  { %v6286_v63 = vpop.eup %6285  ;;  %v3715_v18 = vpop.permute.xlu1 %3714 }
0x1ea5   :  { %v3561_v15 = vsel %vm485_vm1, %v6286_v63, 0.0  ;;  %v3720_v31 = vsel %vm485_vm1, %v3715_v18, 0 }
0x1ea6   :  { %3562 = vadd.xlane.f32.xlu0 %v3561_v15 }
0x1ea7   :  { %v6288_v19 = vpop.eup %6287 }
0x1ea8   :  { %v3558_v21 = vsel %vm485_vm1, %v6288_v19, 0.0  ;;  %v3663_v41 = vpop.permute.xlu1 %3662 }
0x1eaa   :  { %3559 = vadd.xlane.f32.xlu0 %v3558_v21 }
0x1ec0   :  { %3616 = vrot.lane.b32.xlu0 %v7394_v40, %s6587_s1 }
0x1ec4   :  { %3712 = vrot.lane.b32.xlu0 %v7408_v34, %s7899_s27 }
0x1f33   :  { %v3563_v11 = vpop.xlane.xlu0 %3562 }
0x1f34   :  { %6289 = vrcp.f32 %v3563_v11 }
0x1f37   :  { %v3560_v12 = vpop.xlane.xlu0 %3559 }
0x1f38   :  { %6291 = vrcp.f32 %v3560_v12 }
0x1f3b   :  { %v3617_v14 = vpop.permute.xlu0 %3616 }
0x1f3c   :  { %5857 = vmatpush3.bf16.msra.mxu0 %v3617_v14 }
0x1f3d   :  { %5868 = vmatprep.subr.bf16.mxu0 %v6583_v20 }
0x1f3e   :  { %v6290_v16 = vpop.eup %6289 }
0x1f3f   :  { %v3567_v17 = vmul.f32 %v6290_v16, %v6286_v63  ;;  %v3713_v37 = vpop.permute.xlu0 %3712 }
0x1f41   :  { %v3569_v27 = vpack.c.bf16 %v3567_v17, %v3567_v17 }
0x1f42   :  { %v6292_v28 = vpop.eup %6291 }
0x1f43   :  { %v3566_v29 = vmul.f32 %v6292_v28, %v6288_v19  ;;  %5859 = vmatmul.mubr.msk.bf16.vlgmr.msra.gmra.mrb[104].mxu0 %vm485_vm1, %v3569_v27 }
0x1f44   :  { %5870 = vmatprep.mubr.msk.bf16.mxu0 %vm6584_vm0, %v6583_v20 }
0x1f45   :  { %5869 = vmatpush3.bf16.xpose.msra.mxu0 %v3720_v31  ;;  %v3568_v32 = vpack.c.bf16 %v3566_v29, %v3566_v29 }
0x1f46   :  { %5880 = vmatprep.subr.bf16.mxu0 %v6583_v20 }
0x1f47   :  { %5853 = vmatmul.mubr.msk.bf16.vlgmr.msra.gmra.mrb[104].mxu1 %vm485_vm1, %v3568_v32 }
0x1f48   :  { %5863 = vmatpush3.bf16.xpose.msra.mxu1 %v3670_v35  ;;  %5864 = vmatprep.mubr.msk.bf16.mxu1 %vm6584_vm0, %v6583_v20 }
0x1f49   :  { %5874 = vmatprep.subr.bf16.mxu1 %v6583_v20 }
0x1f4c   :  { %5871 = vmatmul.mubr.msk.bf16.vlgmr.msra.gmra.mrb[108].mxu0 %vm485_vm1, %v3713_v37 }
0x1f4d   :  { %5882 = vmatprep.mubr.msk.bf16.mxu0 %vm6584_vm0, %v6583_v20 }
0x1f4f   :  { %5865 = vmatmul.mubr.msk.bf16.vlgmr.msra.gmra.mrb[108].mxu1 %vm485_vm1, %v3663_v41 }
0x1f50   :  { %5876 = vmatprep.mubr.msk.bf16.mxu1 %vm6584_vm0, %v6583_v20 }
0x2016   :  { %v7598_v42 = vpop.f32.mrb[104].mxu0 }
0x2017   :  { %v5860_v60 = vpop.f32.mrb[105].mxu0 }
0x2018   :  { %v3659_v61 = vpop.f32.mrb[106].mxu0 }
0x2019   :  { %v5861_v1 = vpop.f32.mrb[107].mxu0 }
0x201a   :  { %v7600_v36 = vpop.f32.mrb[104].mxu1 }
0x201b   :  { %v6048_v2 = vpack.i.bf16 %v7598_v42, %v7600_v36  ;;  %v5854_v33 = vpop.f32.mrb[105].mxu1 }
0x201c   :  { %v3613_v3 = vpop.f32.mrb[106].mxu1 }
0x201d   :  { %v5855_v52 = vpop.f32.mrb[107].mxu1 }
0x201f   :  { %v3756_v43 = vpop.f32.mrb[108].mxu0 }
0x2020   :  { %v3763_v48 = vsel %vm7433_vm3, -65504.0, %v3756_v43  ;;  %v5872_v53 = vpop.f32.mrb[109].mxu0 }
0x2021   :  { %v3767_v54 = vsel %vm485_vm1, %v3763_v48, -inf  ;;  %v3759_v47 = vpop.f32.mrb[110].mxu0 }
0x2022   :  { %3768 = vmax.xlane.f32.xlu0 %v3767_v54  ;;  %v3706_v55 = vpop.f32.mrb[108].mxu1  ;;  %v5873_v4 = vpop.f32.mrb[111].mxu0 }
0x2023   :  { %v3762_v8 = vsel %vm7424_vm2, -65504.0, %v3706_v55  ;;  %v5866_v9 = vpop.f32.mrb[109].mxu1 }
0x2024   :  { %v3764_v5 = vsel %vm485_vm1, %v3762_v8, -inf  ;;  %v3709_v6 = vpop.f32.mrb[110].mxu1 }
0x2025   :  { %3765 = vmax.xlane.f32.xlu1 %v3764_v5  ;;  %v5867_v7 = vpop.f32.mrb[111].mxu1 }
0x2036   :  { %3788 = vrot.lane.b32.xlu1 %v7387_v26, %s7899_s27 }
0x203a   :  { %3882 = vrot.lane.b32.xlu1 %v7385_v39, %s6588_s8 }
0x203e   :  { %3932 = vrot.lane.b32.xlu1 %v7392_v38, %s6588_s8 }
0x2042   :  { %3880 = vrot.lane.b32.xlu1 %v7399_v59, %s6588_s8 }
0x20af   :  { %v3769_v30 = vpop.xlane.xlu0 %3768 }
0x20b0   :  { %v3771_v62 = vsub.f32 %v3763_v48, %v3769_v30 }
0x20b2   :  { %v3774_v63 = vmul.f32 1.442695, %v3771_v62  ;;  %v3766_v15 = vpop.xlane.xlu1 %3765 }
0x20b3   :  { %v3770_v19 = vsub.f32 %v3762_v8, %v3766_v15 }
0x20b4   :  { %6293 = vpow2.f32 %v3774_v63 }
0x20b5   :  { %v3772_v21 = vmul.f32 1.442695, %v3770_v19 }
0x20b6   :  { %v3789_v11 = vpop.permute.xlu1 %3788 }
0x20b7   :  { %6295 = vpow2.f32 %v3772_v21  ;;  %5875 = vmatpush3.bf16.msra.mxu1 %v3789_v11 }
0x20b8   :  { %5886 = vmatprep.subr.bf16.mxu1 %v6583_v20 }
0x20ba   :  { %v3883_v27 = vpop.permute.xlu1 %3882 }
0x20bb   :  { %v3888_v1 = vsel %vm485_vm1, %v3883_v27, 0 }
0x20be   :  { %v6294_v12 = vpop.eup %6293  ;;  %v3933_v32 = vpop.permute.xlu1 %3932 }
0x20bf   :  { %v3779_v13 = vsel %vm485_vm1, %v6294_v12, 0.0  ;;  %v3938_v60 = vsel %vm485_vm1, %v3933_v32, 0 }
0x20c0   :  { %3780 = vadd.xlane.f32.xlu0 %v3779_v13 }
0x20c1   :  { %v6296_v14 = vpop.eup %6295 }
0x20c2   :  { %v3776_v16 = vsel %vm485_vm1, %v6296_v14, 0.0  ;;  %v3881_v3 = vpop.permute.xlu1 %3880 }
0x20c4   :  { %3777 = vadd.xlane.f32.xlu0 %v3776_v16 }
0x20da   :  { %3834 = vrot.lane.b32.xlu0 %v7394_v40, %s7899_s27 }
0x20de   :  { %3930 = vrot.lane.b32.xlu0 %v7408_v34, %s6588_s8 }
0x214d   :  { %v3781_v17 = vpop.xlane.xlu0 %3780 }
0x214e   :  { %6297 = vrcp.f32 %v3781_v17 }
0x2151   :  { %v3778_v18 = vpop.xlane.xlu0 %3777 }
0x2152   :  { %6299 = vrcp.f32 %v3778_v18 }
0x2155   :  { %v3835_v28 = vpop.permute.xlu0 %3834 }
0x2156   :  { %5881 = vmatpush3.bf16.msra.mxu0 %v3835_v28 }
0x2157   :  { %5892 = vmatprep.subr.bf16.mxu0 %v6583_v20 }
0x2158   :  { %v6298_v29 = vpop.eup %6297 }
0x2159   :  { %v3785_v31 = vmul.f32 %v6298_v29, %v6294_v12  ;;  %v3931_v33 = vpop.permute.xlu0 %3930 }
0x215b   :  { %v3787_v35 = vpack.c.bf16 %v3785_v31, %v3785_v31 }
0x215c   :  { %v6300_v37 = vpop.eup %6299 }
0x215d   :  { %v3784_v41 = vmul.f32 %v6300_v37, %v6296_v14  ;;  %5883 = vmatmul.mubr.msk.bf16.vlgmr.msra.gmra.mrb[112].mxu0 %vm485_vm1, %v3787_v35 }
0x215e   :  { %5894 = vmatprep.mubr.msk.bf16.mxu0 %vm6584_vm0, %v6583_v20 }
0x215f   :  { %5893 = vmatpush3.bf16.xpose.msra.mxu0 %v3938_v60  ;;  %v3786_v61 = vpack.c.bf16 %v3784_v41, %v3784_v41 }
0x2160   :  { %5904 = vmatprep.subr.bf16.mxu0 %v6583_v20 }
0x2161   :  { %5877 = vmatmul.mubr.msk.bf16.vlgmr.msra.gmra.mrb[112].mxu1 %vm485_vm1, %v3786_v61 }
0x2162   :  { %5887 = vmatpush3.bf16.xpose.msra.mxu1 %v3888_v1  ;;  %5888 = vmatprep.mubr.msk.bf16.mxu1 %vm6584_vm0, %v6583_v20 }
0x2163   :  { %5898 = vmatprep.subr.bf16.mxu1 %v6583_v20 }
0x2166   :  { %5895 = vmatmul.mubr.msk.bf16.vlgmr.msra.gmra.mrb[116].mxu0 %vm485_vm1, %v3931_v33 }
0x2167   :  { %5906 = vmatprep.mubr.msk.bf16.mxu0 %vm6584_vm0, %v6583_v20 }
0x2169   :  { %5889 = vmatmul.mubr.msk.bf16.vlgmr.msra.gmra.mrb[116].mxu1 %vm485_vm1, %v3881_v3 }
0x216a   :  { %5900 = vmatprep.mubr.msk.bf16.mxu1 %vm6584_vm0, %v6583_v20 }
0x2230   :  { %v7642_v52 = vpop.f32.mrb[112].mxu0 }
0x2231   :  { %v5884_v43 = vpop.f32.mrb[113].mxu0 }
0x2232   :  { %v3877_v48 = vpop.f32.mrb[114].mxu0 }
0x2233   :  { %v5885_v53 = vpop.f32.mrb[115].mxu0 }
0x2234   :  { %v7644_v54 = vpop.f32.mrb[112].mxu1 }
0x2235   :  { %v6053_v47 = vpack.i.bf16 %v7642_v52, %v7644_v54  ;;  %v5878_v55 = vpop.f32.mrb[113].mxu1  ;;  %v6145_v52 = vld [vmem:[#allocation13] sm:$0xff]   ;;  %v6146_v54 = vld [vmem:[#allocation13 + $0x8] sm:$0xff]  }
0x2236   :  { %v3831_v4 = vpop.f32.mrb[114].mxu1 }
0x2237   :  { %v5879_v8 = vpop.f32.mrb[115].mxu1 }
0x2239   :  { %v3974_v9 = vpop.f32.mrb[116].mxu0 }
0x223a   :  { %v3981_v5 = vsel %vm7433_vm3, -65504.0, %v3974_v9  ;;  %v5896_v6 = vpop.f32.mrb[117].mxu0 }
0x223b   :  { %v3985_v7 = vsel %vm485_vm1, %v3981_v5, -inf  ;;  %v3977_v30 = vpop.f32.mrb[118].mxu0 }
0x223c   :  { %3986 = vmax.xlane.f32.xlu0 %v3985_v7  ;;  %v3924_v62 = vpop.f32.mrb[116].mxu1  ;;  %v5897_v63 = vpop.f32.mrb[119].mxu0 }
0x223d   :  { %v3980_v15 = vsel %vm7424_vm2, -65504.0, %v3924_v62  ;;  %v5890_v19 = vpop.f32.mrb[117].mxu1 }
0x223e   :  { %v3982_v21 = vsel %vm485_vm1, %v3980_v15, -inf  ;;  %v3927_v11 = vpop.f32.mrb[118].mxu1 }
0x223f   :  { %3983 = vmax.xlane.f32.xlu1 %v3982_v21  ;;  %v5891_v12 = vpop.f32.mrb[119].mxu1 }
0x2250   :  { %4006 = vrot.lane.b32.xlu1 %v7387_v26, %s6588_s8 }
0x2254   :  { %4100 = vrot.lane.b32.xlu1 %v7385_v39, %s6589_s14 }
0x2258   :  { %4150 = vrot.lane.b32.xlu1 %v7392_v38, %s6589_s14 }
0x225c   :  { %4098 = vrot.lane.b32.xlu1 %v7399_v59, %s6589_s14 }
0x22c9   :  { %v3987_v13 = vpop.xlane.xlu0 %3986 }
0x22ca   :  { %v3989_v14 = vsub.f32 %v3981_v5, %v3987_v13 }
0x22cc   :  { %v3992_v16 = vmul.f32 1.442695, %v3989_v14  ;;  %v3984_v17 = vpop.xlane.xlu1 %3983 }
0x22cd   :  { %v3988_v18 = vsub.f32 %v3980_v15, %v3984_v17 }
0x22ce   :  { %6301 = vpow2.f32 %v3992_v16 }
0x22cf   :  { %v3990_v27 = vmul.f32 1.442695, %v3988_v18 }
0x22d0   :  { %v4007_v28 = vpop.permute.xlu1 %4006 }
0x22d1   :  { %6303 = vpow2.f32 %v3990_v27  ;;  %5899 = vmatpush3.bf16.msra.mxu1 %v4007_v28 }
0x22d2   :  { %5910 = vmatprep.subr.bf16.mxu1 %v6583_v20 }
0x22d4   :  { %v4101_v60 = vpop.permute.xlu1 %4100 }
0x22d5   :  { %v4106_v8 = vsel %vm485_vm1, %v4101_v60, 0 }
0x22d8   :  { %v6302_v29 = vpop.eup %6301  ;;  %v4151_v3 = vpop.permute.xlu1 %4150 }
0x22d9   :  { %v3997_v31 = vsel %vm485_vm1, %v6302_v29, 0.0  ;;  %v4156_v55 = vsel %vm485_vm1, %v4151_v3, 0 }
0x22da   :  { %3998 = vadd.xlane.f32.xlu0 %v3997_v31 }
0x22db   :  { %v6304_v32 = vpop.eup %6303 }
0x22dc   :  { %v3994_v35 = vsel %vm485_vm1, %v6304_v32, 0.0  ;;  %v4099_v5 = vpop.permute.xlu1 %4098 }
0x22de   :  { %3995 = vadd.xlane.f32.xlu0 %v3994_v35 }
0x22f4   :  { %4052 = vrot.lane.b32.xlu0 %v7394_v40, %s6588_s8 }
0x22f8   :  { %4148 = vrot.lane.b32.xlu0 %v7408_v34, %s6589_s14 }
0x2367   :  { %v3999_v37 = vpop.xlane.xlu0 %3998 }
0x2368   :  { %6305 = vrcp.f32 %v3999_v37 }
0x236b   :  { %v3996_v41 = vpop.xlane.xlu0 %3995 }
0x236c   :  { %6307 = vrcp.f32 %v3996_v41 }
0x236f   :  { %v4053_v61 = vpop.permute.xlu0 %4052 }
0x2370   :  { %5905 = vmatpush3.bf16.msra.mxu0 %v4053_v61 }
0x2371   :  { %5916 = vmatprep.subr.bf16.mxu0 %v6583_v20 }
0x2372   :  { %v6306_v1 = vpop.eup %6305 }
0x2373   :  { %v4003_v33 = vmul.f32 %v6306_v1, %v6302_v29  ;;  %v4149_v9 = vpop.permute.xlu0 %4148 }
0x2375   :  { %v4005_v43 = vpack.c.bf16 %v4003_v33, %v4003_v33 }
0x2376   :  { %v6308_v48 = vpop.eup %6307 }
0x2377   :  { %v4002_v53 = vmul.f32 %v6308_v48, %v6304_v32  ;;  %5907 = vmatmul.mubr.msk.bf16.vlgmr.msra.gmra.mrb[120].mxu0 %vm485_vm1, %v4005_v43 }
0x2378   :  { %5918 = vmatprep.mubr.msk.bf16.mxu0 %vm6584_vm0, %v6583_v20 }
0x2379   :  { %5917 = vmatpush3.bf16.xpose.msra.mxu0 %v4156_v55  ;;  %v4004_v4 = vpack.c.bf16 %v4002_v53, %v4002_v53 }
0x237a   :  { %5928 = vmatprep.subr.bf16.mxu0 %v6583_v20 }
0x237b   :  { %5901 = vmatmul.mubr.msk.bf16.vlgmr.msra.gmra.mrb[120].mxu1 %vm485_vm1, %v4004_v4 }
0x237c   :  { %5911 = vmatpush3.bf16.xpose.msra.mxu1 %v4106_v8  ;;  %5912 = vmatprep.mubr.msk.bf16.mxu1 %vm6584_vm0, %v6583_v20 }
0x237d   :  { %5922 = vmatprep.subr.bf16.mxu1 %v6583_v20 }
0x2380   :  { %5919 = vmatmul.mubr.msk.bf16.vlgmr.msra.gmra.mrb[124].mxu0 %vm485_vm1, %v4149_v9 }
0x2381   :  { %5930 = vmatprep.mubr.msk.bf16.mxu0 %vm6584_vm0, %v6583_v20 }
0x2383   :  { %5913 = vmatmul.mubr.msk.bf16.vlgmr.msra.gmra.mrb[124].mxu1 %vm485_vm1, %v4099_v5 }
0x2384   :  { %5924 = vmatprep.mubr.msk.bf16.mxu1 %vm6584_vm0, %v6583_v20 }
0x244a   :  { %v7686_v6 = vpop.f32.mrb[120].mxu0 }
0x244b   :  { %v5908_v7 = vpop.f32.mrb[121].mxu0 }
0x244c   :  { %v4095_v30 = vpop.f32.mrb[122].mxu0 }
0x244d   :  { %v5909_v62 = vpop.f32.mrb[123].mxu0 }
0x244e   :  { %v7688_v63 = vpop.f32.mrb[120].mxu1 }
0x244f   :  { %v6058_v15 = vpack.i.bf16 %v7686_v6, %v7688_v63  ;;  %v5902_v19 = vpop.f32.mrb[121].mxu1 }
0x2450   :  { %v4049_v21 = vpop.f32.mrb[122].mxu1 }
0x2451   :  { %v5903_v11 = vpop.f32.mrb[123].mxu1 }
0x2453   :  { %v4192_v12 = vpop.f32.mrb[124].mxu0 }
0x2454   :  { %v4199_v13 = vsel %vm7433_vm3, -65504.0, %v4192_v12  ;;  %v5920_v14 = vpop.f32.mrb[125].mxu0 }
0x2455   :  { %v4203_v16 = vsel %vm485_vm1, %v4199_v13, -inf  ;;  %v4195_v17 = vpop.f32.mrb[126].mxu0 }
0x2456   :  { %4204 = vmax.xlane.f32.xlu0 %v4203_v16  ;;  %v4142_v18 = vpop.f32.mrb[124].mxu1  ;;  %v5921_v27 = vpop.f32.mrb[127].mxu0 }
0x2457   :  { %v4198_v28 = vsel %vm7424_vm2, -65504.0, %v4142_v18  ;;  %v5914_v29 = vpop.f32.mrb[125].mxu1 }
0x2458   :  { %v4200_v31 = vsel %vm485_vm1, %v4198_v28, -inf  ;;  %v4145_v32 = vpop.f32.mrb[126].mxu1 }
0x2459   :  { %4201 = vmax.xlane.f32.xlu1 %v4200_v31  ;;  %v5915_v35 = vpop.f32.mrb[127].mxu1 }
0x246a   :  { %4224 = vrot.lane.b32.xlu1 %v7387_v26, %s6589_s14 }
0x246e   :  { %4318 = vrot.lane.b32.xlu1 %v7385_v39, %s6590_s30 }
0x2472   :  { %4368 = vrot.lane.b32.xlu1 %v7392_v38, %s6590_s30 }
0x2476   :  { %4316 = vrot.lane.b32.xlu1 %v7399_v59, %s6590_s30 }
0x24e3   :  { %v4205_v37 = vpop.xlane.xlu0 %4204 }
0x24e4   :  { %v4207_v41 = vsub.f32 %v4199_v13, %v4205_v37 }
0x24e6   :  { %v4210_v60 = vmul.f32 1.442695, %v4207_v41  ;;  %v4202_v61 = vpop.xlane.xlu1 %4201 }
0x24e7   :  { %v4206_v1 = vsub.f32 %v4198_v28, %v4202_v61 }
0x24e8   :  { %6309 = vpow2.f32 %v4210_v60 }
0x24e9   :  { %v4208_v33 = vmul.f32 1.442695, %v4206_v1 }
0x24ea   :  { %v4225_v3 = vpop.permute.xlu1 %4224 }
0x24eb   :  { %6311 = vpow2.f32 %v4208_v33  ;;  %5923 = vmatpush3.bf16.msra.mxu1 %v4225_v3 }
0x24ec   :  { %5934 = vmatprep.subr.bf16.mxu1 %v6583_v20 }
0x24ee   :  { %v4319_v55 = vpop.permute.xlu1 %4318 }
0x24ef   :  { %v4324_v21 = vsel %vm485_vm1, %v4319_v55, 0 }
0x24f2   :  { %v6310_v43 = vpop.eup %6309  ;;  %v4369_v5 = vpop.permute.xlu1 %4368 }
0x24f3   :  { %v4215_v39 = vsel %vm485_vm1, %v6310_v43, 0.0  ;;  %v4374_v19 = vsel %vm485_vm1, %v4369_v5, 0  ;;  %v6152_v5 = vld [vmem:[#allocation13 + $0x38] sm:$0xff]  }
0x24f4   :  { %4216 = vadd.xlane.f32.xlu0 %v4215_v39 }
0x24f5   :  { %v6312_v38 = vpop.eup %6311 }
0x24f6   :  { %v4212_v48 = vsel %vm485_vm1, %v6312_v38, 0.0  ;;  %v4317_v12 = vpop.permute.xlu1 %4316 }
0x24f8   :  { %4213 = vadd.xlane.f32.xlu0 %v4212_v48 }
0x250e   :  { %4270 = vrot.lane.b32.xlu0 %v7394_v40, %s6589_s14 }
0x2512   :  { %4366 = vrot.lane.b32.xlu0 %v7408_v34, %s6590_s30 }
0x2581   :  { %v4217_v59 = vpop.xlane.xlu0 %4216 }
0x2582   :  { %6313 = vrcp.f32 %v4217_v59 }
0x2585   :  { %v4214_v53 = vpop.xlane.xlu0 %4213 }
0x2586   :  { %6315 = vrcp.f32 %v4214_v53 }
0x2589   :  { %v4271_v4 = vpop.permute.xlu0 %4270 }
0x258a   :  { %5929 = vmatpush3.bf16.msra.mxu0 %v4271_v4  ;;  %v6148_v4 = vld [vmem:[#allocation13 + $0x18] sm:$0xff]  }
0x258b   :  { %5940 = vmatprep.subr.bf16.mxu0 %v6583_v20 }
0x258c   :  { %v6314_v8 = vpop.eup %6313 }
0x258d   :  { %v4221_v9 = vmul.f32 %v6314_v8, %v6310_v43  ;;  %v4367_v11 = vpop.permute.xlu0 %4366  ;;  %v6150_v8 = vld [vmem:[#allocation13 + $0x28] sm:$0xff]  }
0x258f   :  { %v4223_v7 = vpack.c.bf16 %v4221_v9, %v4221_v9  ;;  %v6151_v9 = vld [vmem:[#allocation13 + $0x30] sm:$0xff]  }
0x2590   :  { %v6316_v30 = vpop.eup %6315 }
0x2591   :  { %v4220_v62 = vmul.f32 %v6316_v30, %v6312_v38  ;;  %5931 = vmatmul.mubr.msk.bf16.vlgmr.msra.gmra.mrb[128].mxu0 %vm485_vm1, %v4223_v7 }
0x2592   :  { %5942 = vmatprep.mubr.msk.bf16.mxu0 %vm6584_vm0, %v6583_v20 }
0x2593   :  { %5941 = vmatpush3.bf16.xpose.msra.mxu0 %v4374_v19  ;;  %v4222_v34 = vpack.c.bf16 %v4220_v62, %v4220_v62 }
0x2594   :  { %5952 = vmatprep.subr.bf16.mxu0 %v6583_v20 }
0x2595   :  { %5925 = vmatmul.mubr.msk.bf16.vlgmr.msra.gmra.mrb[128].mxu1 %vm485_vm1, %v4222_v34 }
0x2596   :  { %5935 = vmatpush3.bf16.xpose.msra.mxu1 %v4324_v21  ;;  %5936 = vmatprep.mubr.msk.bf16.mxu1 %vm6584_vm0, %v6583_v20 }
0x2597   :  { %5946 = vmatprep.subr.bf16.mxu1 %v6583_v20 }
0x259a   :  { %5943 = vmatmul.mubr.msk.bf16.vlgmr.msra.gmra.mrb[132].mxu0 %vm485_vm1, %v4367_v11 }
0x259b   :  { %5954 = vmatprep.mubr.msk.bf16.mxu0 %vm6584_vm0, %v6583_v20 }
0x259d   :  { %5937 = vmatmul.mubr.msk.bf16.vlgmr.msra.gmra.mrb[132].mxu1 %vm485_vm1, %v4317_v12 }
0x259e   :  { %5948 = vmatprep.mubr.msk.bf16.mxu1 %vm6584_vm0, %v6583_v20 }
0x2664   :  { %v4310_v13 = vpop.f32.mrb[128].mxu0 }
0x2665   :  { %v5932_v14 = vpop.f32.mrb[129].mxu0 }
0x2666   :  { %v4313_v16 = vpop.f32.mrb[130].mxu0 }
0x2667   :  { %v5933_v17 = vpop.f32.mrb[131].mxu0 }
0x2668   :  { %v4264_v18 = vpop.f32.mrb[128].mxu1 }
0x2669   :  { %v6063_v27 = vpack.i.bf16 %v4310_v13, %v4264_v18  ;;  %v5926_v28 = vpop.f32.mrb[129].mxu1 }
0x266a   :  { %v4267_v29 = vpop.f32.mrb[130].mxu1 }
0x266b   :  { %v5927_v31 = vpop.f32.mrb[131].mxu1 }
0x266d   :  { %v4410_v32 = vpop.f32.mrb[132].mxu0 }
0x266e   :  { %v4417_v35 = vsel %vm7433_vm3, -65504.0, %v4410_v32  ;;  %v5944_v37 = vpop.f32.mrb[133].mxu0 }
0x266f   :  { %v4421_v41 = vsel %vm485_vm1, %v4417_v35, -inf  ;;  %v4413_v60 = vpop.f32.mrb[134].mxu0 }
0x2670   :  { %4422 = vmax.xlane.f32.xlu0 %v4421_v41  ;;  %v4360_v61 = vpop.f32.mrb[132].mxu1  ;;  %v5945_v1 = vpop.f32.mrb[135].mxu0 }
0x2671   :  { %v4416_v33 = vsel %vm7424_vm2, -65504.0, %v4360_v61  ;;  %v5938_v3 = vpop.f32.mrb[133].mxu1 }
0x2672   :  { %v4418_v43 = vsel %vm485_vm1, %v4416_v33, -inf  ;;  %v4363_v39 = vpop.f32.mrb[134].mxu1 }
0x2673   :  { %4419 = vmax.xlane.f32.xlu1 %v4418_v43  ;;  %v5939_v38 = vpop.f32.mrb[135].mxu1 }
0x2684   :  { %4442 = vrot.lane.b32.xlu1 %v7387_v26, %s6590_s30 }
0x2688   :  { %6039 = vrot.lane.b32.xlu1 %v6038_v46, %s6590_s30 }
0x268c   :  { %6044 = vrot.lane.b32.xlu1 %v6043_v50, %s6589_s14 }
0x2690   :  { %6049 = vrot.lane.b32.xlu1 %v6048_v2, %s6588_s8 }
0x2694   :  { %6059 = vrot.lane.b32.xlu1 %v6058_v15, %s6587_s1 }
0x26fd   :  { %v4423_v26 = vpop.xlane.xlu0 %4422 }
0x26fe   :  { %v4425_v57 = vsub.f32 %v4417_v35, %v4423_v26 }
0x2700   :  { %v4428_v58 = vmul.f32 1.442695, %v4425_v57  ;;  %v4420_v24 = vpop.xlane.xlu1 %4419 }
0x2701   :  { %v4424_v45 = vsub.f32 %v4416_v33, %v4420_v24 }
0x2702   :  { %6317 = vpow2.f32 %v4428_v58 }
0x2703   :  { %v4426_v46 = vmul.f32 1.442695, %v4424_v45 }
0x2704   :  { %v4443_v48 = vpop.permute.xlu1 %4442 }
0x2705   :  { %6319 = vpow2.f32 %v4426_v46  ;;  %5947 = vmatpush3.bf16.msra.mxu1 %v4443_v48 }
0x2706   :  { %5958 = vmatprep.subr.bf16.mxu1 %v6583_v20 }
0x2708   :  { %v6040_v14 = vpop.permute.xlu1 %6039 }
0x2709   :  { %v6041_v28 = vunpack.i.l.bf16 %v6040_v14 }
0x270b   :  { %v4590_v60 = vsel %vm485_vm1, %v7468_v44, %v6041_v28  ;;  %v6176_v28 = vld [vmem:[#allocation14 + $0x74] ss:$8 sps:$4 sm:$0xff]  }
0x270c   :  { %v6318_v22 = vpop.eup %6317  ;;  %v6045_v16 = vpop.permute.xlu1 %6044 }
0x270d   :  { %v4433_v49 = vsel %vm485_vm1, %v6318_v22, 0.0  ;;  %v6046_v29 = vunpack.i.l.bf16 %v6045_v16 }
0x270e   :  { %4434 = vadd.xlane.f32.xlu0 %v4433_v49 }
0x270f   :  { %v6320_v50 = vpop.eup %6319  ;;  %v4592_v1 = vsel %vm2328_vm8, %v4590_v60, %v6046_v29  ;;  %v6177_v29 = vld [vmem:[#allocation16 + $0x40] sm:$0xff]   ;;  %v6183_v60 = vld [vmem:[#allocation16 + $0x58] sm:$0xff]  }
0x2710   :  { %v4430_v42 = vsel %vm485_vm1, %v6320_v50, 0.0  ;;  %v6050_v18 = vpop.permute.xlu1 %6049 }
0x2711   :  { %v6052_v31 = vunpack.i.h.bf16 %v6050_v18  ;;  %v6051_v32 = vunpack.i.l.bf16 %v6050_v18  ;;  %v6173_v18 = vld [vmem:[#allocation14 + $0x64] ss:$8 sps:$4 sm:$0xff]  }
0x2712   :  { %4431 = vadd.xlane.f32.xlu0 %v4430_v42 }
0x2713   :  { %v4594_v43 = vsel %vm2331_vm9, %v4592_v1, %v6051_v32  ;;  %v6179_v32 = vld [vmem:[#allocation16 + $0x48] sm:$0xff]   ;;  %v6185_v1 = vld [vmem:[#allocation16 + $0x60] sm:$0xff]  }
0x2714   :  { %v6060_v3 = vpop.permute.xlu1 %6059 }
0x2715   :  { %v6061_v24 = vunpack.i.l.bf16 %v6060_v3 }
0x2728   :  { %4488 = vrot.lane.b32.xlu0 %v7394_v40, %s6590_s30 }
0x272c   :  { %6054 = vrot.lane.b32.xlu0 %v6053_v47, %s7899_s27  ;;  %v6147_v47 = vld [vmem:[#allocation13 + $0x10] sm:$0xff]  }
0x2730   :  { %6064 = vrot.lane.b32.xlu0 %v6063_v27, %s6586_s4  ;;  %v6042_v27 = vunpack.i.h.bf16 %v6040_v14  ;;  %v6165_v14 = vld [vmem:[#allocation14 + $0x40] ss:$8 sps:$4 sm:$0xff]  }
0x2732   :  { %v4591_v41 = vsel %vm485_vm1, %v7473_v56, %v6042_v27  ;;  %v6062_v56 = vunpack.i.h.bf16 %v6060_v3  ;;  %v6171_v27 = vld [vmem:[#allocation14 + $0x60] ss:$8 sps:$4 sm:$0xff]  }
0x2733   :  { %v6187_v3 = vld [vmem:[#allocation16 + $0x68] sm:$0xff]  }
0x279b   :  { %v4435_v36 = vpop.xlane.xlu0 %4434 }
0x279c   :  { %6321 = vrcp.f32 %v4435_v36 }
0x279f   :  { %v4432_v2 = vpop.xlane.xlu0 %4431 }
0x27a0   :  { %6323 = vrcp.f32 %v4432_v2 }
0x27a3   :  { %v4489_v6 = vpop.permute.xlu0 %4488 }
0x27a4   :  { %5953 = vmatpush3.bf16.msra.mxu0 %v4489_v6  ;;  %v5282_v6 = vld [vmem:[%s7851_s13] ss:$0 sm:$0xff] }
0x27a6   :  { %v6322_v63 = vpop.eup %6321 }
0x27a7   :  { %v4439_v15 = vmul.f32 %v6322_v63, %v6318_v22  ;;  %v6055_v17 = vpop.permute.xlu0 %6054 }
0x27a8   :  { %v6057_v35 = vunpack.i.h.bf16 %v6055_v17  ;;  %v6056_v37 = vunpack.i.l.bf16 %v6055_v17  ;;  %v6168_v17 = vld [vmem:[#allocation14 + $0x50] ss:$8 sps:$4 sm:$0xff]  }
0x27a9   :  { %v4441_v59 = vpack.c.bf16 %v4439_v15, %v4439_v15 }
0x27aa   :  { %v6324_v53 = vpop.eup %6323  ;;  %v4596_v38 = vsel %vm2334_vm10, %v4594_v43, %v6056_v37  ;;  %v6181_v37 = vld [vmem:[#allocation16 + $0x50] sm:$0xff]  }
0x27ab   :  { %v4438_v55 = vmul.f32 %v6324_v53, %v6320_v50  ;;  %5955 = vmatmul.mubr.msk.bf16.vlgmr.msra.gmra.mrb[136].mxu0 %vm485_vm1, %v4441_v59  ;;  %v6065_v61 = vpop.permute.xlu0 %6064  ;;  %v4598_v44 = vsel %vm2337_vm11, %v4596_v38, %v6061_v24 }
0x27ac   :  { %4900 = vmatprep.mubr.bf16.mxu0 %v6582_v0  ;;  %v6149_v0 = vld [vmem:[#allocation13 + $0x20] sm:$0xff]   ;;  %v6067_v57 = vunpack.i.h.bf16 %v6065_v61  ;;  %v6066_v58 = vunpack.i.l.bf16 %v6065_v61  ;;  %v6184_v61 = vld [vmem:[#allocation16 + $0x18] sm:$0xff]  }
0x27ad   :  { %v4440_v40 = vpack.c.bf16 %v4438_v55, %v4438_v55 }
0x27ae   :  { %v4600_v49 = vsel %vm2340_vm12, %v4598_v44, %v6066_v58 }
0x27af   :  { %5949 = vmatmul.mubr.msk.bf16.vlgmr.msra.gmra.mrb[136].mxu1 %vm485_vm1, %v4440_v40 }
0x27b0   :  { %5974 = vmatprep.mubr.msk.bf16.mxu1 %vm6584_vm0, %v6583_v20  ;;  %5959 = vmatpush3.bf16.msra.mxu1 %v6145_v52 }
0x27b1   :  { %5960 = vmatprep.subr.bf16.mxu1 %v6583_v20 }
0x27b4   :  { %5961 = vmatpush3.bf16.msra.mxu1 %v6146_v54 }
0x27b5   :  { %5962 = vmatprep.subr.bf16.mxu1 %v6583_v20 }
0x27b8   :  { %5963 = vmatpush3.bf16.msra.mxu1 %v6147_v47  ;;  %v6153_v47 = vld [vmem:[#allocation14] ss:$8 sps:$4 sm:$0xff]  }
0x27b9   :  { %5964 = vmatprep.subr.bf16.mxu1 %v6583_v20 }
0x27bc   :  { %5965 = vmatpush3.bf16.msra.mxu1 %v6148_v4  ;;  %v6155_v4 = vld [vmem:[#allocation14 + $0x4] ss:$8 sps:$4 sm:$0xff]  }
0x27bd   :  { %5966 = vmatprep.subr.bf16.mxu1 %v6583_v20  ;;  %4868 = vmatprep.subr.bf16.mxu0 %v6155_v4 }
0x27be   :  { %4869 = vmatpush1.bf16.msra.mxu0 %v6153_v47 }
0x27c0   :  { %5967 = vmatpush3.bf16.msra.mxu1 %v6149_v0  ;;  %v6158_v0 = vld [vmem:[#allocation14 + $0x14] ss:$8 sps:$4 sm:$0xff]  }
0x27c1   :  { %5968 = vmatprep.subr.bf16.mxu1 %v6583_v20  ;;  %4870 = vmatprep.subr.bf16.mxu0 %v6158_v0 }
0x27c4   :  { %5969 = vmatpush3.bf16.msra.mxu1 %v6150_v8  ;;  %v6156_v8 = vld [vmem:[#allocation14 + $0x10] ss:$8 sps:$4 sm:$0xff]  }
0x27c5   :  { %5970 = vmatprep.subr.bf16.mxu1 %v6583_v20  ;;  %4871 = vmatpush1.bf16.msra.mxu0 %v6156_v8 }
0x27c8   :  { %5971 = vmatpush3.bf16.msra.mxu1 %v6151_v9 }
0x27c9   :  { %5972 = vmatprep.subr.bf16.mxu1 %v6583_v20  ;;  %v6047_v20 = vunpack.i.h.bf16 %v6045_v16  ;;  %v6170_v16 = vld [vmem:[#allocation14 + $0x54] ss:$8 sps:$4 sm:$0xff]  }
0x27cb   :  { %v4593_v33 = vsel %vm2328_vm8, %v4591_v41, %v6047_v20  ;;  %v6174_v20 = vld [vmem:[#allocation14 + $0x70] ss:$8 sps:$4 sm:$0xff]  }
0x27cc   :  { %5973 = vmatpush3.bf16.msra.mxu1 %v6152_v5  ;;  %v4595_v39 = vsel %vm2331_vm9, %v4593_v33, %v6052_v31  ;;  %v6178_v31 = vld [vmem:[#allocation16] sm:$0xff]   ;;  %v6182_v41 = vld [vmem:[#allocation16 + $0x10] sm:$0xff]  }
0x27cd   :  { %v4597_v26 = vsel %vm2334_vm10, %v4595_v39, %v6057_v35  ;;  %5492 = vmatprep.subr.bf16.mxu1 %v6177_v29  ;;  %v6180_v35 = vld [vmem:[#allocation16 + $0x8] sm:$0xff]   ;;  %v6186_v33 = vld [vmem:[#allocation16 + $0x20] sm:$0xff]  }
0x27ce   :  { %v4599_v46 = vsel %vm2337_vm11, %v4597_v26, %v6062_v56 }
0x27cf   :  { %v4601_v50 = vsel %vm2340_vm12, %v4599_v46, %v6067_v57 }
0x287e   :  { %v4528_v7 = vpop.f32.mrb[136].mxu0 }
0x287f   :  { %v5956_v30 = vpop.f32.mrb[137].mxu0 }
0x2880   :  { %v4531_v62 = vpop.f32.mrb[138].mxu0 }
0x2881   :  { %v5957_v19 = vpop.f32.mrb[139].mxu0 }
0x2882   :  { %v4482_v34 = vpop.f32.mrb[136].mxu1 }
0x2883   :  { %v6068_v21 = vpack.i.bf16 %v4528_v7, %v4482_v34  ;;  %v5950_v11 = vpop.f32.mrb[137].mxu1  ;;  %v6161_v34 = vld [vmem:[#allocation14 + $0x24] ss:$8 sps:$4 sm:$0xff]  }
0x2884   :  { %v4485_v12 = vpop.f32.mrb[138].mxu1  ;;  %4872 = vmatprep.subr.bf16.mxu0 %v6161_v34  ;;  %v6164_v11 = vld [vmem:[#allocation14 + $0x34] ss:$8 sps:$4 sm:$0xff]  }
0x2885   :  { %6069 = vrot.lane.b32.xlu1 %v6068_v21, %s6585_s7  ;;  %v5951_v13 = vpop.f32.mrb[139].mxu1  ;;  %v6159_v21 = vld [vmem:[#allocation14 + $0x20] ss:$8 sps:$4 sm:$0xff]   ;;  %v6162_v12 = vld [vmem:[#allocation14 + $0x30] ss:$8 sps:$4 sm:$0xff]  }
0x2886   :  { %4873 = vmatpush1.bf16.msra.mxu0 %v6159_v21  ;;  %v6167_v13 = vld [vmem:[#allocation14 + $0x44] ss:$8 sps:$4 sm:$0xff]  }
0x2887   :  { %4874 = vmatprep.subr.bf16.mxu0 %v6164_v11 }
0x288a   :  { %4875 = vmatpush1.bf16.msra.mxu0 %v6162_v12 }
0x288b   :  { %4876 = vmatprep.subr.bf16.mxu0 %v6167_v13 }
0x288e   :  { %4877 = vmatpush1.bf16.msra.mxu0 %v6165_v14 }
0x288f   :  { %4878 = vmatprep.subr.bf16.mxu0 %v6170_v16 }
0x2892   :  { %4879 = vmatpush1.bf16.msra.mxu0 %v6168_v17 }
0x2893   :  { %4880 = vmatprep.subr.bf16.mxu0 %v6173_v18 }
0x2896   :  { %4881 = vmatpush1.bf16.msra.mxu0 %v6171_v27 }
0x2897   :  { %4882 = vmatprep.subr.bf16.mxu0 %v6176_v28 }
0x289a   :  { %4883 = vmatpush1.bf16.msra.mxu0 %v6174_v20 }
0x28f7   :  { %v6070_v45 = vpop.permute.xlu1 %6069 }
0x28f8   :  { %v6072_v48 = vunpack.i.h.bf16 %v6070_v45  ;;  %v6071_v22 = vunpack.i.l.bf16 %v6070_v45  ;;  %v5291_v45 = vld [vmem:[%s7858_s20] ss:$0 sm:$0xff] }
0x28fa   :  { %v4603_v42 = vsel %vm2343_vm13, %v4601_v50, %v6072_v48  ;;  %v4602_v36 = vsel %vm2343_vm13, %v4600_v49, %v6071_v22  ;;  %v5292_v22 = vld [vmem:[%s7859_s21] ss:$0 sm:$0xff] }
0x28fb   :  { %v4604_v2 = vpack.c.bf16 %v4603_v42, %v4602_v36 }
0x28fd   :  { %5975 = vmatmul.mubr.bf16.vlgmr.msra.gmra.mrb[140].mxu1 %v4604_v2  ;;  %v6188_v2 = vld [vmem:[#allocation16 + $0x28] sm:$0xff]  }
0x28fe   :  { %5493 = vmatpush3.bf16.msra.mxu1 %v6178_v31 }
0x28ff   :  { %5494 = vmatprep.subr.bf16.mxu1 %v6179_v32 }
0x2902   :  { %5495 = vmatpush3.bf16.msra.mxu1 %v6180_v35 }
0x2903   :  { %5496 = vmatprep.subr.bf16.mxu1 %v6181_v37 }
0x2906   :  { %5497 = vmatpush3.bf16.msra.mxu1 %v6182_v41 }
0x2907   :  { %5498 = vmatprep.subr.bf16.mxu1 %v6183_v60 }
0x290a   :  { %5499 = vmatpush3.bf16.msra.mxu1 %v6184_v61 }
0x290b   :  { %5500 = vmatprep.subr.bf16.mxu1 %v6185_v1 }
0x290e   :  { %5501 = vmatpush3.bf16.msra.mxu1 %v6186_v33 }
0x290f   :  { %5502 = vmatprep.subr.bf16.mxu1 %v6187_v3 }
0x2912   :  { %5503 = vmatpush3.bf16.msra.mxu1 %v6188_v2 }
0x29d0   :  { %v4710_v63 = vpop.f32.mrb[140].mxu1 }
0x29d1   :  { %v4711_v15 = vadd.f32 %v5282_v6, %v4710_v63  ;;  %v5976_v59 = vpop.f32.mrb[141].mxu1  ;;  %v6190_v63 = vld [vmem:[#allocation16 + $0x30] sm:$0xff]  }
0x29d2   :  { %v4713_v53 = vpop.f32.mrb[142].mxu1  ;;  %v6192_v59 = vld [vmem:[#allocation16 + $0x38] sm:$0xff]  }
0x29d3   :  { %v4717_v55 = vadd.f32 %v4711_v15, %v7372_v10  ;;  %v4714_v40 = vadd.f32 %v5282_v6, %v4713_v53  ;;  %v5977_v52 = vpop.f32.mrb[143].mxu1  ;;  %v6189_v6 = vld [vmem:[#allocation16 + $0x70] sm:$0xff]   ;;  %v6191_v15 = vld [vmem:[#allocation16 + $0x78] sm:$0xff]  }
0x29d4   :  { %5504 = vmatprep.subr.bf16.mxu1 %v6189_v6  ;;  %v4776_v53 = vld [vmem:[%s7853_s15] sm:$0x3] }
0x29d5   :  { %v4718_v54 = vadd.f32 %v4714_v40, %v7374_v51  ;;  %4719 = vadd.xlane.f32.xlu0 %v4717_v55  ;;  %5505 = vmatpush3.bf16.msra.mxu1 %v6190_v63  ;;  %v4785_v40 = vrot.slane %v4776_v53, %v6890_v23  ;;  %v5309_v23 = vld [vmem:[%s7855_s17] ss:$0 sm:$0xff] }
0x29d6   :  { %5506 = vmatprep.subr.bf16.mxu1 %v6191_v15 }
0x29d7   :  { %4721 = vadd.xlane.f32.xlu1 %v4718_v54 }
0x29d9   :  { %5507 = vmatpush3.bf16.msra.mxu1 %v6192_v59 }
0x2a62   :  { %v4720_v9 = vpop.xlane.xlu0 %4719 }
0x2a63   :  { %v4723_v5 = vmul.f32 0.0078125, %v4720_v9 }
0x2a64   :  { %v4722_v7 = vpop.xlane.xlu1 %4721 }
0x2a65   :  { %v4725_v30 = vsub.f32 %v4717_v55, %v4723_v5  ;;  %v4724_v62 = vmul.f32 0.0078125, %v4722_v7  ;;  %v4781_v55 = vrot.slane %v4776_v53, %v6898_v25 }
0x2a67   :  { %v7798_v10 = vsub.f32 %v4718_v54, %v4724_v62  ;;  %v4727_v19 = vmul.f32 %v4725_v30, %v4725_v30 }
0x2a69   :  { %4729 = vadd.xlane.f32.xlu0 %v4727_v19  ;;  %v4728_v51 = vmul.f32 %v7798_v10, %v7798_v10 }
0x2a6d   :  { %4731 = vadd.xlane.f32.xlu0 %v4728_v51 }
0x2af6   :  { %v4730_v43 = vpop.xlane.xlu0 %4729 }
0x2af7   :  { %v4733_v39 = vmul.f32 0.0078125, %v4730_v43 }
0x2af9   :  { %v4735_v38 = vadd.f32 1e-05, %v4733_v39  ;;  %v5326_v39 = vld [vmem:[%s7860_s22] ss:$0 sm:$0xff] }
0x2afa   :  { %v4732_v26 = vpop.xlane.xlu0 %4731 }
0x2afb   :  { %6325 = vrsqrt.f32 %v4735_v38  ;;  %v4734_v57 = vmul.f32 0.0078125, %v4732_v26 }
0x2afd   :  { %v4736_v58 = vadd.f32 1e-05, %v4734_v57  ;;  %v5327_v57 = vld [vmem:[%s7912_s5] ss:$0 sm:$0xff] }
0x2aff   :  { %6327 = vrsqrt.f32 %v4736_v58 }
0x2b05   :  { %v6326_v56 = vpop.eup %6325 }
0x2b06   :  { %v4739_v24 = vmul.f32 %v6326_v56, %v4725_v30 }
0x2b08   :  { %v4748_v48 = vmul.f32 %v5291_v45, %v4739_v24 }
0x2b09   :  { %v6328_v44 = vpop.eup %6327 }
0x2b0a   :  { %v4740_v46 = vmul.f32 %v6328_v44, %v7798_v10  ;;  %v4757_v50 = vadd.f32 %v5292_v22, %v4748_v48 }
0x2b0c   :  { %v4749_v49 = vmul.f32 %v5291_v45, %v4740_v46 }
0x2b0e   :  { %v4758_v42 = vadd.f32 %v5292_v22, %v4749_v49 }
0x2b10   :  { %v4759_v36 = vpack.c.bf16 %v4758_v42, %v4757_v50 }
0x2b12   :  { %4901 = vmatmul.mubr.bf16.vlgmr.msra.gmra.mrb[140].mxu0 %v4759_v36 }
0x2be5   :  { %v4902_v52 = vpop.f32.mrb[140].mxu0 }
0x2be6   :  { %v4903_v54 = vadd.f32 %v4902_v52, %v4781_v55  ;;  %v4904_v47 = vpop.f32.mrb[141].mxu0 }
0x2be7   :  { %v4905_v4 = vadd.f32 %v4904_v47, %v4785_v40  ;;  %v4906_v0 = vpop.f32.mrb[142].mxu0 }
0x2be8   :  { %v4907_v8 = vadd.f32 %v4906_v0, %v4781_v55  ;;  %v4908_v9 = vpop.f32.mrb[143].mxu0  ;;  %v4911_v7 = vmax.f32 %v4903_v54, 0.0 }
0x2be9   :  { %v4909_v5 = vadd.f32 %v4908_v9, %v4785_v40  ;;  %v4912_v62 = vmax.f32 %v4905_v4, 0.0 }
0x2bea   :  { %v4913_v30 = vmax.f32 %v4907_v8, 0.0 }
0x2beb   :  { %v4914_v10 = vmax.f32 %v4909_v5, 0.0 }
0x2bec   :  { %v4915_v19 = vpack.c.bf16 %v4913_v30, %v4911_v7 }
0x2bed   :  { %v4916_v51 = vpack.c.bf16 %v4914_v10, %v4912_v62 }
0x2bef   :  { %5084 = vmatprep.mubr.bf16.mxu1 %v4916_v51 }
0x2bf0   :  { %5085 = vmatmul.mubr.bf16.vlgmr.msra.gmra.mrb[144].mxu1 %v4915_v19 }
0x2cc3   :  { %v5508_v34 = vpop.f32.mrb[144].mxu1 }
0x2cc4   :  { %v5509_v25 = vpop.f32.mrb[145].mxu1 }
0x2cc5   :  { %v5510_v21 = vadd.f32 %v5509_v25, %v5508_v34  ;;  %v5511_v11 = vpop.f32.mrb[146].mxu1 }
0x2cc6   :  { %v5512_v12 = vpop.f32.mrb[147].mxu1 }
0x2cc7   :  { %v5087_v13 = vadd.f32 %v5510_v21, %v5309_v23  ;;  %v5513_v14 = vadd.f32 %v5512_v12, %v5511_v11 }
0x2cc9   :  { %v5090_v16 = vadd.f32 %v5513_v14, %v5309_v23  ;;  %v5093_v17 = vadd.f32 %v5087_v13, %v4757_v50 }
0x2ccb   :  { %5095 = vadd.xlane.f32.xlu0 %v5093_v17  ;;  %v5094_v18 = vadd.f32 %v5090_v16, %v4758_v42 }
0x2ccd   :  { %5097 = vadd.xlane.f32.xlu1 %v5094_v18 }
0x2d58   :  { %v5096_v27 = vpop.xlane.xlu0 %5095 }
0x2d59   :  { %v5099_v28 = vmul.f32 0.0078125, %v5096_v27 }
0x2d5a   :  { %v5098_v20 = vpop.xlane.xlu1 %5097 }
0x2d5b   :  { %v5101_v29 = vsub.f32 %v5093_v17, %v5099_v28  ;;  %v5100_v31 = vmul.f32 0.0078125, %v5098_v20 }
0x2d5d   :  { %v5102_v32 = vsub.f32 %v5094_v18, %v5100_v31  ;;  %v5103_v35 = vmul.f32 %v5101_v29, %v5101_v29 }
0x2d5f   :  { %5105 = vadd.xlane.f32.xlu0 %v5103_v35  ;;  %v5104_v37 = vmul.f32 %v5102_v32, %v5102_v32 }
0x2d61   :  { %5107 = vadd.xlane.f32.xlu1 %v5104_v37 }
0x2dec   :  { %v5106_v41 = vpop.xlane.xlu0 %5105 }
0x2ded   :  { %v5109_v60 = vmul.f32 0.0078125, %v5106_v41 }
0x2dee   :  { %v5108_v61 = vpop.xlane.xlu1 %5107 }
0x2def   :  { %v5111_v1 = vadd.f32 1e-05, %v5109_v60  ;;  %v5110_v33 = vmul.f32 0.0078125, %v5108_v61 }
0x2df1   :  { %6329 = vrsqrt.f32 %v5111_v1  ;;  %v5112_v3 = vadd.f32 1e-05, %v5110_v33 }
0x2df3   :  { %6331 = vrsqrt.f32 %v5112_v3 }
0x2dfb   :  { %v6330_v43 = vpop.eup %6329 }
0x2dfc   :  { %v5115_v38 = vmul.f32 %v6330_v43, %v5101_v29 }
0x2dfd   :  { %v6332_v26 = vpop.eup %6331 }
0x2dfe   :  { %v5116_v58 = vmul.f32 %v6332_v26, %v5102_v32  ;;  %v5124_v56 = vmul.f32 %v5326_v39, %v5115_v38 }
0x2e00   :  { %v5125_v24 = vmul.f32 %v5326_v39, %v5116_v58  ;;  %v5133_v45 = vadd.f32 %v5327_v57, %v5124_v56 }
0x2e02   :  { %v5134_v44 = vadd.f32 %v5327_v57, %v5125_v24  ;;  %5135 = vst [vmem:[#allocation17] sm:$0xff] %v5133_v45 }
0x2e04   :  { %5136 = vst [vmem:[#allocation17 + $0x8] sm:$0xff] %v5134_v44 }
0x2e05   :  { %6544 = shalt.err (!%p6541_p6)
}
0x2e06   :  { %s7913_s26 = sld [smem:[#allocation34_spill]] }
0x2e0c   :  { %s6545_s18 = scalar_lea.hbm %s7913_s26, 256 }
0x2e0d   :  { %p6546_p7 = scmp.ne.s32.totalorder %s7913_s26, %s6545_s18  ;;  %p6549_p8 = scmp.lt.u32.totalorder %s6545_s18, %s7913_s26 }
0x2e0f   :  { %p6551_p9 = pnand %p6549_p8, %p6546_p7 }
0x2e11   :  { %6554 = shalt.err (!%p6551_p9)
}
0x2e12   :  { %s7914_s24 = smov 128  }
0x2e13   :  { %5148 = dma.vmem_to_hbm [thread:$0]  %s5143_s12, 256, %s7913_s26, [#allocation4], %s7914_s24, %s7914_s24, %s7893_s0  }
0x2e14   :  { %6565 = dma.done.wait [#allocation4], 256  }
0x2e15   :  { %6566 = vsyncadd [#allocation4], 4294967040 }
0x2e16   :  { %5152 = vsyncpa [#allocation3], 1 }
0x2e17   :  { %5153 = vsyncpa [#allocation6], 1 }
0x2e18   :  { %5154 = vsyncpa [#allocation9], 1 }
0x2e19   :  { %5155 = vsyncpa [#allocation12], 1 }
0x2e1a   :  { %5156 = vsyncpa [#allocation15], 1 }
0x2e1b   :  { %5157 = vsyncpa [#allocation4], 1 }

</bundles_post_ra>
